<compile_context>
chip_gen: v6e
topology: v6e:2x2x1
jax: 0.10.0
libtpu: 0.0.40
codegen_flags: <defaults>
</compile_context>

<pallas_src>
import functools
import math

import jax
import jax.numpy as jnp
from jax.experimental import pallas as pl
from jax.experimental.pallas import tpu as pltpu

INPUT_DIM = 32043
NUM_CLASSES = 11
BN_EPS = 1e-5
LANE = 128          # TPU lane width; final logits padded to this for dense stores
NUM_K_STEPS = 3     # first-layer K-reduction grid length


def _round_up(x, m):
    return ((x + m - 1) // m) * m


# K tile for the dominant first layer: smallest lane-aligned tile giving
# NUM_K_STEPS grid steps.  TK = 10752 -> k_pad = 32256 (213 rows of zeros).
TK = _round_up(math.ceil(INPUT_DIM / NUM_K_STEPS), LANE)
K_PAD = TK * NUM_K_STEPS


def _mlp_fused_kernel(*refs, n_hidden_tail):
    """Whole-MLP forward in one kernel.

    refs = (x, W1, b1, scale1, shift1,
            [W, b, scale, shift] * n_hidden_tail,
            W_last, b_last,               # padded to LANE output columns
            o_ref,                        # output (lane-dense logits)
            acc_ref)                      # fp32 accumulator scratch
    """
    it = iter(refs)
    x_ref = next(it)
    w1_ref = next(it)
    b1_ref = next(it)
    s1_ref = next(it)
    sh1_ref = next(it)
    tail = []
    for _ in range(n_hidden_tail):
        tail.append((next(it), next(it), next(it), next(it)))
    wl_ref = next(it)
    bl_ref = next(it)
    o_ref = next(it)
    acc_ref = next(it)

    k = pl.program_id(0)

    @pl.when(k == 0)
    def _():
        acc_ref[...] = jnp.zeros_like(acc_ref)

    # First (large) Linear: accumulate one K-tile of x @ W1 on the MXU.
    acc_ref[...] += jnp.dot(x_ref[...], w1_ref[...],
                            preferred_element_type=jnp.float32)

    @pl.when(k == pl.num_programs(0) - 1)
    def _():
        # Layer-1 epilogue: bias + folded BatchNorm(eval) + ReLU.
        h = acc_ref[...] + b1_ref[...]
        h = jnp.maximum(h * s1_ref[...] + sh1_ref[...], 0.0)
        # Remaining hidden layers (tiny; weights fully resident in VMEM).
        for (w_ref, b_ref, s_ref, sh_ref) in tail:
            h = jnp.dot(h, w_ref[...], preferred_element_type=jnp.float32)
            h = h + b_ref[...]
            h = jnp.maximum(h * s_ref[...] + sh_ref[...], 0.0)
        # Final classifier Linear (output padded to LANE columns -> unmasked vst).
        logits = jnp.dot(h, wl_ref[...], preferred_element_type=jnp.float32)
        logits = logits + bl_ref[...]
        o_ref[...] = logits.astype(o_ref.dtype)


def init_params(key, output_dims):
    """Deterministic synthetic parameters with the same shapes as modelobest.__init__.

    Linear weights are stored as [F_in, F_out] (transpose of PyTorch's [out, in])
    so kernels compute x @ W directly on the MXU.
    """
    params = []
    in_dim = INPUT_DIM
    for out_dim in output_dims:
        key, kw, kb, kg, kbe, km, kv = jax.random.split(key, 7)
        bound = 1.0 / float(in_dim) ** 0.5
        params.append(dict(
            w=jax.random.uniform(kw, (in_dim, out_dim), jnp.float32, -bound, bound),
            b=jax.random.uniform(kb, (out_dim,), jnp.float32, -bound, bound),
            gamma=jax.random.uniform(kg, (out_dim,), jnp.float32, 0.5, 1.5),
            beta=jax.random.uniform(kbe, (out_dim,), jnp.float32, -0.1, 0.1),
            mean=jax.random.uniform(km, (out_dim,), jnp.float32, -0.1, 0.1),
            var=jax.random.uniform(kv, (out_dim,), jnp.float32, 0.5, 1.5),
        ))
        in_dim = out_dim
    key, kw, kb = jax.random.split(key, 3)
    bound = 1.0 / float(in_dim) ** 0.5
    params.append(dict(
        w=jax.random.uniform(kw, (in_dim, NUM_CLASSES), jnp.float32, -bound, bound),
        b=jax.random.uniform(kb, (NUM_CLASSES,), jnp.float32, -bound, bound),
    ))
    return params


def prepare_params(params):
    """One-time parameter prep (hoisted out of the forward pass):
       - fold BatchNorm1d(eval) into per-feature scale/shift,
       - zero-pad the first-layer weight along K to K_PAD (= NUM_K_STEPS * TK),
       - zero-pad the last layer to LANE output columns (lane-dense stores)."""
    first = params[0]
    n1 = first["w"].shape[1]
    scale1 = first["gamma"] * jax.lax.rsqrt(first["var"] + BN_EPS)
    shift1 = first["beta"] - first["mean"] * scale1
    prep = {
        "w1": jnp.pad(first["w"], ((0, K_PAD - INPUT_DIM), (0, 0))).astype(jnp.float32),
        "b1": first["b"].reshape(1, n1).astype(jnp.float32),
        "scale1": scale1.reshape(1, n1).astype(jnp.float32),
        "shift1": shift1.reshape(1, n1).astype(jnp.float32),
        "tail": [],
    }
    for layer in params[1:-1]:
        n = layer["w"].shape[1]
        scale = layer["gamma"] * jax.lax.rsqrt(layer["var"] + BN_EPS)
        shift = layer["beta"] - layer["mean"] * scale
        prep["tail"].append(dict(
            w=layer["w"].astype(jnp.float32),
            b=layer["b"].reshape(1, n).astype(jnp.float32),
            scale=scale.reshape(1, n).astype(jnp.float32),
            shift=shift.reshape(1, n).astype(jnp.float32),
        ))
    last = params[-1]
    n_in, n_out = last["w"].shape
    n_out_pad = _round_up(n_out, LANE)
    prep["w_last"] = jnp.pad(
        last["w"], ((0, 0), (0, n_out_pad - n_out))).astype(jnp.float32)
    prep["b_last"] = jnp.pad(
        last["b"], (0, n_out_pad - n_out)).reshape(1, n_out_pad).astype(jnp.float32)
    return prep


def modelobest_forward(prep, x):
    """Eval-mode forward: [Linear -> BN -> ReLU -> (Dropout=id)]* -> Linear,
    fused into a single pallas_call."""
    M, K = x.shape
    k_pad = prep["w1"].shape[0]
    if k_pad != K:
        # Padding x is cheap (activation is tiny vs. the 16 MB weight stream).
        x = jnp.pad(x, ((0, 0), (0, k_pad - K)))
    n1 = prep["w1"].shape[1]
    n_out_pad = prep["w_last"].shape[1]
    n_hidden_tail = len(prep["tail"])

    inputs = [x, prep["w1"], prep["b1"], prep["scale1"], prep["shift1"]]
    in_specs = [
        pl.BlockSpec((M, TK), lambda k: (0, k)),    # x K-tile
        pl.BlockSpec((TK, n1), lambda k: (k, 0)),   # W1 K-tile (the HBM stream)
        pl.BlockSpec((1, n1), lambda k: (0, 0)),    # bias 1
        pl.BlockSpec((1, n1), lambda k: (0, 0)),    # BN1 scale
        pl.BlockSpec((1, n1), lambda k: (0, 0)),    # BN1 shift
    ]
    for layer in prep["tail"]:
        ni, no = layer["w"].shape
        inputs += [layer["w"], layer["b"], layer["scale"], layer["shift"]]
        in_specs += [
            pl.BlockSpec((ni, no), lambda k: (0, 0)),   # tail weight (resident)
            pl.BlockSpec((1, no), lambda k: (0, 0)),    # tail bias
            pl.BlockSpec((1, no), lambda k: (0, 0)),    # tail BN scale
            pl.BlockSpec((1, no), lambda k: (0, 0)),    # tail BN shift
        ]
    nli, nlo = prep["w_last"].shape
    inputs += [prep["w_last"], prep["b_last"]]
    in_specs += [
        pl.BlockSpec((nli, nlo), lambda k: (0, 0)),     # classifier weight
        pl.BlockSpec((1, nlo), lambda k: (0, 0)),       # classifier bias
    ]

    kernel = functools.partial(_mlp_fused_kernel, n_hidden_tail=n_hidden_tail)

    flops = 2 * M * k_pad * n1
    bytes_accessed = (k_pad * n1 + M * k_pad + M * n_out_pad) * 4

    out = pl.pallas_call(
        kernel,
        out_shape=jax.ShapeDtypeStruct((M, n_out_pad), jnp.float32),
        grid_spec=pltpu.PrefetchScalarGridSpec(
            num_scalar_prefetch=0,
            grid=(k_pad // TK,),
            in_specs=in_specs,
            out_specs=pl.BlockSpec((M, n_out_pad), lambda k: (0, 0)),
            scratch_shapes=[pltpu.VMEM((M, n1), jnp.float32)],
        ),
        compiler_params=pltpu.CompilerParams(
            dimension_semantics=("arbitrary",)),   # K is a reduction axis
        cost_estimate=pl.CostEstimate(
            flops=flops, transcendentals=0, bytes_accessed=bytes_accessed),
    )(*inputs)
    return out[:, :NUM_CLASSES]


def modelobest_reference(params, x):
    """Pure-JAX reference (same eval-mode semantics) for a sanity check."""
    h = x
    for layer in params[:-1]:
        y = jnp.dot(h, layer["w"], precision=jax.lax.Precision.HIGHEST) + layer["b"]
        scale = layer["gamma"] * jax.lax.rsqrt(layer["var"] + BN_EPS)
        shift = layer["beta"] - layer["mean"] * scale
        h = jnp.maximum(y * scale + shift, 0.0)
    last = params[-1]
    return jnp.dot(h, last["w"], precision=jax.lax.Precision.HIGHEST) + last["b"]


if __name__ == "__main__":
    key = jax.random.PRNGKey(0)
    kx, kp = jax.random.split(key)

    batch = 8
    output_dims = [128, 64]     # hidden widths; dropout ratio unused in eval mode
    x = jax.random.normal(kx, (batch, INPUT_DIM), dtype=jnp.float32)
    params = init_params(kp, output_dims)
    prep = prepare_params(params)   # pad/fold once, outside the forward

    fwd = jax.jit(modelobest_forward)
    logits = jax.block_until_ready(fwd(prep, x))
    assert logits.shape == (batch, NUM_CLASSES)

    ref = jax.block_until_ready(modelobest_reference(params, x))
    assert jnp.allclose(logits, ref, rtol=1e-2, atol=1e-2), "mismatch vs JAX reference"

    print("KERNEL_OK")
</pallas_src>

<mosaic_0001>
module attributes {stable_mosaic.version = 11 : i64} {
  func.func @_mlp_fused_kernel(%arg0: i32, %arg1: memref<8x10752xf32, #tpu.memory_space<vmem>>, %arg2: memref<10752x128xf32, #tpu.memory_space<vmem>>, %arg3: memref<1x128xf32, #tpu.memory_space<vmem>>, %arg4: memref<1x128xf32, #tpu.memory_space<vmem>>, %arg5: memref<1x128xf32, #tpu.memory_space<vmem>>, %arg6: memref<128x64xf32, #tpu.memory_space<vmem>>, %arg7: memref<1x64xf32, #tpu.memory_space<vmem>>, %arg8: memref<1x64xf32, #tpu.memory_space<vmem>>, %arg9: memref<1x64xf32, #tpu.memory_space<vmem>>, %arg10: memref<64x128xf32, #tpu.memory_space<vmem>>, %arg11: memref<1x128xf32, #tpu.memory_space<vmem>>, %arg12: memref<8x128xf32, #tpu.memory_space<vmem>>, %arg13: memref<8x128xf32, #tpu.memory_space<vmem>>) attributes {dimension_semantics = [#tpu.dimension_semantics<arbitrary>], iteration_bounds = array<i64: 3>, scalar_prefetch = 0 : i64, scratch_operands = 1 : i64, tpu.core_type = #tpu.core_type<tc>, window_params = [{transform_indices = @transform_0, window_bounds = array<i64: 8, 10752>}, {transform_indices = @transform_1, window_bounds = array<i64: 10752, 128>}, {pipeline_mode = #tpu.pipeline_mode<synchronous>, transform_indices = @transform_2, window_bounds = array<i64: 1, 128>}, {pipeline_mode = #tpu.pipeline_mode<synchronous>, transform_indices = @transform_3, window_bounds = array<i64: 1, 128>}, {pipeline_mode = #tpu.pipeline_mode<synchronous>, transform_indices = @transform_4, window_bounds = array<i64: 1, 128>}, {pipeline_mode = #tpu.pipeline_mode<synchronous>, transform_indices = @transform_5, window_bounds = array<i64: 128, 64>}, {pipeline_mode = #tpu.pipeline_mode<synchronous>, transform_indices = @transform_6, window_bounds = array<i64: 1, 64>}, {pipeline_mode = #tpu.pipeline_mode<synchronous>, transform_indices = @transform_7, window_bounds = array<i64: 1, 64>}, {pipeline_mode = #tpu.pipeline_mode<synchronous>, transform_indices = @transform_8, window_bounds = array<i64: 1, 64>}, {pipeline_mode = #tpu.pipeline_mode<synchronous>, transform_indices = @transform_9, window_bounds = array<i64: 64, 128>}, {pipeline_mode = #tpu.pipeline_mode<synchronous>, transform_indices = @transform_10, window_bounds = array<i64: 1, 128>}, {pipeline_mode = #tpu.pipeline_mode<synchronous>, transform_indices = @transform_11, window_bounds = array<i64: 8, 128>}]} {
    %c0_i32 = arith.constant 0 : i32
    %0 = arith.cmpi eq, %arg0, %c0_i32 : i32
    %1 = arith.extui %0 : i1 to i32
    %c0_i32_0 = arith.constant 0 : i32
    %2 = arith.cmpi ne, %1, %c0_i32_0 : i32
    scf.if %2 {
      %cst_9 = arith.constant 0.000000e+00 : f32
      %12 = vector.broadcast %cst_9 : f32 to vector<8x128xf32>
      %c0_10 = arith.constant 0 : index
      %c0_11 = arith.constant 0 : index
      %13 = vector.load %arg13[%c0_10, %c0_11] : memref<8x128xf32, #tpu.memory_space<vmem>>, vector<8x128xf32>
      tpu.vector_store %arg13[%c0_10, %c0_11], %12 {strides = array<i32>} : memref<8x128xf32, #tpu.memory_space<vmem>>, vector<8x128xf32>,
    } else {
    }
    %c0 = arith.constant 0 : index
    %c0_1 = arith.constant 0 : index
    %3 = vector.load %arg13[%c0, %c0_1] : memref<8x128xf32, #tpu.memory_space<vmem>>, vector<8x128xf32>
    %c0_2 = arith.constant 0 : index
    %c0_3 = arith.constant 0 : index
    %4 = vector.load %arg1[%c0_2, %c0_3] : memref<8x10752xf32, #tpu.memory_space<vmem>>, vector<8x10752xf32>
    %c0_4 = arith.constant 0 : index
    %c0_5 = arith.constant 0 : index
    %5 = vector.load %arg2[%c0_4, %c0_5] : memref<10752x128xf32, #tpu.memory_space<vmem>>, vector<10752x128xf32>
    %cst = arith.constant dense<0.000000e+00> : vector<8x128xf32>
    %6 = tpu.matmul %4, %5, %cst {dimension_numbers = #tpu.dot_dimension_numbers<[1], [0], [0], [1], [0, 0, 1, 1], [], []>} : vector<8x10752xf32>, vector<10752x128xf32>, vector<8x128xf32> -> vector<8x128xf32>
    %7 = arith.addf %3, %6 : vector<8x128xf32>
    %c0_6 = arith.constant 0 : index
    %c0_7 = arith.constant 0 : index
    %8 = vector.load %arg13[%c0_6, %c0_7] : memref<8x128xf32, #tpu.memory_space<vmem>>, vector<8x128xf32>
    tpu.vector_store %arg13[%c0_6, %c0_7], %7 {strides = array<i32>} : memref<8x128xf32, #tpu.memory_space<vmem>>, vector<8x128xf32>,
    %c2_i32 = arith.constant 2 : i32
    %9 = arith.cmpi eq, %arg0, %c2_i32 : i32
    %10 = arith.extui %9 : i1 to i32
    %c0_i32_8 = arith.constant 0 : i32
    %11 = arith.cmpi ne, %10, %c0_i32_8 : i32
    scf.if %11 {
      %c0_9 = arith.constant 0 : index
      %c0_10 = arith.constant 0 : index
      %12 = vector.load %arg13[%c0_9, %c0_10] : memref<8x128xf32, #tpu.memory_space<vmem>>, vector<8x128xf32>
      %c0_11 = arith.constant 0 : index
      %c0_12 = arith.constant 0 : index
      %13 = vector.load %arg3[%c0_11, %c0_12] : memref<1x128xf32, #tpu.memory_space<vmem>>, vector<1x128xf32>
      %14 = vector.broadcast %13 : vector<1x128xf32> to vector<8x128xf32>
      %15 = arith.addf %12, %14 : vector<8x128xf32>
      %c0_13 = arith.constant 0 : index
      %c0_14 = arith.constant 0 : index
      %16 = vector.load %arg4[%c0_13, %c0_14] : memref<1x128xf32, #tpu.memory_space<vmem>>, vector<1x128xf32>
      %17 = vector.broadcast %16 : vector<1x128xf32> to vector<8x128xf32>
      %18 = arith.mulf %15, %17 : vector<8x128xf32>
      %c0_15 = arith.constant 0 : index
      %c0_16 = arith.constant 0 : index
      %19 = vector.load %arg5[%c0_15, %c0_16] : memref<1x128xf32, #tpu.memory_space<vmem>>, vector<1x128xf32>
      %20 = vector.broadcast %19 : vector<1x128xf32> to vector<8x128xf32>
      %21 = arith.addf %18, %20 : vector<8x128xf32>
      %cst_17 = arith.constant 0.000000e+00 : f32
      %22 = vector.broadcast %cst_17 : f32 to vector<8x128xf32>
      %23 = arith.maximumf %21, %22 : vector<8x128xf32>
      %c0_18 = arith.constant 0 : index
      %c0_19 = arith.constant 0 : index
      %24 = vector.load %arg6[%c0_18, %c0_19] : memref<128x64xf32, #tpu.memory_space<vmem>>, vector<128x64xf32>
      %cst_20 = arith.constant dense<0.000000e+00> : vector<8x64xf32>
      %25 = tpu.matmul %23, %24, %cst_20 {dimension_numbers = #tpu.dot_dimension_numbers<[1], [0], [0], [1], [0, 0, 1, 1], [], []>} : vector<8x128xf32>, vector<128x64xf32>, vector<8x64xf32> -> vector<8x64xf32>
      %c0_21 = arith.constant 0 : index
      %c0_22 = arith.constant 0 : index
      %26 = vector.load %arg7[%c0_21, %c0_22] : memref<1x64xf32, #tpu.memory_space<vmem>>, vector<1x64xf32>
      %27 = vector.broadcast %26 : vector<1x64xf32> to vector<8x64xf32>
      %28 = arith.addf %25, %27 : vector<8x64xf32>
      %c0_23 = arith.constant 0 : index
      %c0_24 = arith.constant 0 : index
      %29 = vector.load %arg8[%c0_23, %c0_24] : memref<1x64xf32, #tpu.memory_space<vmem>>, vector<1x64xf32>
      %30 = vector.broadcast %29 : vector<1x64xf32> to vector<8x64xf32>
      %31 = arith.mulf %28, %30 : vector<8x64xf32>
      %c0_25 = arith.constant 0 : index
      %c0_26 = arith.constant 0 : index
      %32 = vector.load %arg9[%c0_25, %c0_26] : memref<1x64xf32, #tpu.memory_space<vmem>>, vector<1x64xf32>
      %33 = vector.broadcast %32 : vector<1x64xf32> to vector<8x64xf32>
      %34 = arith.addf %31, %33 : vector<8x64xf32>
      %cst_27 = arith.constant 0.000000e+00 : f32
      %35 = vector.broadcast %cst_27 : f32 to vector<8x64xf32>
      %36 = arith.maximumf %34, %35 : vector<8x64xf32>
      %c0_28 = arith.constant 0 : index
      %c0_29 = arith.constant 0 : index
      %37 = vector.load %arg10[%c0_28, %c0_29] : memref<64x128xf32, #tpu.memory_space<vmem>>, vector<64x128xf32>
      %cst_30 = arith.constant dense<0.000000e+00> : vector<8x128xf32>
      %38 = tpu.matmul %36, %37, %cst_30 {dimension_numbers = #tpu.dot_dimension_numbers<[1], [0], [0], [1], [0, 0, 1, 1], [], []>} : vector<8x64xf32>, vector<64x128xf32>, vector<8x128xf32> -> vector<8x128xf32>
      %c0_31 = arith.constant 0 : index
      %c0_32 = arith.constant 0 : index
      %39 = vector.load %arg11[%c0_31, %c0_32] : memref<1x128xf32, #tpu.memory_space<vmem>>, vector<1x128xf32>
      %40 = vector.broadcast %39 : vector<1x128xf32> to vector<8x128xf32>
      %41 = arith.addf %38, %40 : vector<8x128xf32>
      %c0_33 = arith.constant 0 : index
      %c0_34 = arith.constant 0 : index
      %42 = vector.load %arg12[%c0_33, %c0_34] : memref<8x128xf32, #tpu.memory_space<vmem>>, vector<8x128xf32>
      tpu.vector_store %arg12[%c0_33, %c0_34], %41 {strides = array<i32>} : memref<8x128xf32, #tpu.memory_space<vmem>>, vector<8x128xf32>,
    } else {
    }
    return
  }
  func.func @transform_0(%arg0: i32) -> (i32, i32) {
    %c0_i32 = arith.constant 0 : i32
    %c0_i32_0 = arith.constant 0 : i32
    return %c0_i32, %arg0 : i32, i32
  }
  func.func @transform_1(%arg0: i32) -> (i32, i32) {
    %c0_i32 = arith.constant 0 : i32
    %c0_i32_0 = arith.constant 0 : i32
    return %arg0, %c0_i32 : i32, i32
  }
  func.func @transform_2(%arg0: i32) -> (i32, i32) {
    %c0_i32 = arith.constant 0 : i32
    %c0_i32_0 = arith.constant 0 : i32
    %c0_i32_1 = arith.constant 0 : i32
    return %c0_i32, %c0_i32_0 : i32, i32
  }
  func.func @transform_3(%arg0: i32) -> (i32, i32) {
    %c0_i32 = arith.constant 0 : i32
    %c0_i32_0 = arith.constant 0 : i32
    %c0_i32_1 = arith.constant 0 : i32
    return %c0_i32, %c0_i32_0 : i32, i32
  }
  func.func @transform_4(%arg0: i32) -> (i32, i32) {
    %c0_i32 = arith.constant 0 : i32
    %c0_i32_0 = arith.constant 0 : i32
    %c0_i32_1 = arith.constant 0 : i32
    return %c0_i32, %c0_i32_0 : i32, i32
  }
  func.func @transform_5(%arg0: i32) -> (i32, i32) {
    %c0_i32 = arith.constant 0 : i32
    %c0_i32_0 = arith.constant 0 : i32
    %c0_i32_1 = arith.constant 0 : i32
    return %c0_i32, %c0_i32_0 : i32, i32
  }
  func.func @transform_6(%arg0: i32) -> (i32, i32) {
    %c0_i32 = arith.constant 0 : i32
    %c0_i32_0 = arith.constant 0 : i32
    %c0_i32_1 = arith.constant 0 : i32
    return %c0_i32, %c0_i32_0 : i32, i32
  }
  func.func @transform_7(%arg0: i32) -> (i32, i32) {
    %c0_i32 = arith.constant 0 : i32
    %c0_i32_0 = arith.constant 0 : i32
    %c0_i32_1 = arith.constant 0 : i32
    return %c0_i32, %c0_i32_0 : i32, i32
  }
  func.func @transform_8(%arg0: i32) -> (i32, i32) {
    %c0_i32 = arith.constant 0 : i32
    %c0_i32_0 = arith.constant 0 : i32
    %c0_i32_1 = arith.constant 0 : i32
    return %c0_i32, %c0_i32_0 : i32, i32
  }
  func.func @transform_9(%arg0: i32) -> (i32, i32) {
    %c0_i32 = arith.constant 0 : i32
    %c0_i32_0 = arith.constant 0 : i32
    %c0_i32_1 = arith.constant 0 : i32
    return %c0_i32, %c0_i32_0 : i32, i32
  }
  func.func @transform_10(%arg0: i32) -> (i32, i32) {
    %c0_i32 = arith.constant 0 : i32
    %c0_i32_0 = arith.constant 0 : i32
    %c0_i32_1 = arith.constant 0 : i32
    return %c0_i32, %c0_i32_0 : i32, i32
  }
  func.func @transform_11(%arg0: i32) -> (i32, i32) {
    %c0_i32 = arith.constant 0 : i32
    %c0_i32_0 = arith.constant 0 : i32
    %c0_i32_1 = arith.constant 0 : i32
    return %c0_i32, %c0_i32_0 : i32, i32
  }
}

</mosaic_0001>

<bundles_post_ra>
// kernel: modelobest_forward.1
= control target key start
LH: loop header
LB: loop body
LE: loop exit
PB: predicated region body
PF: predicated region fallthrough
CT: control target
= control target key end

     0   :  { %s9123_s0 = inlined_call_operand.vmem [shape: f32[8,32256], index: 0, kind: input, shape index: {}]   ;;  %s9124_s1 = inlined_call_operand.hbm [shape: f32[32256,128], index: 1, kind: input, shape index: {}]   ;;  %s9125_s2 = inlined_call_operand.hbm [shape: f32[1,128], index: 2, kind: input, shape index: {}]   ;;  %s9126_s3 = inlined_call_operand.hbm [shape: f32[1,128], index: 3, kind: input, shape index: {}]   ;;  %s9127_s4 = inlined_call_operand.hbm [shape: f32[1,128], index: 4, kind: input, shape index: {}]   ;;  %s9128_s5 = inlined_call_operand.vmem [shape: f32[128,64], index: 5, kind: input, shape index: {}]   ;;  %s9129_s6 = inlined_call_operand.hbm [shape: f32[1,64], index: 6, kind: input, shape index: {}]   ;;  %s9130_s7 = inlined_call_operand.hbm [shape: f32[1,64], index: 7, kind: input, shape index: {}]   ;;  %s9131_s8 = inlined_call_operand.hbm [shape: f32[1,64], index: 8, kind: input, shape index: {}]   ;;  %s9132_s9 = inlined_call_operand.hbm [shape: f32[64,128], index: 9, kind: input, shape index: {}]   ;;  %s9133_s10 = inlined_call_operand.hbm [shape: f32[1,128], index: 10, kind: input, shape index: {}]   ;;  %s9134_s11 = inlined_call_operand.hbm [shape: f32[8,128], index: 11, kind: output, shape index: {}]  }
   0x1   :  { %9140 = sst [smem:[#allocation25_spill]] %s9125_s2 }
   0x2   :  { %16 = vsyncpa [#allocation4], 0 }
   0x3   :  { %18 = vsyncpa [#allocation4 + $0x1], 0 }
   0x4   :  { %19 = vsyncpa [#allocation7], 0 }
   0x5   :  { %20 = vsyncpa [#allocation10], 0 }
   0x6   :  { %21 = vsyncpa [#allocation13], 0 }
   0x7   :  { %22 = vsyncpa [#allocation16], 0 }
   0x8   :  { %23 = vsyncpa [#allocation5], 0  ;;  %s7381_s17 = smov 0   ;;  %s7383_s18 = smov 0  }
   0x9   :  { %s7385_s19 = smov 0   ;;  %s7387_s20 = smov 0  }
   0xa LB: > { %s7306_s21 = smov [#allocation6]   ;;  %s7402_s23 = sadd.s32 4294967295, %s7304_s20   ;;  %s7304_s20 = sphi %s7387_s20, %s9164_s20   ;;  %s7300_s19 = sphi %s7385_s19, %s9163_s19   ;;  %s7296_s18 = sphi %s7383_s18, %s9162_s18   ;;  %s7292_s17 = sphi %s7381_s17, %s9161_s17  }
   0xb   : > { %s309_s22 = sshll.u32 %s7306_s21, 4  ;;  %p5270_p0 = scmp.ge.s32.totalorder %s7304_s20, 1  ;;  %s310_s22 = int_to_ptr.vmem [resolvable:$true] %s309_s22 }
   0xc   : > { %p9135_p1 = scmp.eq.s32.totalorder %s7402_s23, 0  ;;  %p296_p2 = scmp.lt.s32.totalorder %s7304_s20, 4 }
   0xd   : > { %s7307_s25 = smov [#allocation9]   ;;  %s7308_s27 = smov [#allocation12]  }
   0xe   : > { %p7408_p4 = pnand %p5270_p0, %p296_p2  ;;  %s331_s26 = sshll.u32 %s7307_s25, 4  ;;  %s7414_s26 = int_to_ptr.vmem [resolvable:$true] %s331_s26 }
   0xf   : > { %s356_s28 = sshll.u32 %s7308_s27, 4  ;;  %s7309_s30 = smov [#allocation15]   ;;  %s7422_s28 = int_to_ptr.vmem [resolvable:$true] %s356_s28 }
  0x10   : > { %s9141_s24 = scalar_select %p7408_p4, 1, 0 }
  0x11   : > { %p6896_p5 = pneg %p7408_p4  ;;  %s7424_s12 = sshll.u32 %s7309_s30, 4  ;;  %s378_s12 = int_to_ptr.vmem [resolvable:$true] %s7424_s12 }
  0x12   : > { %s7001_s14 = scalar_lea.vmem %s310_s22, 16  ;;  %s7008_s15 = scalar_lea.vmem %s310_s22, 32 }
  0x13   : > { %p7418_p6 = pnand %p6896_p5, %p9135_p1  ;;  %p7002_p8 = scmp.ne.s32.totalorder %s310_s22, %s7001_s14 }
  0x14   : > { %p7009_p11 = scmp.lt.s32.totalorder %s310_s22, %s310_s22  ;;  %p7010_p12 = scmp.lt.s32.totalorder %s7008_s15, %s7001_s14 }
  0x15   : > { %p7428_p7 = pneg %p7418_p6 }
  0x16   : > { %p7011_p13 = por %p7010_p12, %p7009_p11 }
  0x17   : > { %p7004_p9 = pnand %p7002_p8, %p7428_p7 }
  0x19   : > { %p7005_p10 = pneg %p7004_p9 }
  0x1b   : > { %p7012_p0 = pnand %p7011_p13, %p7005_p10 }
  0x1d   : > { %7015 = shalt.err (!%p7012_p0)
}
  0x1e   : > { %s9144_s2 = sld [smem:[#allocation25_spill]]  ;;  %s7027_s25 = scalar_lea.vmem %s7414_s26, 16 }
  0x1f   : > { %p7028_p2 = scmp.ne.s32.totalorder %s7414_s26, %s7027_s25  ;;  %s7034_s27 = scalar_lea.vmem %s7414_s26, 32 }
  0x20   : > { %p7035_p9 = scmp.lt.s32.totalorder %s7414_s26, %s7414_s26  ;;  %p7036_p10 = scmp.lt.s32.totalorder %s7034_s27, %s7027_s25 }
  0x21   : > { %p7030_p5 = pnand %p7028_p2, %p7428_p7 }
  0x22   : > { %p7037_p11 = por %p7036_p10, %p7035_p9 }
  0x23   : > { %p7031_p8 = pneg %p7030_p5 }
  0x24   : > { %6899 = dma.hbm_to_vmem [thread:$0]  (!%p7418_p6), %s9144_s2, 16, %s310_s22, [#allocation7]  }
  0x25   : > { %p7038_p12 = pnand %p7037_p11, %p7031_p8 }
  0x27   : > { %7041 = shalt.err (!%p7038_p12)
}
  0x28   : > { %6905 = dma.hbm_to_vmem [thread:$0]  (!%p7418_p6), %s9127_s4, 16, %s7414_s26, [#allocation10]  }
  0x29   : > { %s7053_s22 = scalar_lea.vmem %s7422_s28, 16  ;;  %s7060_s15 = scalar_lea.vmem %s7422_s28, 32 }
  0x2a   : > { %p7054_p13 = scmp.ne.s32.totalorder %s7422_s28, %s7053_s22  ;;  %p7061_p5 = scmp.lt.s32.totalorder %s7422_s28, %s7422_s28 }
  0x2b   : > { %p7062_p8 = scmp.lt.s32.totalorder %s7060_s15, %s7053_s22 }
  0x2c   : > { %p7056_p0 = pnand %p7054_p13, %p7428_p7 }
  0x2d   : > { %p7063_p9 = por %p7062_p8, %p7061_p5 }
  0x2e   : > { %p7057_p2 = pneg %p7056_p0 }
  0x30   : > { %p7064_p10 = pnand %p7063_p9, %p7057_p2 }
  0x32   : > { %7067 = shalt.err (!%p7064_p10)
}
  0x33   : > { %6911 = dma.hbm_to_vmem [thread:$0]  (!%p7418_p6), %s9130_s7, 16, %s7422_s28, [#allocation13]  }
  0x34   : > { %s7079_s26 = scalar_lea.vmem %s378_s12, 1024  ;;  %p7087_p0 = scmp.lt.s32.totalorder %s378_s12, %s378_s12 }
  0x35   : > { %p7080_p11 = scmp.ne.s32.totalorder %s378_s12, %s7079_s26  ;;  %p7088_p3 = scmp.lt.s32.totalorder %s7079_s26, %s7079_s26 }
  0x37   : > { %p7082_p12 = pnand %p7080_p11, %p7428_p7  ;;  %p7089_p5 = por %p7088_p3, %p7087_p0 }
  0x39   : > { %p7083_p13 = pneg %p7082_p12 }
  0x3b   : > { %p7090_p2 = pnand %p7089_p5, %p7083_p13 }
  0x3d   : > { %7093 = shalt.err (!%p7090_p2)
}
  0x3e   : > { %s9137_s25 = smov 128   ;;  %s9138_s27 = smov 8  }
  0x3f   : > { %6917 = dma.hbm_to_vmem [thread:$0]  (!%p7418_p6), %s9132_s9, 1024, %s378_s12, [#allocation16], %s9137_s25, %s9137_s25, %s9138_s27  }
  0x40   : > { %s7312_s14 = smov [#allocation8]   ;;  %s7313_s15 = smov [#allocation11]  }
  0x41   : > { %s320_s22 = sshll.u32 %s7312_s14, 4  ;;  %s345_s16 = sshll.u32 %s7313_s15, 4  ;;  %s321_s22 = int_to_ptr.vmem [resolvable:$true] %s320_s22  ;;  %s346_s16 = int_to_ptr.vmem [resolvable:$true] %s345_s16 }
  0x42   : > { %s7105_s21 = scalar_lea.vmem %s321_s22, 16  ;;  %s7112_s26 = scalar_lea.vmem %s321_s22, 32 }
  0x43   : > { %p7106_p3 = scmp.ne.s32.totalorder %s321_s22, %s7105_s21  ;;  %p7113_p10 = scmp.lt.s32.totalorder %s321_s22, %s321_s22 }
  0x44   : > { %p7114_p11 = scmp.lt.s32.totalorder %s7112_s26, %s7105_s21 }
  0x45   : > { %p7108_p8 = pnand %p7106_p3, %p7428_p7 }
  0x46   : > { %p7115_p12 = por %p7114_p11, %p7113_p10 }
  0x47   : > { %p7109_p9 = pneg %p7108_p8 }
  0x49   : > { %p7116_p13 = pnand %p7115_p12, %p7109_p9 }
  0x4b   : > { %7119 = shalt.err (!%p7116_p13)
}
  0x4c   : > { %6902 = dma.hbm_to_vmem [thread:$0]  (!%p7418_p6), %s9126_s3, 16, %s321_s22, [#allocation7]  }
  0x4d   : > { %s7131_s30 = scalar_lea.vmem %s346_s16, 16  ;;  %s7138_s14 = scalar_lea.vmem %s346_s16, 32 }
  0x4e   : > { %p7132_p0 = scmp.ne.s32.totalorder %s346_s16, %s7131_s30  ;;  %p7139_p3 = scmp.lt.s32.totalorder %s346_s16, %s346_s16 }
  0x4f   : > { %p7140_p8 = scmp.lt.s32.totalorder %s7138_s14, %s7131_s30 }
  0x50   : > { %p7134_p5 = pnand %p7132_p0, %p7428_p7 }
  0x51   : > { %p7141_p1 = por %p7140_p8, %p7139_p3 }
  0x52   : > { %p7135_p2 = pneg %p7134_p5 }
  0x54   : > { %p7142_p4 = pnand %p7141_p1, %p7135_p2 }
  0x56   : > { %7145 = shalt.err (!%p7142_p4)
}
  0x57   : > { %6908 = dma.hbm_to_vmem [thread:$0]  (!%p7418_p6), %s9129_s6, 16, %s346_s16, [#allocation10]  }
  0x58   : > { %s7314_s26 = smov [#allocation14]   ;;  %s7315_s12 = smov [#allocation17]  }
  0x59   : > { %s367_s22 = sshll.u32 %s7314_s26, 4  ;;  %s391_s28 = sshll.u32 %s7315_s12, 4  ;;  %s368_s22 = int_to_ptr.vmem [resolvable:$true] %s367_s22  ;;  %s392_s28 = int_to_ptr.vmem [resolvable:$true] %s391_s28 }
  0x5a   : > { %s7157_s25 = scalar_lea.vmem %s368_s22, 16  ;;  %s7164_s30 = scalar_lea.vmem %s368_s22, 32 }
  0x5b   : > { %p7158_p9 = scmp.ne.s32.totalorder %s368_s22, %s7157_s25  ;;  %p7165_p1 = scmp.lt.s32.totalorder %s368_s22, %s368_s22 }
  0x5c   : > { %p7166_p4 = scmp.lt.s32.totalorder %s7164_s30, %s7157_s25 }
  0x5d   : > { %p7160_p10 = pnand %p7158_p9, %p7428_p7 }
  0x5e   : > { %p7167_p12 = por %p7166_p4, %p7165_p1 }
  0x5f   : > { %p7161_p11 = pneg %p7160_p10 }
  0x61   : > { %p7168_p13 = pnand %p7167_p12, %p7161_p11 }
  0x63   : > { %7171 = shalt.err (!%p7168_p13)
}
  0x64   : > { %6914 = dma.hbm_to_vmem [thread:$0]  (!%p7418_p6), %s9131_s8, 16, %s368_s22, [#allocation13]  }
  0x65   : > { %s7183_s15 = scalar_lea.vmem %s392_s28, 16  ;;  %s7190_s21 = scalar_lea.vmem %s392_s28, 32 }
  0x66   : > { %p7184_p0 = scmp.ne.s32.totalorder %s392_s28, %s7183_s15  ;;  %p7191_p3 = scmp.lt.s32.totalorder %s392_s28, %s392_s28 }
  0x67   : > { %p7192_p8 = scmp.lt.s32.totalorder %s7190_s21, %s7183_s15 }
  0x68   : > { %p7186_p5 = pnand %p7184_p0, %p7428_p7 }
  0x69   : > { %p7193_p9 = por %p7192_p8, %p7191_p3 }
  0x6a   : > { %p7187_p2 = pneg %p7186_p5 }
  0x6c   : > { %p7194_p10 = pnand %p7193_p9, %p7187_p2 }
  0x6e   : > { %7197 = shalt.err (!%p7194_p10)
}
  0x6f   : > { %6920 = dma.hbm_to_vmem [thread:$0]  (!%p7418_p6), %s9133_s10, 16, %s392_s28, [#allocation16]  }
  0x70   : > { %s7505_s13 = sadd.s32 1, %s7304_s20   ;;  %s62_s29 = sadd.s32 1, %s7300_s19 }
  0x71   : > { %s59_s22 = ssub.s32 %s7304_s20, %s7505_s13  ;;  %p69_p7 = scmp.ne.s32.totalorder %s7300_s19, %s7296_s18 }
  0x72   : > { %p60_p11 = scmp.eq.s32.totalorder %s59_s22, 0  ;;  %p70_p1 = scmp.eq.s32.totalorder %s7304_s20, 0 }
  0x73   : > { %p75_p4 = scmp.ne.s32.totalorder %s7296_s18, %s7292_s17  ;;  %p6933_p12 = scmp.lt.s32.totalorder %s7304_s20, 3 }
  0x74   : > { %s7517_s12 = scalar_select %p60_p11, %s7300_s19, %s62_s29  }
  0x75   : > { %p71_p13 = por %p70_p1, %p69_p7  ;;  %p9145_p0 = scmp.eq.s32.totalorder %s7402_s23, 0 }
  0x76   : > { %s411_s16 = sand.u32 1, %s7300_s19   ;;  %s5305_s28 = smul.u32 172032, %s7304_s20 }
  0x77   : > { %p7521_p5 = por %p9145_p0, %p75_p4  ;;  %s6856_s14 = smul.u32 10752, %s411_s16 }
  0x78   : > { %p7527_p6 = pnand %p6933_p12, %p71_p13  ;;  %s7534_s17 = scalar_lea.hbm %s9124_s1, %s5305_s28 }
  0x79   : > { %s9146_s30 = scalar_select %p7521_p5, 1, 0 }
  0x7a   : > { %s415_s26 = scalar_lea.vmem [#allocation3], %s6856_s14  ;;  %s7538_s22 = scalar_lea.sflag [#allocation4], %s411_s16 }
  0x7b   : > { %s422_s29 = sshll.u32 %s415_s26, 4  ;;  %s7198_s20 = scalar_lea.hbm %s7534_s17, 172032  ;;  %s7536_s29 = int_to_ptr.vmem [resolvable:$true] %s422_s29 }
  0x7c   : > { %p7199_p2 = scmp.ne.s32.totalorder %s7534_s17, %s7198_s20  ;;  %p7200_p3 = pneg %p7527_p6 }
  0x7d   : > { %s7203_s28 = scalar_lea.hbm %s9124_s1, 516096  ;;  %p7204_p10 = scmp.lt.s32.totalorder %s7534_s17, %s9124_s1 }
  0x7e   : > { %p7201_p8 = pnand %p7200_p3, %p7199_p2  ;;  %p7205_p7 = scmp.lt.s32.totalorder %s7203_s28, %s7198_s20 }
  0x80   : > { %p7202_p9 = pneg %p7201_p8  ;;  %p7206_p11 = por %p7205_p7, %p7204_p10 }
  0x82   : > { %p7207_p1 = pnand %p7206_p11, %p7202_p9 }
  0x84   : > { %7210 = shalt.err (!%p7207_p1)
}
  0x85   : > { %s7211_s16 = scalar_lea.vmem %s7536_s29, 172032  ;;  %s7316_s14 = smov [#allocation3]  }
  0x86   : > { %p7212_p4 = scmp.ne.s32.totalorder %s7536_s29, %s7211_s16  ;;  %s7216_s26 = sshll.u32 %s7316_s14, 4  ;;  %s7217_s26 = int_to_ptr.vmem [resolvable:$false] %s7216_s26 }
  0x87   : > { %s7218_s27 = scalar_lea.vmem %s7217_s26, 344064  ;;  %p7219_p0 = scmp.lt.s32.totalorder %s7536_s29, %s7217_s26 }
  0x88   : > { %p7214_p12 = pnand %p7212_p4, %p7200_p3  ;;  %p7220_p2 = scmp.lt.s32.totalorder %s7218_s27, %s7211_s16 }
  0x8a   : > { %p7215_p13 = pneg %p7214_p12  ;;  %p7221_p8 = por %p7220_p2, %p7219_p0 }
  0x8c   : > { %p7222_p5 = pnand %p7221_p8, %p7215_p13 }
  0x8e   : > { %7225 = shalt.err (!%p7222_p5)
}
  0x8f   : > { %s9148_s2 = smov 8   ;;  %s9149_s20 = smov 128  }
  0x90   : > { %6924 = dma.hbm_to_vmem [thread:$0]  (!%p7527_p6), %s7534_s17, 172032, %s7536_s29, %s7538_s22, %s9149_s20, %s9149_s20, %s9148_s2  }
  0x91   : > { %p9150_p3 = scmp.ne.s32.totalorder %s9141_s24, 0 }
  0x92   : > { %s436_s21 = sand.u32 (!%p9150_p3), 1, %s7296_s18   ;;  %p9151_p5 = scmp.ne.s32.totalorder (!%p9150_p3), %s9146_s30, 0 }
  0x93   : > { %434 = sbr.rel (%p9150_p3) target bundleno = 1539 (0x603), region = 64  ;;  %s437_s25 = scalar_lea.sflag (!%p9150_p3), [#allocation4], %s436_s21 }
  0x94   : > { %s6857_s28 = smul.u32 (!%p9150_p3), 10752, %s436_s21 }
  0x96   : > { %s7565_s16 = scalar_lea.vmem (!%p9150_p3), [#allocation3], %s6857_s28 }
  0x98   : > { %7267 = dma.done.wait (%p9151_p5), %s437_s25, 172032  }
  0x99   : > { %7269 = vsyncadd (%p9151_p5), %s437_s25, 4294795264  ;;  %p9152_p9 = scmp.eq.s32.totalorder %s7402_s23, 0 }
  0x9b   : > { %7271 = dma.done.wait (%p9152_p9), [#allocation7], 32   ;;  %p9153_p6 = pmov %p9152_p9 }
  0x9d   : > { %7273 = vsyncadd (%p9153_p6), [#allocation7], 4294967264  ;;  %p9154_p10 = pmov %p9153_p6 }
  0x9e   : > { %p9155_p7 = pmov %p9153_p6 }
  0x9f   : > { %7275 = dma.done.wait (%p9154_p10), [#allocation10], 32  }
  0xa0   : > { %7277 = vsyncadd (%p9155_p7), [#allocation10], 4294967264  ;;  %p9156_p11 = pmov %p9153_p6 }
  0xa1   : > { %p9157_p1 = pmov %p9153_p6 }
  0xa2   : > { %7279 = dma.done.wait (%p9156_p11), [#allocation13], 32  }
  0xa3   : > { %7281 = vsyncadd (%p9157_p1), [#allocation13], 4294967264  ;;  %p9158_p4 = pmov %p9157_p1 }
  0xa4   : > { %p9159_p12 = pmov %p9157_p1 }
  0xa5   : > { %7283 = dma.done.wait (%p9158_p4), [#allocation16], 1040  }
  0xa6   : > { %7285 = vsyncadd (%p9159_p12), [#allocation16], 4294966256  ;;  %s511_s24 = smul.u32 84, %s7402_s23  ;;  %p9160_p0 = scmp.ne.s32.totalorder %s7402_s23, 0 }
  0xa8   : > { %p512_p13 = scmp.lt.s32.totalorder %s511_s24, 251  ;;  %521 = sbr.rel (%p9160_p0) target bundleno = 175 (0xaf), region = 104 }
  0xaa   : > { %s9166_s24 = smov (!%p512_p13, %s511_s24), 251 }
  0xab   : > { %s5290_s30 = sshll.u32 %s9166_s24, 3 }
  0xac   : > { %s7591_s29 = scalar_lea.vmem %s9123_s0, %s5290_s30 }
  0xad   : > { %v7317_v0 = vmov 0.0  }
  0xae   : > { %522 = vst [vmem:[#allocation2] sm:$0xff] %v7317_v0 }
  0xaf PF: > { %v639_v1 = vld [vmem:[%s7565_s16 + $0xf8] sm:$0xff]  ;;  %v638_v5 = vld [vmem:[%s7565_s16 + $0xf0] sm:$0xff]  ;;  %v637_v9 = vld [vmem:[%s7565_s16 + $0xe8] sm:$0xff]  ;;  %p5292_p2 = scmp.ne.s32.totalorder %s7402_s23, 2 }
  0xb0   : > { %v671_v2 = vld [vmem:[%s7565_s16 + $0x1f8] sm:$0xff]  ;;  %5306 = vmatprep.subr.mxu0 %v639_v1  ;;  %v670_v6 = vld [vmem:[%s7565_s16 + $0x1f0] sm:$0xff]  ;;  %v669_v10 = vld [vmem:[%s7565_s16 + $0x1e8] sm:$0xff] }
  0xb1   : > { %v623_v3 = vld [vmem:[%s7565_s16 + $0x78] sm:$0xff]  ;;  %5341 = vmatprep.subr.mxu1 %v671_v2  ;;  %v622_v7 = vld [vmem:[%s7565_s16 + $0x70] sm:$0xff]  ;;  %v621_v11 = vld [vmem:[%s7565_s16 + $0x68] sm:$0xff] }
  0xb2   : > { %v655_v4 = vld [vmem:[%s7565_s16 + $0x178] sm:$0xff]  ;;  %5307 = vmatpush3.msra.mxu0 %v623_v3  ;;  %v654_v8 = vld [vmem:[%s7565_s16 + $0x170] sm:$0xff]  ;;  %v653_v12 = vld [vmem:[%s7565_s16 + $0x168] sm:$0xff] }
  0xb3   : > { %5342 = vmatpush3.msra.mxu1 %v655_v4  ;;  %5308 = vmatprep.subr.mxu0 %v638_v5  ;;  %v636_v13 = vld [vmem:[%s7565_s16 + $0xe0] sm:$0xff]  ;;  %v635_v17 = vld [vmem:[%s7565_s16 + $0xd8] sm:$0xff]  ;;  %v634_v21 = vld [vmem:[%s7565_s16 + $0xd0] sm:$0xff] }
  0xb4   : > { %5343 = vmatprep.subr.mxu1 %v670_v6  ;;  %5309 = vmatpush3.msra.mxu0 %v622_v7  ;;  %v668_v14 = vld [vmem:[%s7565_s16 + $0x1e0] sm:$0xff]  ;;  %v667_v18 = vld [vmem:[%s7565_s16 + $0x1d8] sm:$0xff]  ;;  %v666_v22 = vld [vmem:[%s7565_s16 + $0x1d0] sm:$0xff] }
  0xb5   : > { %5344 = vmatpush3.msra.mxu1 %v654_v8  ;;  %5310 = vmatprep.subr.mxu0 %v637_v9  ;;  %v620_v15 = vld [vmem:[%s7565_s16 + $0x60] sm:$0xff]  ;;  %v619_v19 = vld [vmem:[%s7565_s16 + $0x58] sm:$0xff]  ;;  %v618_v23 = vld [vmem:[%s7565_s16 + $0x50] sm:$0xff] }
  0xb6   : > { %5345 = vmatprep.subr.mxu1 %v669_v10  ;;  %v652_v16 = vld [vmem:[%s7565_s16 + $0x160] sm:$0xff]  ;;  %5311 = vmatpush3.msra.mxu0 %v621_v11  ;;  %v651_v20 = vld [vmem:[%s7565_s16 + $0x158] sm:$0xff]  ;;  %v650_v24 = vld [vmem:[%s7565_s16 + $0x150] sm:$0xff] }
  0xb7   : > { %5346 = vmatpush3.msra.mxu1 %v653_v12  ;;  %5312 = vmatprep.subr.mxu0 %v636_v13  ;;  %v633_v25 = vld [vmem:[%s7565_s16 + $0xc8] sm:$0xff]  ;;  %v632_v29 = vld [vmem:[%s7565_s16 + $0xc0] sm:$0xff]  ;;  %v631_v33 = vld [vmem:[%s7565_s16 + $0xb8] sm:$0xff] }
  0xb8   : > { %5347 = vmatprep.subr.mxu1 %v668_v14  ;;  %5313 = vmatpush3.msra.mxu0 %v620_v15  ;;  %v665_v26 = vld [vmem:[%s7565_s16 + $0x1c8] sm:$0xff]  ;;  %v664_v30 = vld [vmem:[%s7565_s16 + $0x1c0] sm:$0xff]  ;;  %v663_v34 = vld [vmem:[%s7565_s16 + $0x1b8] sm:$0xff] }
  0xb9   : > { %5348 = vmatpush3.msra.mxu1 %v652_v16  ;;  %5314 = vmatprep.subr.mxu0 %v635_v17  ;;  %v617_v27 = vld [vmem:[%s7565_s16 + $0x48] sm:$0xff]  ;;  %v616_v31 = vld [vmem:[%s7565_s16 + $0x40] sm:$0xff]  ;;  %v615_v35 = vld [vmem:[%s7565_s16 + $0x38] sm:$0xff] }
  0xba   : > { %5349 = vmatprep.subr.mxu1 %v667_v18  ;;  %5315 = vmatpush3.msra.mxu0 %v619_v19  ;;  %v649_v28 = vld [vmem:[%s7565_s16 + $0x148] sm:$0xff]  ;;  %v648_v32 = vld [vmem:[%s7565_s16 + $0x140] sm:$0xff]  ;;  %v647_v36 = vld [vmem:[%s7565_s16 + $0x138] sm:$0xff] }
  0xbb   : > { %5350 = vmatpush3.msra.mxu1 %v651_v20  ;;  %5316 = vmatprep.subr.mxu0 %v634_v21  ;;  %v630_v37 = vld [vmem:[%s7565_s16 + $0xb0] sm:$0xff]  ;;  %v629_v41 = vld [vmem:[%s7565_s16 + $0xa8] sm:$0xff]  ;;  %v628_v45 = vld [vmem:[%s7565_s16 + $0xa0] sm:$0xff] }
  0xbc   : > { %5351 = vmatprep.subr.mxu1 %v666_v22  ;;  %5317 = vmatpush3.msra.mxu0 %v618_v23  ;;  %v662_v38 = vld [vmem:[%s7565_s16 + $0x1b0] sm:$0xff]  ;;  %v661_v42 = vld [vmem:[%s7565_s16 + $0x1a8] sm:$0xff]  ;;  %v660_v46 = vld [vmem:[%s7565_s16 + $0x1a0] sm:$0xff] }
  0xbd   : > { %5352 = vmatpush3.msra.mxu1 %v650_v24  ;;  %5318 = vmatprep.subr.mxu0 %v633_v25  ;;  %v614_v39 = vld [vmem:[%s7565_s16 + $0x30] sm:$0xff]  ;;  %v613_v43 = vld [vmem:[%s7565_s16 + $0x28] sm:$0xff]  ;;  %v612_v47 = vld [vmem:[%s7565_s16 + $0x20] sm:$0xff] }
  0xbe   : > { %5353 = vmatprep.subr.mxu1 %v665_v26  ;;  %5319 = vmatpush3.msra.mxu0 %v617_v27  ;;  %v646_v40 = vld [vmem:[%s7565_s16 + $0x130] sm:$0xff]  ;;  %v645_v44 = vld [vmem:[%s7565_s16 + $0x128] sm:$0xff]  ;;  %v644_v48 = vld [vmem:[%s7565_s16 + $0x120] sm:$0xff] }
  0xbf   : > { %5354 = vmatpush3.msra.mxu1 %v649_v28  ;;  %5320 = vmatprep.subr.mxu0 %v632_v29  ;;  %v627_v49 = vld [vmem:[%s7565_s16 + $0x98] sm:$0xff]  ;;  %v626_v53 = vld [vmem:[%s7565_s16 + $0x90] sm:$0xff]  ;;  %v625_v57 = vld [vmem:[%s7565_s16 + $0x88] sm:$0xff] }
  0xc0   : > { %5355 = vmatprep.subr.mxu1 %v664_v30  ;;  %5321 = vmatpush3.msra.mxu0 %v616_v31  ;;  %v659_v50 = vld [vmem:[%s7565_s16 + $0x198] sm:$0xff]  ;;  %v658_v54 = vld [vmem:[%s7565_s16 + $0x190] sm:$0xff]  ;;  %v657_v58 = vld [vmem:[%s7565_s16 + $0x188] sm:$0xff] }
  0xc1   : > { %5356 = vmatpush3.msra.mxu1 %v648_v32  ;;  %5322 = vmatprep.subr.mxu0 %v631_v33  ;;  %v611_v51 = vld [vmem:[%s7565_s16 + $0x18] sm:$0xff]  ;;  %v610_v55 = vld [vmem:[%s7565_s16 + $0x10] sm:$0xff]  ;;  %v609_v59 = vld [vmem:[%s7565_s16 + $0x8] sm:$0xff] }
  0xc2   : > { %5357 = vmatprep.subr.mxu1 %v663_v34  ;;  %5323 = vmatpush3.msra.mxu0 %v615_v35  ;;  %v643_v52 = vld [vmem:[%s7565_s16 + $0x118] sm:$0xff]  ;;  %v642_v56 = vld [vmem:[%s7565_s16 + $0x110] sm:$0xff]  ;;  %v641_v60 = vld [vmem:[%s7565_s16 + $0x108] sm:$0xff] }
  0xc3   : > { %5358 = vmatpush3.msra.mxu1 %v647_v36  ;;  %5324 = vmatprep.subr.mxu0 %v630_v37  ;;  %v624_v61 = vld [vmem:[%s7565_s16 + $0x80] sm:$0xff]  ;;  %v527_v2 = vld [vmem:[%s7591_s29 + $0x18] sm:$0xff]  ;;  %v524_v3 = vld [vmem:[%s7591_s29] sm:$0xff] }
  0xc4   : > { %5359 = vmatprep.subr.mxu1 %v662_v38  ;;  %5325 = vmatpush3.msra.mxu0 %v614_v39  ;;  %v656_v62 = vld [vmem:[%s7565_s16 + $0x180] sm:$0xff]  ;;  %v526_v4 = vld [vmem:[%s7591_s29 + $0x10] sm:$0xff]  ;;  %v703_v5 = vld [vmem:[%s7565_s16 + $0x2f8] sm:$0xff] }
  0xc5   : > { %5360 = vmatpush3.msra.mxu1 %v646_v40  ;;  %5326 = vmatprep.subr.mxu0 %v629_v41  ;;  %v608_v63 = vld [vmem:[%s7565_s16] sm:$0xff]  ;;  %v735_v6 = vld [vmem:[%s7565_s16 + $0x3f8] sm:$0xff]  ;;  %v702_v9 = vld [vmem:[%s7565_s16 + $0x2f0] sm:$0xff] }
  0xc6   : > { %5361 = vmatprep.subr.mxu1 %v661_v42  ;;  %5327 = vmatpush3.msra.mxu0 %v613_v43  ;;  %v525_v0 = vld [vmem:[%s7591_s29 + $0x8] sm:$0xff]  ;;  %v687_v7 = vld [vmem:[%s7565_s16 + $0x278] sm:$0xff]  ;;  %v734_v10 = vld [vmem:[%s7565_s16 + $0x3f0] sm:$0xff] }
  0xc7   : > { %5362 = vmatpush3.msra.mxu1 %v645_v44  ;;  %5328 = vmatprep.subr.mxu0 %v628_v45  ;;  %v640_v1 = vld [vmem:[%s7565_s16 + $0x100] sm:$0xff]  ;;  %v719_v8 = vld [vmem:[%s7565_s16 + $0x378] sm:$0xff]  ;;  %v686_v11 = vld [vmem:[%s7565_s16 + $0x270] sm:$0xff] }
  0xc8   : > { %5363 = vmatprep.subr.mxu1 %v660_v46  ;;  %5329 = vmatpush3.msra.mxu0 %v612_v47  ;;  %v718_v12 = vld [vmem:[%s7565_s16 + $0x370] sm:$0xff]  ;;  %v701_v13 = vld [vmem:[%s7565_s16 + $0x2e8] sm:$0xff]  ;;  %v700_v17 = vld [vmem:[%s7565_s16 + $0x2e0] sm:$0xff] }
  0xc9   : > { %5364 = vmatpush3.msra.mxu1 %v644_v48  ;;  %5330 = vmatprep.subr.mxu0 %v627_v49  ;;  %v733_v14 = vld [vmem:[%s7565_s16 + $0x3e8] sm:$0xff]  ;;  %v732_v18 = vld [vmem:[%s7565_s16 + $0x3e0] sm:$0xff]  ;;  %v699_v21 = vld [vmem:[%s7565_s16 + $0x2d8] sm:$0xff] }
  0xca   : > { %5365 = vmatprep.subr.mxu1 %v659_v50  ;;  %5331 = vmatpush3.msra.mxu0 %v611_v51  ;;  %v685_v15 = vld [vmem:[%s7565_s16 + $0x268] sm:$0xff]  ;;  %v684_v19 = vld [vmem:[%s7565_s16 + $0x260] sm:$0xff]  ;;  %v731_v22 = vld [vmem:[%s7565_s16 + $0x3d8] sm:$0xff] }
  0xcb   : > { %5366 = vmatpush3.msra.mxu1 %v643_v52  ;;  %5332 = vmatprep.subr.mxu0 %v626_v53  ;;  %v717_v16 = vld [vmem:[%s7565_s16 + $0x368] sm:$0xff]  ;;  %v716_v20 = vld [vmem:[%s7565_s16 + $0x360] sm:$0xff]  ;;  %v683_v23 = vld [vmem:[%s7565_s16 + $0x258] sm:$0xff] }
  0xcc   : > { %5367 = vmatprep.subr.mxu1 %v658_v54  ;;  %5333 = vmatpush3.msra.mxu0 %v610_v55  ;;  %v715_v24 = vld [vmem:[%s7565_s16 + $0x358] sm:$0xff]  ;;  %v698_v25 = vld [vmem:[%s7565_s16 + $0x2d0] sm:$0xff]  ;;  %v697_v29 = vld [vmem:[%s7565_s16 + $0x2c8] sm:$0xff] }
  0xcd   : > { %5368 = vmatpush3.msra.mxu1 %v642_v56  ;;  %5334 = vmatprep.subr.mxu0 %v625_v57  ;;  %v730_v26 = vld [vmem:[%s7565_s16 + $0x3d0] sm:$0xff]  ;;  %v729_v30 = vld [vmem:[%s7565_s16 + $0x3c8] sm:$0xff]  ;;  %v696_v33 = vld [vmem:[%s7565_s16 + $0x2c0] sm:$0xff] }
  0xce   : > { %5369 = vmatprep.subr.mxu1 %v657_v58  ;;  %5335 = vmatpush3.msra.mxu0 %v609_v59  ;;  %v682_v27 = vld [vmem:[%s7565_s16 + $0x250] sm:$0xff]  ;;  %v681_v31 = vld [vmem:[%s7565_s16 + $0x248] sm:$0xff]  ;;  %v728_v34 = vld [vmem:[%s7565_s16 + $0x3c0] sm:$0xff] }
  0xcf   : > { %5370 = vmatpush3.msra.mxu1 %v641_v60  ;;  %5336 = vmatprep.subr.mxu0 %v624_v61  ;;  %v714_v28 = vld [vmem:[%s7565_s16 + $0x350] sm:$0xff]  ;;  %v713_v32 = vld [vmem:[%s7565_s16 + $0x348] sm:$0xff]  ;;  %v680_v35 = vld [vmem:[%s7565_s16 + $0x240] sm:$0xff] }
  0xd0   : > { %5371 = vmatprep.subr.mxu1 %v656_v62  ;;  %5337 = vmatpush3.msra.mxu0 %v608_v63  ;;  %v712_v36 = vld [vmem:[%s7565_s16 + $0x340] sm:$0xff]  ;;  %v695_v37 = vld [vmem:[%s7565_s16 + $0x2b8] sm:$0xff]  ;;  %v694_v41 = vld [vmem:[%s7565_s16 + $0x2b0] sm:$0xff] }
  0xd1   : > { %2016 = vmatprep.mubr.f32.mxu0 %v525_v0  ;;  %5372 = vmatpush3.msra.mxu1 %v640_v1  ;;  %v727_v38 = vld [vmem:[%s7565_s16 + $0x3b8] sm:$0xff]  ;;  %v726_v42 = vld [vmem:[%s7565_s16 + $0x3b0] sm:$0xff]  ;;  %v693_v45 = vld [vmem:[%s7565_s16 + $0x2a8] sm:$0xff] }
  0xd2   : > { %2086 = vmatprep.mubr.f32.mxu1 %v527_v2  ;;  %2017 = vmatmul.mubr.f32.vlgmr.msra.gmra.mxu0 %v524_v3  ;;  %v679_v39 = vld [vmem:[%s7565_s16 + $0x238] sm:$0xff]  ;;  %v678_v43 = vld [vmem:[%s7565_s16 + $0x230] sm:$0xff]  ;;  %v725_v46 = vld [vmem:[%s7565_s16 + $0x3a8] sm:$0xff] }
  0xd3   : > { %2087 = vmatmul.mubr.f32.vlgmr.msra.gmra.mxu1 %v526_v4  ;;  %5376 = vmatprep.subr.mxu0 %v703_v5  ;;  %v711_v40 = vld [vmem:[%s7565_s16 + $0x338] sm:$0xff]  ;;  %v710_v44 = vld [vmem:[%s7565_s16 + $0x330] sm:$0xff]  ;;  %v677_v47 = vld [vmem:[%s7565_s16 + $0x228] sm:$0xff] }
  0xd4   : > { %5411 = vmatprep.subr.mxu1 %v735_v6  ;;  %5377 = vmatpush3.msra.mxu0 %v687_v7  ;;  %v709_v48 = vld [vmem:[%s7565_s16 + $0x328] sm:$0xff]  ;;  %v692_v49 = vld [vmem:[%s7565_s16 + $0x2a0] sm:$0xff]  ;;  %v691_v53 = vld [vmem:[%s7565_s16 + $0x298] sm:$0xff] }
  0xd5   : > { %5412 = vmatpush3.msra.mxu1 %v719_v8  ;;  %5378 = vmatprep.subr.mxu0 %v702_v9  ;;  %v724_v50 = vld [vmem:[%s7565_s16 + $0x3a0] sm:$0xff]  ;;  %v723_v54 = vld [vmem:[%s7565_s16 + $0x398] sm:$0xff]  ;;  %v690_v57 = vld [vmem:[%s7565_s16 + $0x290] sm:$0xff] }
  0xd6   : > { %5413 = vmatprep.subr.mxu1 %v734_v10  ;;  %5379 = vmatpush3.msra.mxu0 %v686_v11  ;;  %v676_v51 = vld [vmem:[%s7565_s16 + $0x220] sm:$0xff]  ;;  %v675_v55 = vld [vmem:[%s7565_s16 + $0x218] sm:$0xff]  ;;  %v722_v58 = vld [vmem:[%s7565_s16 + $0x390] sm:$0xff] }
  0xd7   : > { %5414 = vmatpush3.msra.mxu1 %v718_v12  ;;  %5380 = vmatprep.subr.mxu0 %v701_v13  ;;  %v708_v52 = vld [vmem:[%s7565_s16 + $0x320] sm:$0xff]  ;;  %v707_v56 = vld [vmem:[%s7565_s16 + $0x318] sm:$0xff]  ;;  %v674_v59 = vld [vmem:[%s7565_s16 + $0x210] sm:$0xff] }
  0xd8   : > { %5415 = vmatprep.subr.mxu1 %v733_v14  ;;  %5381 = vmatpush3.msra.mxu0 %v685_v15  ;;  %v706_v60 = vld [vmem:[%s7565_s16 + $0x310] sm:$0xff]  ;;  %v689_v61 = vld [vmem:[%s7565_s16 + $0x288] sm:$0xff]  ;;  %v688_v1 = vld [vmem:[%s7565_s16 + $0x280] sm:$0xff] }
  0xd9   : > { %5416 = vmatpush3.msra.mxu1 %v717_v16  ;;  %5382 = vmatprep.subr.mxu0 %v700_v17  ;;  %v721_v62 = vld [vmem:[%s7565_s16 + $0x388] sm:$0xff]  ;;  %v720_v2 = vld [vmem:[%s7565_s16 + $0x380] sm:$0xff]  ;;  %v528_v6 = vld [vmem:[%s7591_s29 + $0x20] sm:$0xff] }
  0xda   : > { %5417 = vmatprep.subr.mxu1 %v732_v18  ;;  %5383 = vmatpush3.msra.mxu0 %v684_v19  ;;  %v673_v63 = vld [vmem:[%s7565_s16 + $0x208] sm:$0xff]  ;;  %v672_v3 = vld [vmem:[%s7565_s16 + $0x200] sm:$0xff]  ;;  %v531_v7 = vld [vmem:[%s7591_s29 + $0x38] sm:$0xff] }
  0xdb   : > { %5418 = vmatpush3.msra.mxu1 %v716_v20  ;;  %5384 = vmatprep.subr.mxu0 %v699_v21  ;;  %v705_v0 = vld [vmem:[%s7565_s16 + $0x308] sm:$0xff]  ;;  %v529_v4 = vld [vmem:[%s7591_s29 + $0x28] sm:$0xff]  ;;  %v767_v8 = vld [vmem:[%s7565_s16 + $0x4f8] sm:$0xff] }
  0xdc   : > { %5419 = vmatprep.subr.mxu1 %v731_v22  ;;  %5385 = vmatpush3.msra.mxu0 %v683_v23  ;;  %v704_v5 = vld [vmem:[%s7565_s16 + $0x300] sm:$0xff]  ;;  %v799_v9 = vld [vmem:[%s7565_s16 + $0x5f8] sm:$0xff]  ;;  %v530_v10 = vld [vmem:[%s7591_s29 + $0x30] sm:$0xff] }
  0xdd   : > { %5420 = vmatpush3.msra.mxu1 %v715_v24  ;;  %5386 = vmatprep.subr.mxu0 %v698_v25  ;;  %v751_v11 = vld [vmem:[%s7565_s16 + $0x478] sm:$0xff]  ;;  %v766_v13 = vld [vmem:[%s7565_s16 + $0x4f0] sm:$0xff]  ;;  %v765_v17 = vld [vmem:[%s7565_s16 + $0x4e8] sm:$0xff] }
  0xde   : > { %5421 = vmatprep.subr.mxu1 %v730_v26  ;;  %5387 = vmatpush3.msra.mxu0 %v682_v27  ;;  %v783_v12 = vld [vmem:[%s7565_s16 + $0x578] sm:$0xff]  ;;  %v798_v14 = vld [vmem:[%s7565_s16 + $0x5f0] sm:$0xff]  ;;  %v797_v18 = vld [vmem:[%s7565_s16 + $0x5e8] sm:$0xff] }
  0xdf   : > { %5422 = vmatpush3.msra.mxu1 %v714_v28  ;;  %5388 = vmatprep.subr.mxu0 %v697_v29  ;;  %v750_v15 = vld [vmem:[%s7565_s16 + $0x470] sm:$0xff]  ;;  %v749_v19 = vld [vmem:[%s7565_s16 + $0x468] sm:$0xff]  ;;  %v764_v21 = vld [vmem:[%s7565_s16 + $0x4e0] sm:$0xff] }
  0xe0   : > { %5423 = vmatprep.subr.mxu1 %v729_v30  ;;  %5389 = vmatpush3.msra.mxu0 %v681_v31  ;;  %v782_v16 = vld [vmem:[%s7565_s16 + $0x570] sm:$0xff]  ;;  %v781_v20 = vld [vmem:[%s7565_s16 + $0x568] sm:$0xff]  ;;  %v796_v22 = vld [vmem:[%s7565_s16 + $0x5e0] sm:$0xff] }
  0xe1   : > { %5424 = vmatpush3.msra.mxu1 %v713_v32  ;;  %5390 = vmatprep.subr.mxu0 %v696_v33  ;;  %v748_v23 = vld [vmem:[%s7565_s16 + $0x460] sm:$0xff]  ;;  %v763_v25 = vld [vmem:[%s7565_s16 + $0x4d8] sm:$0xff]  ;;  %v762_v29 = vld [vmem:[%s7565_s16 + $0x4d0] sm:$0xff] }
  0xe2   : > { %5425 = vmatprep.subr.mxu1 %v728_v34  ;;  %5391 = vmatpush3.msra.mxu0 %v680_v35  ;;  %v780_v24 = vld [vmem:[%s7565_s16 + $0x560] sm:$0xff]  ;;  %v795_v26 = vld [vmem:[%s7565_s16 + $0x5d8] sm:$0xff]  ;;  %v794_v30 = vld [vmem:[%s7565_s16 + $0x5d0] sm:$0xff] }
  0xe3   : > { %5426 = vmatpush3.msra.mxu1 %v712_v36  ;;  %5392 = vmatprep.subr.mxu0 %v695_v37  ;;  %v747_v27 = vld [vmem:[%s7565_s16 + $0x458] sm:$0xff]  ;;  %v746_v31 = vld [vmem:[%s7565_s16 + $0x450] sm:$0xff]  ;;  %v761_v33 = vld [vmem:[%s7565_s16 + $0x4c8] sm:$0xff] }
  0xe4   : > { %5427 = vmatprep.subr.mxu1 %v727_v38  ;;  %5393 = vmatpush3.msra.mxu0 %v679_v39  ;;  %v779_v28 = vld [vmem:[%s7565_s16 + $0x558] sm:$0xff]  ;;  %v778_v32 = vld [vmem:[%s7565_s16 + $0x550] sm:$0xff]  ;;  %v793_v34 = vld [vmem:[%s7565_s16 + $0x5c8] sm:$0xff] }
  0xe5   : > { %5428 = vmatpush3.msra.mxu1 %v711_v40  ;;  %5394 = vmatprep.subr.mxu0 %v694_v41  ;;  %v745_v35 = vld [vmem:[%s7565_s16 + $0x448] sm:$0xff]  ;;  %v760_v37 = vld [vmem:[%s7565_s16 + $0x4c0] sm:$0xff]  ;;  %v759_v41 = vld [vmem:[%s7565_s16 + $0x4b8] sm:$0xff] }
  0xe6   : > { %5429 = vmatprep.subr.mxu1 %v726_v42  ;;  %5395 = vmatpush3.msra.mxu0 %v678_v43  ;;  %v777_v36 = vld [vmem:[%s7565_s16 + $0x548] sm:$0xff]  ;;  %v792_v38 = vld [vmem:[%s7565_s16 + $0x5c0] sm:$0xff]  ;;  %v791_v42 = vld [vmem:[%s7565_s16 + $0x5b8] sm:$0xff] }
  0xe7   : > { %5430 = vmatpush3.msra.mxu1 %v710_v44  ;;  %5396 = vmatprep.subr.mxu0 %v693_v45  ;;  %v744_v39 = vld [vmem:[%s7565_s16 + $0x440] sm:$0xff]  ;;  %v743_v43 = vld [vmem:[%s7565_s16 + $0x438] sm:$0xff]  ;;  %v758_v45 = vld [vmem:[%s7565_s16 + $0x4b0] sm:$0xff] }
  0xe8   : > { %5431 = vmatprep.subr.mxu1 %v725_v46  ;;  %5397 = vmatpush3.msra.mxu0 %v677_v47  ;;  %v776_v40 = vld [vmem:[%s7565_s16 + $0x540] sm:$0xff]  ;;  %v775_v44 = vld [vmem:[%s7565_s16 + $0x538] sm:$0xff]  ;;  %v790_v46 = vld [vmem:[%s7565_s16 + $0x5b0] sm:$0xff] }
  0xe9   : > { %5432 = vmatpush3.msra.mxu1 %v709_v48  ;;  %5398 = vmatprep.subr.mxu0 %v692_v49  ;;  %v742_v47 = vld [vmem:[%s7565_s16 + $0x430] sm:$0xff]  ;;  %v757_v49 = vld [vmem:[%s7565_s16 + $0x4a8] sm:$0xff] }
  0xea   : > { %5433 = vmatprep.subr.mxu1 %v724_v50  ;;  %5399 = vmatpush3.msra.mxu0 %v676_v51  ;;  %v774_v48 = vld [vmem:[%s7565_s16 + $0x530] sm:$0xff]  ;;  %v789_v50 = vld [vmem:[%s7565_s16 + $0x5a8] sm:$0xff] }
  0xeb   : > { %5434 = vmatpush3.msra.mxu1 %v708_v52  ;;  %5400 = vmatprep.subr.mxu0 %v691_v53  ;;  %v741_v51 = vld [vmem:[%s7565_s16 + $0x428] sm:$0xff]  ;;  %v756_v53 = vld [vmem:[%s7565_s16 + $0x4a0] sm:$0xff] }
  0xec   : > { %5435 = vmatprep.subr.mxu1 %v723_v54  ;;  %5401 = vmatpush3.msra.mxu0 %v675_v55  ;;  %v773_v52 = vld [vmem:[%s7565_s16 + $0x528] sm:$0xff]  ;;  %v788_v54 = vld [vmem:[%s7565_s16 + $0x5a0] sm:$0xff] }
  0xed   : > { %5436 = vmatpush3.msra.mxu1 %v707_v56  ;;  %5402 = vmatprep.subr.mxu0 %v690_v57  ;;  %v740_v55 = vld [vmem:[%s7565_s16 + $0x420] sm:$0xff]  ;;  %v755_v57 = vld [vmem:[%s7565_s16 + $0x498] sm:$0xff] }
  0xee   : > { %5437 = vmatprep.subr.mxu1 %v722_v58  ;;  %5403 = vmatpush3.msra.mxu0 %v674_v59  ;;  %v772_v56 = vld [vmem:[%s7565_s16 + $0x520] sm:$0xff]  ;;  %v787_v58 = vld [vmem:[%s7565_s16 + $0x598] sm:$0xff] }
  0xef   : > { %5438 = vmatpush3.msra.mxu1 %v706_v60  ;;  %5404 = vmatprep.subr.mxu0 %v689_v61  ;;  %v739_v59 = vld [vmem:[%s7565_s16 + $0x418] sm:$0xff]  ;;  %v754_v61 = vld [vmem:[%s7565_s16 + $0x490] sm:$0xff] }
  0xf0   : > { %5439 = vmatprep.subr.mxu1 %v721_v62  ;;  %5405 = vmatpush3.msra.mxu0 %v673_v63  ;;  %v771_v60 = vld [vmem:[%s7565_s16 + $0x518] sm:$0xff]  ;;  %v786_v62 = vld [vmem:[%s7565_s16 + $0x590] sm:$0xff] }
  0xf1   : > { %5440 = vmatpush3.msra.mxu1 %v705_v0  ;;  %5406 = vmatprep.subr.mxu0 %v688_v1  ;;  %v738_v63 = vld [vmem:[%s7565_s16 + $0x410] sm:$0xff]  ;;  %v753_v1 = vld [vmem:[%s7565_s16 + $0x488] sm:$0xff] }
  0xf2   : > { %5441 = vmatprep.subr.mxu1 %v720_v2  ;;  %5407 = vmatpush3.msra.mxu0 %v672_v3  ;;  %v770_v0 = vld [vmem:[%s7565_s16 + $0x510] sm:$0xff]  ;;  %v785_v2 = vld [vmem:[%s7565_s16 + $0x588] sm:$0xff] }
  0xf3   : > { %2156 = vmatprep.mubr.f32.mxu0 %v529_v4  ;;  %5442 = vmatpush3.msra.mxu1 %v704_v5  ;;  %v737_v3 = vld [vmem:[%s7565_s16 + $0x408] sm:$0xff]  ;;  %v752_v5 = vld [vmem:[%s7565_s16 + $0x480] sm:$0xff] }
  0xf4   : > { %2157 = vmatmul.mubr.f32.vlgmr.msra.gmra.mxu0 %v528_v6  ;;  %2226 = vmatprep.mubr.f32.mxu1 %v531_v7  ;;  %v769_v4 = vld [vmem:[%s7565_s16 + $0x508] sm:$0xff]  ;;  %v784_v6 = vld [vmem:[%s7565_s16 + $0x580] sm:$0xff] }
  0xf5   : > { %5446 = vmatprep.subr.mxu0 %v767_v8  ;;  %5481 = vmatprep.subr.mxu1 %v799_v9  ;;  %v736_v7 = vld [vmem:[%s7565_s16 + $0x400] sm:$0xff] }
  0xf6   : > { %2227 = vmatmul.mubr.f32.vlgmr.msra.gmra.mxu1 %v530_v10  ;;  %5447 = vmatpush3.msra.mxu0 %v751_v11  ;;  %v533_v8 = vld [vmem:[%s7591_s29 + $0x48] sm:$0xff]  ;;  %v532_v10 = vld [vmem:[%s7591_s29 + $0x40] sm:$0xff]  ;;  %v535_v11 = vld [vmem:[%s7591_s29 + $0x58] sm:$0xff] }
  0xf7   : > { %5482 = vmatpush3.msra.mxu1 %v783_v12  ;;  %5448 = vmatprep.subr.mxu0 %v766_v13  ;;  %v768_v9 = vld [vmem:[%s7565_s16 + $0x500] sm:$0xff]  ;;  %v831_v12 = vld [vmem:[%s7565_s16 + $0x6f8] sm:$0xff] }
  0xf8   : > { %5483 = vmatprep.subr.mxu1 %v798_v14  ;;  %5449 = vmatpush3.msra.mxu0 %v750_v15  ;;  %v863_v13 = vld [vmem:[%s7565_s16 + $0x7f8] sm:$0xff]  ;;  %v534_v14 = vld [vmem:[%s7591_s29 + $0x50] sm:$0xff] }
  0xf9   : > { %5484 = vmatpush3.msra.mxu1 %v782_v16  ;;  %5450 = vmatprep.subr.mxu0 %v765_v17  ;;  %v815_v15 = vld [vmem:[%s7565_s16 + $0x678] sm:$0xff]  ;;  %v830_v17 = vld [vmem:[%s7565_s16 + $0x6f0] sm:$0xff] }
  0xfa   : > { %5485 = vmatprep.subr.mxu1 %v797_v18  ;;  %5451 = vmatpush3.msra.mxu0 %v749_v19  ;;  %v847_v16 = vld [vmem:[%s7565_s16 + $0x778] sm:$0xff]  ;;  %v862_v18 = vld [vmem:[%s7565_s16 + $0x7f0] sm:$0xff] }
  0xfb   : > { %5486 = vmatpush3.msra.mxu1 %v781_v20  ;;  %5452 = vmatprep.subr.mxu0 %v764_v21  ;;  %v814_v19 = vld [vmem:[%s7565_s16 + $0x670] sm:$0xff]  ;;  %v829_v21 = vld [vmem:[%s7565_s16 + $0x6e8] sm:$0xff] }
  0xfc   : > { %5487 = vmatprep.subr.mxu1 %v796_v22  ;;  %5453 = vmatpush3.msra.mxu0 %v748_v23  ;;  %v846_v20 = vld [vmem:[%s7565_s16 + $0x770] sm:$0xff]  ;;  %v861_v22 = vld [vmem:[%s7565_s16 + $0x7e8] sm:$0xff] }
  0xfd   : > { %5488 = vmatpush3.msra.mxu1 %v780_v24  ;;  %5454 = vmatprep.subr.mxu0 %v763_v25  ;;  %v813_v23 = vld [vmem:[%s7565_s16 + $0x668] sm:$0xff]  ;;  %v828_v25 = vld [vmem:[%s7565_s16 + $0x6e0] sm:$0xff] }
  0xfe   : > { %5489 = vmatprep.subr.mxu1 %v795_v26  ;;  %5455 = vmatpush3.msra.mxu0 %v747_v27  ;;  %v845_v24 = vld [vmem:[%s7565_s16 + $0x768] sm:$0xff]  ;;  %v860_v26 = vld [vmem:[%s7565_s16 + $0x7e0] sm:$0xff] }
  0xff   : > { %5490 = vmatpush3.msra.mxu1 %v779_v28  ;;  %5456 = vmatprep.subr.mxu0 %v762_v29  ;;  %v812_v27 = vld [vmem:[%s7565_s16 + $0x660] sm:$0xff]  ;;  %v827_v29 = vld [vmem:[%s7565_s16 + $0x6d8] sm:$0xff] }
 0x100   : > { %5491 = vmatprep.subr.mxu1 %v794_v30  ;;  %5457 = vmatpush3.msra.mxu0 %v746_v31  ;;  %v844_v28 = vld [vmem:[%s7565_s16 + $0x760] sm:$0xff]  ;;  %v859_v30 = vld [vmem:[%s7565_s16 + $0x7d8] sm:$0xff] }
 0x101   : > { %5492 = vmatpush3.msra.mxu1 %v778_v32  ;;  %5458 = vmatprep.subr.mxu0 %v761_v33  ;;  %v811_v31 = vld [vmem:[%s7565_s16 + $0x658] sm:$0xff]  ;;  %v826_v33 = vld [vmem:[%s7565_s16 + $0x6d0] sm:$0xff] }
 0x102   : > { %5493 = vmatprep.subr.mxu1 %v793_v34  ;;  %5459 = vmatpush3.msra.mxu0 %v745_v35  ;;  %v843_v32 = vld [vmem:[%s7565_s16 + $0x758] sm:$0xff]  ;;  %v858_v34 = vld [vmem:[%s7565_s16 + $0x7d0] sm:$0xff] }
 0x103   : > { %5494 = vmatpush3.msra.mxu1 %v777_v36  ;;  %5460 = vmatprep.subr.mxu0 %v760_v37  ;;  %v810_v35 = vld [vmem:[%s7565_s16 + $0x650] sm:$0xff]  ;;  %v825_v37 = vld [vmem:[%s7565_s16 + $0x6c8] sm:$0xff] }
 0x104   : > { %5495 = vmatprep.subr.mxu1 %v792_v38  ;;  %5461 = vmatpush3.msra.mxu0 %v744_v39  ;;  %v842_v36 = vld [vmem:[%s7565_s16 + $0x750] sm:$0xff]  ;;  %v857_v38 = vld [vmem:[%s7565_s16 + $0x7c8] sm:$0xff] }
 0x105   : > { %5496 = vmatpush3.msra.mxu1 %v776_v40  ;;  %5462 = vmatprep.subr.mxu0 %v759_v41  ;;  %v809_v39 = vld [vmem:[%s7565_s16 + $0x648] sm:$0xff]  ;;  %v824_v41 = vld [vmem:[%s7565_s16 + $0x6c0] sm:$0xff] }
 0x106   : > { %5497 = vmatprep.subr.mxu1 %v791_v42  ;;  %5463 = vmatpush3.msra.mxu0 %v743_v43  ;;  %v841_v40 = vld [vmem:[%s7565_s16 + $0x748] sm:$0xff]  ;;  %v856_v42 = vld [vmem:[%s7565_s16 + $0x7c0] sm:$0xff] }
 0x107   : > { %5498 = vmatpush3.msra.mxu1 %v775_v44  ;;  %5464 = vmatprep.subr.mxu0 %v758_v45  ;;  %v808_v43 = vld [vmem:[%s7565_s16 + $0x640] sm:$0xff]  ;;  %v823_v45 = vld [vmem:[%s7565_s16 + $0x6b8] sm:$0xff] }
 0x108   : > { %5499 = vmatprep.subr.mxu1 %v790_v46  ;;  %5465 = vmatpush3.msra.mxu0 %v742_v47  ;;  %v840_v44 = vld [vmem:[%s7565_s16 + $0x740] sm:$0xff]  ;;  %v855_v46 = vld [vmem:[%s7565_s16 + $0x7b8] sm:$0xff] }
 0x109   : > { %5500 = vmatpush3.msra.mxu1 %v774_v48  ;;  %5466 = vmatprep.subr.mxu0 %v757_v49  ;;  %v807_v47 = vld [vmem:[%s7565_s16 + $0x638] sm:$0xff]  ;;  %v822_v49 = vld [vmem:[%s7565_s16 + $0x6b0] sm:$0xff] }
 0x10a   : > { %5501 = vmatprep.subr.mxu1 %v789_v50  ;;  %5467 = vmatpush3.msra.mxu0 %v741_v51  ;;  %v839_v48 = vld [vmem:[%s7565_s16 + $0x738] sm:$0xff]  ;;  %v854_v50 = vld [vmem:[%s7565_s16 + $0x7b0] sm:$0xff] }
 0x10b   : > { %5502 = vmatpush3.msra.mxu1 %v773_v52  ;;  %5468 = vmatprep.subr.mxu0 %v756_v53  ;;  %v806_v51 = vld [vmem:[%s7565_s16 + $0x630] sm:$0xff]  ;;  %v821_v53 = vld [vmem:[%s7565_s16 + $0x6a8] sm:$0xff] }
 0x10c   : > { %5503 = vmatprep.subr.mxu1 %v788_v54  ;;  %5469 = vmatpush3.msra.mxu0 %v740_v55  ;;  %v838_v52 = vld [vmem:[%s7565_s16 + $0x730] sm:$0xff]  ;;  %v853_v54 = vld [vmem:[%s7565_s16 + $0x7a8] sm:$0xff] }
 0x10d   : > { %5504 = vmatpush3.msra.mxu1 %v772_v56  ;;  %5470 = vmatprep.subr.mxu0 %v755_v57  ;;  %v805_v55 = vld [vmem:[%s7565_s16 + $0x628] sm:$0xff]  ;;  %v820_v57 = vld [vmem:[%s7565_s16 + $0x6a0] sm:$0xff] }
 0x10e   : > { %5505 = vmatprep.subr.mxu1 %v787_v58  ;;  %5471 = vmatpush3.msra.mxu0 %v739_v59  ;;  %v837_v56 = vld [vmem:[%s7565_s16 + $0x728] sm:$0xff]  ;;  %v852_v58 = vld [vmem:[%s7565_s16 + $0x7a0] sm:$0xff] }
 0x10f   : > { %5506 = vmatpush3.msra.mxu1 %v771_v60  ;;  %5472 = vmatprep.subr.mxu0 %v754_v61  ;;  %v804_v59 = vld [vmem:[%s7565_s16 + $0x620] sm:$0xff]  ;;  %v819_v61 = vld [vmem:[%s7565_s16 + $0x698] sm:$0xff] }
 0x110   : > { %5507 = vmatprep.subr.mxu1 %v786_v62  ;;  %5473 = vmatpush3.msra.mxu0 %v738_v63  ;;  %v836_v60 = vld [vmem:[%s7565_s16 + $0x720] sm:$0xff]  ;;  %v851_v62 = vld [vmem:[%s7565_s16 + $0x798] sm:$0xff] }
 0x111   : > { %5508 = vmatpush3.msra.mxu1 %v770_v0  ;;  %5474 = vmatprep.subr.mxu0 %v753_v1  ;;  %v803_v63 = vld [vmem:[%s7565_s16 + $0x618] sm:$0xff]  ;;  %v818_v1 = vld [vmem:[%s7565_s16 + $0x690] sm:$0xff] }
 0x112   : > { %5509 = vmatprep.subr.mxu1 %v785_v2  ;;  %5475 = vmatpush3.msra.mxu0 %v737_v3  ;;  %v835_v0 = vld [vmem:[%s7565_s16 + $0x718] sm:$0xff]  ;;  %v850_v2 = vld [vmem:[%s7565_s16 + $0x790] sm:$0xff] }
 0x113   : > { %5510 = vmatpush3.msra.mxu1 %v769_v4  ;;  %5476 = vmatprep.subr.mxu0 %v752_v5  ;;  %v802_v3 = vld [vmem:[%s7565_s16 + $0x610] sm:$0xff]  ;;  %v817_v5 = vld [vmem:[%s7565_s16 + $0x688] sm:$0xff] }
 0x114   : > { %5511 = vmatprep.subr.mxu1 %v784_v6  ;;  %5477 = vmatpush3.msra.mxu0 %v736_v7  ;;  %v834_v4 = vld [vmem:[%s7565_s16 + $0x710] sm:$0xff]  ;;  %v849_v6 = vld [vmem:[%s7565_s16 + $0x788] sm:$0xff] }
 0x115   : > { %2296 = vmatprep.mubr.f32.mxu0 %v533_v8  ;;  %5512 = vmatpush3.msra.mxu1 %v768_v9  ;;  %v801_v7 = vld [vmem:[%s7565_s16 + $0x608] sm:$0xff]  ;;  %v816_v9 = vld [vmem:[%s7565_s16 + $0x680] sm:$0xff] }
 0x116   : > { %2297 = vmatmul.mubr.f32.vlgmr.msra.gmra.mxu0 %v532_v10  ;;  %2366 = vmatprep.mubr.f32.mxu1 %v535_v11  ;;  %v833_v8 = vld [vmem:[%s7565_s16 + $0x708] sm:$0xff]  ;;  %v848_v10 = vld [vmem:[%s7565_s16 + $0x780] sm:$0xff] }
 0x117   : > { %5516 = vmatprep.subr.mxu0 %v831_v12  ;;  %5551 = vmatprep.subr.mxu1 %v863_v13  ;;  %v800_v11 = vld [vmem:[%s7565_s16 + $0x600] sm:$0xff] }
 0x118   : > { %2367 = vmatmul.mubr.f32.vlgmr.msra.gmra.mxu1 %v534_v14  ;;  %5517 = vmatpush3.msra.mxu0 %v815_v15  ;;  %v537_v12 = vld [vmem:[%s7591_s29 + $0x68] sm:$0xff]  ;;  %v536_v14 = vld [vmem:[%s7591_s29 + $0x60] sm:$0xff]  ;;  %v539_v15 = vld [vmem:[%s7591_s29 + $0x78] sm:$0xff] }
 0x119   : > { %5552 = vmatpush3.msra.mxu1 %v847_v16  ;;  %5518 = vmatprep.subr.mxu0 %v830_v17  ;;  %v832_v13 = vld [vmem:[%s7565_s16 + $0x700] sm:$0xff]  ;;  %v895_v16 = vld [vmem:[%s7565_s16 + $0x8f8] sm:$0xff] }
 0x11a   : > { %5553 = vmatprep.subr.mxu1 %v862_v18  ;;  %5519 = vmatpush3.msra.mxu0 %v814_v19  ;;  %v927_v17 = vld [vmem:[%s7565_s16 + $0x9f8] sm:$0xff]  ;;  %v538_v18 = vld [vmem:[%s7591_s29 + $0x70] sm:$0xff] }
 0x11b   : > { %5554 = vmatpush3.msra.mxu1 %v846_v20  ;;  %5520 = vmatprep.subr.mxu0 %v829_v21  ;;  %v879_v19 = vld [vmem:[%s7565_s16 + $0x878] sm:$0xff]  ;;  %v894_v21 = vld [vmem:[%s7565_s16 + $0x8f0] sm:$0xff] }
 0x11c   : > { %5555 = vmatprep.subr.mxu1 %v861_v22  ;;  %5521 = vmatpush3.msra.mxu0 %v813_v23  ;;  %v911_v20 = vld [vmem:[%s7565_s16 + $0x978] sm:$0xff]  ;;  %v926_v22 = vld [vmem:[%s7565_s16 + $0x9f0] sm:$0xff] }
 0x11d   : > { %5556 = vmatpush3.msra.mxu1 %v845_v24  ;;  %5522 = vmatprep.subr.mxu0 %v828_v25  ;;  %v878_v23 = vld [vmem:[%s7565_s16 + $0x870] sm:$0xff]  ;;  %v893_v25 = vld [vmem:[%s7565_s16 + $0x8e8] sm:$0xff] }
 0x11e   : > { %5557 = vmatprep.subr.mxu1 %v860_v26  ;;  %5523 = vmatpush3.msra.mxu0 %v812_v27  ;;  %v910_v24 = vld [vmem:[%s7565_s16 + $0x970] sm:$0xff]  ;;  %v925_v26 = vld [vmem:[%s7565_s16 + $0x9e8] sm:$0xff] }
 0x11f   : > { %5558 = vmatpush3.msra.mxu1 %v844_v28  ;;  %5524 = vmatprep.subr.mxu0 %v827_v29  ;;  %v877_v27 = vld [vmem:[%s7565_s16 + $0x868] sm:$0xff]  ;;  %v892_v29 = vld [vmem:[%s7565_s16 + $0x8e0] sm:$0xff] }
 0x120   : > { %5559 = vmatprep.subr.mxu1 %v859_v30  ;;  %5525 = vmatpush3.msra.mxu0 %v811_v31  ;;  %v909_v28 = vld [vmem:[%s7565_s16 + $0x968] sm:$0xff]  ;;  %v924_v30 = vld [vmem:[%s7565_s16 + $0x9e0] sm:$0xff] }
 0x121   : > { %5560 = vmatpush3.msra.mxu1 %v843_v32  ;;  %5526 = vmatprep.subr.mxu0 %v826_v33  ;;  %v876_v31 = vld [vmem:[%s7565_s16 + $0x860] sm:$0xff]  ;;  %v891_v33 = vld [vmem:[%s7565_s16 + $0x8d8] sm:$0xff] }
 0x122   : > { %5561 = vmatprep.subr.mxu1 %v858_v34  ;;  %5527 = vmatpush3.msra.mxu0 %v810_v35  ;;  %v908_v32 = vld [vmem:[%s7565_s16 + $0x960] sm:$0xff]  ;;  %v923_v34 = vld [vmem:[%s7565_s16 + $0x9d8] sm:$0xff] }
 0x123   : > { %5562 = vmatpush3.msra.mxu1 %v842_v36  ;;  %5528 = vmatprep.subr.mxu0 %v825_v37  ;;  %v875_v35 = vld [vmem:[%s7565_s16 + $0x858] sm:$0xff]  ;;  %v890_v37 = vld [vmem:[%s7565_s16 + $0x8d0] sm:$0xff] }
 0x124   : > { %5563 = vmatprep.subr.mxu1 %v857_v38  ;;  %5529 = vmatpush3.msra.mxu0 %v809_v39  ;;  %v907_v36 = vld [vmem:[%s7565_s16 + $0x958] sm:$0xff]  ;;  %v922_v38 = vld [vmem:[%s7565_s16 + $0x9d0] sm:$0xff] }
 0x125   : > { %5564 = vmatpush3.msra.mxu1 %v841_v40  ;;  %5530 = vmatprep.subr.mxu0 %v824_v41  ;;  %v874_v39 = vld [vmem:[%s7565_s16 + $0x850] sm:$0xff]  ;;  %v889_v41 = vld [vmem:[%s7565_s16 + $0x8c8] sm:$0xff] }
 0x126   : > { %5565 = vmatprep.subr.mxu1 %v856_v42  ;;  %5531 = vmatpush3.msra.mxu0 %v808_v43  ;;  %v906_v40 = vld [vmem:[%s7565_s16 + $0x950] sm:$0xff]  ;;  %v921_v42 = vld [vmem:[%s7565_s16 + $0x9c8] sm:$0xff] }
 0x127   : > { %5566 = vmatpush3.msra.mxu1 %v840_v44  ;;  %5532 = vmatprep.subr.mxu0 %v823_v45  ;;  %v873_v43 = vld [vmem:[%s7565_s16 + $0x848] sm:$0xff]  ;;  %v888_v45 = vld [vmem:[%s7565_s16 + $0x8c0] sm:$0xff] }
 0x128   : > { %5567 = vmatprep.subr.mxu1 %v855_v46  ;;  %5533 = vmatpush3.msra.mxu0 %v807_v47  ;;  %v905_v44 = vld [vmem:[%s7565_s16 + $0x948] sm:$0xff]  ;;  %v920_v46 = vld [vmem:[%s7565_s16 + $0x9c0] sm:$0xff] }
 0x129   : > { %5568 = vmatpush3.msra.mxu1 %v839_v48  ;;  %5534 = vmatprep.subr.mxu0 %v822_v49  ;;  %v872_v47 = vld [vmem:[%s7565_s16 + $0x840] sm:$0xff]  ;;  %v887_v49 = vld [vmem:[%s7565_s16 + $0x8b8] sm:$0xff] }
 0x12a   : > { %5569 = vmatprep.subr.mxu1 %v854_v50  ;;  %5535 = vmatpush3.msra.mxu0 %v806_v51  ;;  %v904_v48 = vld [vmem:[%s7565_s16 + $0x940] sm:$0xff]  ;;  %v919_v50 = vld [vmem:[%s7565_s16 + $0x9b8] sm:$0xff] }
 0x12b   : > { %5570 = vmatpush3.msra.mxu1 %v838_v52  ;;  %5536 = vmatprep.subr.mxu0 %v821_v53  ;;  %v871_v51 = vld [vmem:[%s7565_s16 + $0x838] sm:$0xff]  ;;  %v886_v53 = vld [vmem:[%s7565_s16 + $0x8b0] sm:$0xff] }
 0x12c   : > { %5571 = vmatprep.subr.mxu1 %v853_v54  ;;  %5537 = vmatpush3.msra.mxu0 %v805_v55  ;;  %v903_v52 = vld [vmem:[%s7565_s16 + $0x938] sm:$0xff]  ;;  %v918_v54 = vld [vmem:[%s7565_s16 + $0x9b0] sm:$0xff] }
 0x12d   : > { %5572 = vmatpush3.msra.mxu1 %v837_v56  ;;  %5538 = vmatprep.subr.mxu0 %v820_v57  ;;  %v870_v55 = vld [vmem:[%s7565_s16 + $0x830] sm:$0xff]  ;;  %v885_v57 = vld [vmem:[%s7565_s16 + $0x8a8] sm:$0xff] }
 0x12e   : > { %5573 = vmatprep.subr.mxu1 %v852_v58  ;;  %5539 = vmatpush3.msra.mxu0 %v804_v59  ;;  %v902_v56 = vld [vmem:[%s7565_s16 + $0x930] sm:$0xff]  ;;  %v917_v58 = vld [vmem:[%s7565_s16 + $0x9a8] sm:$0xff] }
 0x12f   : > { %5574 = vmatpush3.msra.mxu1 %v836_v60  ;;  %5540 = vmatprep.subr.mxu0 %v819_v61  ;;  %v869_v59 = vld [vmem:[%s7565_s16 + $0x828] sm:$0xff]  ;;  %v884_v61 = vld [vmem:[%s7565_s16 + $0x8a0] sm:$0xff] }
 0x130   : > { %5575 = vmatprep.subr.mxu1 %v851_v62  ;;  %5541 = vmatpush3.msra.mxu0 %v803_v63  ;;  %v901_v60 = vld [vmem:[%s7565_s16 + $0x928] sm:$0xff]  ;;  %v916_v62 = vld [vmem:[%s7565_s16 + $0x9a0] sm:$0xff] }
 0x131   : > { %5576 = vmatpush3.msra.mxu1 %v835_v0  ;;  %5542 = vmatprep.subr.mxu0 %v818_v1  ;;  %v868_v63 = vld [vmem:[%s7565_s16 + $0x820] sm:$0xff]  ;;  %v883_v1 = vld [vmem:[%s7565_s16 + $0x898] sm:$0xff] }
 0x132   : > { %5577 = vmatprep.subr.mxu1 %v850_v2  ;;  %5543 = vmatpush3.msra.mxu0 %v802_v3  ;;  %v900_v0 = vld [vmem:[%s7565_s16 + $0x920] sm:$0xff]  ;;  %v915_v2 = vld [vmem:[%s7565_s16 + $0x998] sm:$0xff] }
 0x133   : > { %5578 = vmatpush3.msra.mxu1 %v834_v4  ;;  %5544 = vmatprep.subr.mxu0 %v817_v5  ;;  %v867_v3 = vld [vmem:[%s7565_s16 + $0x818] sm:$0xff]  ;;  %v882_v5 = vld [vmem:[%s7565_s16 + $0x890] sm:$0xff] }
 0x134   : > { %5579 = vmatprep.subr.mxu1 %v849_v6  ;;  %5545 = vmatpush3.msra.mxu0 %v801_v7  ;;  %v899_v4 = vld [vmem:[%s7565_s16 + $0x918] sm:$0xff]  ;;  %v914_v6 = vld [vmem:[%s7565_s16 + $0x990] sm:$0xff] }
 0x135   : > { %5580 = vmatpush3.msra.mxu1 %v833_v8  ;;  %5546 = vmatprep.subr.mxu0 %v816_v9  ;;  %v866_v7 = vld [vmem:[%s7565_s16 + $0x810] sm:$0xff]  ;;  %v881_v9 = vld [vmem:[%s7565_s16 + $0x888] sm:$0xff] }
 0x136   : > { %5581 = vmatprep.subr.mxu1 %v848_v10  ;;  %5547 = vmatpush3.msra.mxu0 %v800_v11  ;;  %v898_v8 = vld [vmem:[%s7565_s16 + $0x910] sm:$0xff]  ;;  %v913_v10 = vld [vmem:[%s7565_s16 + $0x988] sm:$0xff] }
 0x137   : > { %2436 = vmatprep.mubr.f32.mxu0 %v537_v12  ;;  %5582 = vmatpush3.msra.mxu1 %v832_v13  ;;  %v865_v11 = vld [vmem:[%s7565_s16 + $0x808] sm:$0xff]  ;;  %v880_v13 = vld [vmem:[%s7565_s16 + $0x880] sm:$0xff] }
 0x138   : > { %2437 = vmatmul.mubr.f32.vlgmr.msra.gmra.mxu0 %v536_v14  ;;  %2506 = vmatprep.mubr.f32.mxu1 %v539_v15  ;;  %v897_v12 = vld [vmem:[%s7565_s16 + $0x908] sm:$0xff]  ;;  %v912_v14 = vld [vmem:[%s7565_s16 + $0x980] sm:$0xff] }
 0x139   : > { %5586 = vmatprep.subr.mxu0 %v895_v16  ;;  %5621 = vmatprep.subr.mxu1 %v927_v17  ;;  %v864_v15 = vld [vmem:[%s7565_s16 + $0x800] sm:$0xff] }
 0x13a   : > { %2507 = vmatmul.mubr.f32.vlgmr.msra.gmra.mxu1 %v538_v18  ;;  %5587 = vmatpush3.msra.mxu0 %v879_v19  ;;  %v541_v16 = vld [vmem:[%s7591_s29 + $0x88] sm:$0xff]  ;;  %v540_v18 = vld [vmem:[%s7591_s29 + $0x80] sm:$0xff]  ;;  %v543_v19 = vld [vmem:[%s7591_s29 + $0x98] sm:$0xff] }
 0x13b   : > { %5622 = vmatpush3.msra.mxu1 %v911_v20  ;;  %5588 = vmatprep.subr.mxu0 %v894_v21  ;;  %v896_v17 = vld [vmem:[%s7565_s16 + $0x900] sm:$0xff]  ;;  %v959_v20 = vld [vmem:[%s7565_s16 + $0xaf8] sm:$0xff] }
 0x13c   : > { %5623 = vmatprep.subr.mxu1 %v926_v22  ;;  %5589 = vmatpush3.msra.mxu0 %v878_v23  ;;  %v991_v21 = vld [vmem:[%s7565_s16 + $0xbf8] sm:$0xff]  ;;  %v542_v22 = vld [vmem:[%s7591_s29 + $0x90] sm:$0xff] }
 0x13d   : > { %5624 = vmatpush3.msra.mxu1 %v910_v24  ;;  %5590 = vmatprep.subr.mxu0 %v893_v25  ;;  %v943_v23 = vld [vmem:[%s7565_s16 + $0xa78] sm:$0xff]  ;;  %v958_v25 = vld [vmem:[%s7565_s16 + $0xaf0] sm:$0xff] }
 0x13e   : > { %5625 = vmatprep.subr.mxu1 %v925_v26  ;;  %5591 = vmatpush3.msra.mxu0 %v877_v27  ;;  %v975_v24 = vld [vmem:[%s7565_s16 + $0xb78] sm:$0xff]  ;;  %v990_v26 = vld [vmem:[%s7565_s16 + $0xbf0] sm:$0xff] }
 0x13f   : > { %5626 = vmatpush3.msra.mxu1 %v909_v28  ;;  %5592 = vmatprep.subr.mxu0 %v892_v29  ;;  %v942_v27 = vld [vmem:[%s7565_s16 + $0xa70] sm:$0xff]  ;;  %v957_v29 = vld [vmem:[%s7565_s16 + $0xae8] sm:$0xff] }
 0x140   : > { %5627 = vmatprep.subr.mxu1 %v924_v30  ;;  %5593 = vmatpush3.msra.mxu0 %v876_v31  ;;  %v974_v28 = vld [vmem:[%s7565_s16 + $0xb70] sm:$0xff]  ;;  %v989_v30 = vld [vmem:[%s7565_s16 + $0xbe8] sm:$0xff] }
 0x141   : > { %5628 = vmatpush3.msra.mxu1 %v908_v32  ;;  %5594 = vmatprep.subr.mxu0 %v891_v33  ;;  %v941_v31 = vld [vmem:[%s7565_s16 + $0xa68] sm:$0xff]  ;;  %v956_v33 = vld [vmem:[%s7565_s16 + $0xae0] sm:$0xff] }
 0x142   : > { %5629 = vmatprep.subr.mxu1 %v923_v34  ;;  %5595 = vmatpush3.msra.mxu0 %v875_v35  ;;  %v973_v32 = vld [vmem:[%s7565_s16 + $0xb68] sm:$0xff]  ;;  %v988_v34 = vld [vmem:[%s7565_s16 + $0xbe0] sm:$0xff] }
 0x143   : > { %5630 = vmatpush3.msra.mxu1 %v907_v36  ;;  %5596 = vmatprep.subr.mxu0 %v890_v37  ;;  %v940_v35 = vld [vmem:[%s7565_s16 + $0xa60] sm:$0xff]  ;;  %v955_v37 = vld [vmem:[%s7565_s16 + $0xad8] sm:$0xff] }
 0x144   : > { %5631 = vmatprep.subr.mxu1 %v922_v38  ;;  %5597 = vmatpush3.msra.mxu0 %v874_v39  ;;  %v972_v36 = vld [vmem:[%s7565_s16 + $0xb60] sm:$0xff]  ;;  %v987_v38 = vld [vmem:[%s7565_s16 + $0xbd8] sm:$0xff] }
 0x145   : > { %5632 = vmatpush3.msra.mxu1 %v906_v40  ;;  %5598 = vmatprep.subr.mxu0 %v889_v41  ;;  %v939_v39 = vld [vmem:[%s7565_s16 + $0xa58] sm:$0xff]  ;;  %v954_v41 = vld [vmem:[%s7565_s16 + $0xad0] sm:$0xff] }
 0x146   : > { %5633 = vmatprep.subr.mxu1 %v921_v42  ;;  %5599 = vmatpush3.msra.mxu0 %v873_v43  ;;  %v971_v40 = vld [vmem:[%s7565_s16 + $0xb58] sm:$0xff]  ;;  %v986_v42 = vld [vmem:[%s7565_s16 + $0xbd0] sm:$0xff] }
 0x147   : > { %5634 = vmatpush3.msra.mxu1 %v905_v44  ;;  %5600 = vmatprep.subr.mxu0 %v888_v45  ;;  %v938_v43 = vld [vmem:[%s7565_s16 + $0xa50] sm:$0xff]  ;;  %v953_v45 = vld [vmem:[%s7565_s16 + $0xac8] sm:$0xff] }
 0x148   : > { %5635 = vmatprep.subr.mxu1 %v920_v46  ;;  %5601 = vmatpush3.msra.mxu0 %v872_v47  ;;  %v970_v44 = vld [vmem:[%s7565_s16 + $0xb50] sm:$0xff]  ;;  %v985_v46 = vld [vmem:[%s7565_s16 + $0xbc8] sm:$0xff] }
 0x149   : > { %5636 = vmatpush3.msra.mxu1 %v904_v48  ;;  %5602 = vmatprep.subr.mxu0 %v887_v49  ;;  %v937_v47 = vld [vmem:[%s7565_s16 + $0xa48] sm:$0xff]  ;;  %v952_v49 = vld [vmem:[%s7565_s16 + $0xac0] sm:$0xff] }
 0x14a   : > { %5637 = vmatprep.subr.mxu1 %v919_v50  ;;  %5603 = vmatpush3.msra.mxu0 %v871_v51  ;;  %v969_v48 = vld [vmem:[%s7565_s16 + $0xb48] sm:$0xff]  ;;  %v984_v50 = vld [vmem:[%s7565_s16 + $0xbc0] sm:$0xff] }
 0x14b   : > { %5638 = vmatpush3.msra.mxu1 %v903_v52  ;;  %5604 = vmatprep.subr.mxu0 %v886_v53  ;;  %v936_v51 = vld [vmem:[%s7565_s16 + $0xa40] sm:$0xff]  ;;  %v951_v53 = vld [vmem:[%s7565_s16 + $0xab8] sm:$0xff] }
 0x14c   : > { %5639 = vmatprep.subr.mxu1 %v918_v54  ;;  %5605 = vmatpush3.msra.mxu0 %v870_v55  ;;  %v968_v52 = vld [vmem:[%s7565_s16 + $0xb40] sm:$0xff]  ;;  %v983_v54 = vld [vmem:[%s7565_s16 + $0xbb8] sm:$0xff] }
 0x14d   : > { %5640 = vmatpush3.msra.mxu1 %v902_v56  ;;  %5606 = vmatprep.subr.mxu0 %v885_v57  ;;  %v935_v55 = vld [vmem:[%s7565_s16 + $0xa38] sm:$0xff]  ;;  %v950_v57 = vld [vmem:[%s7565_s16 + $0xab0] sm:$0xff] }
 0x14e   : > { %5641 = vmatprep.subr.mxu1 %v917_v58  ;;  %5607 = vmatpush3.msra.mxu0 %v869_v59  ;;  %v967_v56 = vld [vmem:[%s7565_s16 + $0xb38] sm:$0xff]  ;;  %v982_v58 = vld [vmem:[%s7565_s16 + $0xbb0] sm:$0xff] }
 0x14f   : > { %5642 = vmatpush3.msra.mxu1 %v901_v60  ;;  %5608 = vmatprep.subr.mxu0 %v884_v61  ;;  %v934_v59 = vld [vmem:[%s7565_s16 + $0xa30] sm:$0xff]  ;;  %v949_v61 = vld [vmem:[%s7565_s16 + $0xaa8] sm:$0xff] }
 0x150   : > { %5643 = vmatprep.subr.mxu1 %v916_v62  ;;  %5609 = vmatpush3.msra.mxu0 %v868_v63  ;;  %v966_v60 = vld [vmem:[%s7565_s16 + $0xb30] sm:$0xff]  ;;  %v981_v62 = vld [vmem:[%s7565_s16 + $0xba8] sm:$0xff] }
 0x151   : > { %5644 = vmatpush3.msra.mxu1 %v900_v0  ;;  %5610 = vmatprep.subr.mxu0 %v883_v1  ;;  %v933_v63 = vld [vmem:[%s7565_s16 + $0xa28] sm:$0xff]  ;;  %v948_v1 = vld [vmem:[%s7565_s16 + $0xaa0] sm:$0xff] }
 0x152   : > { %5645 = vmatprep.subr.mxu1 %v915_v2  ;;  %5611 = vmatpush3.msra.mxu0 %v867_v3  ;;  %v965_v0 = vld [vmem:[%s7565_s16 + $0xb28] sm:$0xff]  ;;  %v980_v2 = vld [vmem:[%s7565_s16 + $0xba0] sm:$0xff] }
 0x153   : > { %5646 = vmatpush3.msra.mxu1 %v899_v4  ;;  %5612 = vmatprep.subr.mxu0 %v882_v5  ;;  %v932_v3 = vld [vmem:[%s7565_s16 + $0xa20] sm:$0xff]  ;;  %v947_v5 = vld [vmem:[%s7565_s16 + $0xa98] sm:$0xff] }
 0x154   : > { %5647 = vmatprep.subr.mxu1 %v914_v6  ;;  %5613 = vmatpush3.msra.mxu0 %v866_v7  ;;  %v964_v4 = vld [vmem:[%s7565_s16 + $0xb20] sm:$0xff]  ;;  %v979_v6 = vld [vmem:[%s7565_s16 + $0xb98] sm:$0xff] }
 0x155   : > { %5648 = vmatpush3.msra.mxu1 %v898_v8  ;;  %5614 = vmatprep.subr.mxu0 %v881_v9  ;;  %v931_v7 = vld [vmem:[%s7565_s16 + $0xa18] sm:$0xff]  ;;  %v946_v9 = vld [vmem:[%s7565_s16 + $0xa90] sm:$0xff] }
 0x156   : > { %5649 = vmatprep.subr.mxu1 %v913_v10  ;;  %5615 = vmatpush3.msra.mxu0 %v865_v11  ;;  %v963_v8 = vld [vmem:[%s7565_s16 + $0xb18] sm:$0xff]  ;;  %v978_v10 = vld [vmem:[%s7565_s16 + $0xb90] sm:$0xff] }
 0x157   : > { %5650 = vmatpush3.msra.mxu1 %v897_v12  ;;  %5616 = vmatprep.subr.mxu0 %v880_v13  ;;  %v930_v11 = vld [vmem:[%s7565_s16 + $0xa10] sm:$0xff]  ;;  %v945_v13 = vld [vmem:[%s7565_s16 + $0xa88] sm:$0xff] }
 0x158   : > { %5651 = vmatprep.subr.mxu1 %v912_v14  ;;  %5617 = vmatpush3.msra.mxu0 %v864_v15  ;;  %v962_v12 = vld [vmem:[%s7565_s16 + $0xb10] sm:$0xff]  ;;  %v977_v14 = vld [vmem:[%s7565_s16 + $0xb88] sm:$0xff] }
 0x159   : > { %2576 = vmatprep.mubr.f32.mxu0 %v541_v16  ;;  %5652 = vmatpush3.msra.mxu1 %v896_v17  ;;  %v929_v15 = vld [vmem:[%s7565_s16 + $0xa08] sm:$0xff]  ;;  %v944_v17 = vld [vmem:[%s7565_s16 + $0xa80] sm:$0xff] }
 0x15a   : > { %2577 = vmatmul.mubr.f32.vlgmr.msra.gmra.mxu0 %v540_v18  ;;  %2646 = vmatprep.mubr.f32.mxu1 %v543_v19  ;;  %v961_v16 = vld [vmem:[%s7565_s16 + $0xb08] sm:$0xff]  ;;  %v976_v18 = vld [vmem:[%s7565_s16 + $0xb80] sm:$0xff] }
 0x15b   : > { %5656 = vmatprep.subr.mxu0 %v959_v20  ;;  %5691 = vmatprep.subr.mxu1 %v991_v21  ;;  %v928_v19 = vld [vmem:[%s7565_s16 + $0xa00] sm:$0xff] }
 0x15c   : > { %2647 = vmatmul.mubr.f32.vlgmr.msra.gmra.mxu1 %v542_v22  ;;  %5657 = vmatpush3.msra.mxu0 %v943_v23  ;;  %v545_v20 = vld [vmem:[%s7591_s29 + $0xa8] sm:$0xff]  ;;  %v544_v22 = vld [vmem:[%s7591_s29 + $0xa0] sm:$0xff]  ;;  %v547_v23 = vld [vmem:[%s7591_s29 + $0xb8] sm:$0xff] }
 0x15d   : > { %5692 = vmatpush3.msra.mxu1 %v975_v24  ;;  %5658 = vmatprep.subr.mxu0 %v958_v25  ;;  %v960_v21 = vld [vmem:[%s7565_s16 + $0xb00] sm:$0xff]  ;;  %v1023_v24 = vld [vmem:[%s7565_s16 + $0xcf8] sm:$0xff] }
 0x15e   : > { %5693 = vmatprep.subr.mxu1 %v990_v26  ;;  %5659 = vmatpush3.msra.mxu0 %v942_v27  ;;  %v1055_v25 = vld [vmem:[%s7565_s16 + $0xdf8] sm:$0xff]  ;;  %v546_v26 = vld [vmem:[%s7591_s29 + $0xb0] sm:$0xff] }
 0x15f   : > { %5694 = vmatpush3.msra.mxu1 %v974_v28  ;;  %5660 = vmatprep.subr.mxu0 %v957_v29  ;;  %v1007_v27 = vld [vmem:[%s7565_s16 + $0xc78] sm:$0xff]  ;;  %v1022_v29 = vld [vmem:[%s7565_s16 + $0xcf0] sm:$0xff] }
 0x160   : > { %5695 = vmatprep.subr.mxu1 %v989_v30  ;;  %5661 = vmatpush3.msra.mxu0 %v941_v31  ;;  %v1039_v28 = vld [vmem:[%s7565_s16 + $0xd78] sm:$0xff]  ;;  %v1054_v30 = vld [vmem:[%s7565_s16 + $0xdf0] sm:$0xff] }
 0x161   : > { %5696 = vmatpush3.msra.mxu1 %v973_v32  ;;  %5662 = vmatprep.subr.mxu0 %v956_v33  ;;  %v1006_v31 = vld [vmem:[%s7565_s16 + $0xc70] sm:$0xff]  ;;  %v1021_v33 = vld [vmem:[%s7565_s16 + $0xce8] sm:$0xff] }
 0x162   : > { %5697 = vmatprep.subr.mxu1 %v988_v34  ;;  %5663 = vmatpush3.msra.mxu0 %v940_v35  ;;  %v1038_v32 = vld [vmem:[%s7565_s16 + $0xd70] sm:$0xff]  ;;  %v1053_v34 = vld [vmem:[%s7565_s16 + $0xde8] sm:$0xff] }
 0x163   : > { %5698 = vmatpush3.msra.mxu1 %v972_v36  ;;  %5664 = vmatprep.subr.mxu0 %v955_v37  ;;  %v1005_v35 = vld [vmem:[%s7565_s16 + $0xc68] sm:$0xff]  ;;  %v1020_v37 = vld [vmem:[%s7565_s16 + $0xce0] sm:$0xff] }
 0x164   : > { %5699 = vmatprep.subr.mxu1 %v987_v38  ;;  %5665 = vmatpush3.msra.mxu0 %v939_v39  ;;  %v1037_v36 = vld [vmem:[%s7565_s16 + $0xd68] sm:$0xff]  ;;  %v1052_v38 = vld [vmem:[%s7565_s16 + $0xde0] sm:$0xff] }
 0x165   : > { %5700 = vmatpush3.msra.mxu1 %v971_v40  ;;  %5666 = vmatprep.subr.mxu0 %v954_v41  ;;  %v1004_v39 = vld [vmem:[%s7565_s16 + $0xc60] sm:$0xff]  ;;  %v1019_v41 = vld [vmem:[%s7565_s16 + $0xcd8] sm:$0xff] }
 0x166   : > { %5701 = vmatprep.subr.mxu1 %v986_v42  ;;  %5667 = vmatpush3.msra.mxu0 %v938_v43  ;;  %v1036_v40 = vld [vmem:[%s7565_s16 + $0xd60] sm:$0xff]  ;;  %v1051_v42 = vld [vmem:[%s7565_s16 + $0xdd8] sm:$0xff] }
 0x167   : > { %5702 = vmatpush3.msra.mxu1 %v970_v44  ;;  %5668 = vmatprep.subr.mxu0 %v953_v45  ;;  %v1003_v43 = vld [vmem:[%s7565_s16 + $0xc58] sm:$0xff]  ;;  %v1018_v45 = vld [vmem:[%s7565_s16 + $0xcd0] sm:$0xff] }
 0x168   : > { %5703 = vmatprep.subr.mxu1 %v985_v46  ;;  %5669 = vmatpush3.msra.mxu0 %v937_v47  ;;  %v1035_v44 = vld [vmem:[%s7565_s16 + $0xd58] sm:$0xff]  ;;  %v1050_v46 = vld [vmem:[%s7565_s16 + $0xdd0] sm:$0xff] }
 0x169   : > { %5704 = vmatpush3.msra.mxu1 %v969_v48  ;;  %5670 = vmatprep.subr.mxu0 %v952_v49  ;;  %v1002_v47 = vld [vmem:[%s7565_s16 + $0xc50] sm:$0xff]  ;;  %v1017_v49 = vld [vmem:[%s7565_s16 + $0xcc8] sm:$0xff] }
 0x16a   : > { %5705 = vmatprep.subr.mxu1 %v984_v50  ;;  %5671 = vmatpush3.msra.mxu0 %v936_v51  ;;  %v1034_v48 = vld [vmem:[%s7565_s16 + $0xd50] sm:$0xff]  ;;  %v1049_v50 = vld [vmem:[%s7565_s16 + $0xdc8] sm:$0xff] }
 0x16b   : > { %5706 = vmatpush3.msra.mxu1 %v968_v52  ;;  %5672 = vmatprep.subr.mxu0 %v951_v53  ;;  %v1001_v51 = vld [vmem:[%s7565_s16 + $0xc48] sm:$0xff]  ;;  %v1016_v53 = vld [vmem:[%s7565_s16 + $0xcc0] sm:$0xff] }
 0x16c   : > { %5707 = vmatprep.subr.mxu1 %v983_v54  ;;  %5673 = vmatpush3.msra.mxu0 %v935_v55  ;;  %v1033_v52 = vld [vmem:[%s7565_s16 + $0xd48] sm:$0xff]  ;;  %v1048_v54 = vld [vmem:[%s7565_s16 + $0xdc0] sm:$0xff] }
 0x16d   : > { %5708 = vmatpush3.msra.mxu1 %v967_v56  ;;  %5674 = vmatprep.subr.mxu0 %v950_v57  ;;  %v1000_v55 = vld [vmem:[%s7565_s16 + $0xc40] sm:$0xff]  ;;  %v1015_v57 = vld [vmem:[%s7565_s16 + $0xcb8] sm:$0xff] }
 0x16e   : > { %5709 = vmatprep.subr.mxu1 %v982_v58  ;;  %5675 = vmatpush3.msra.mxu0 %v934_v59  ;;  %v1032_v56 = vld [vmem:[%s7565_s16 + $0xd40] sm:$0xff]  ;;  %v1047_v58 = vld [vmem:[%s7565_s16 + $0xdb8] sm:$0xff] }
 0x16f   : > { %5710 = vmatpush3.msra.mxu1 %v966_v60  ;;  %5676 = vmatprep.subr.mxu0 %v949_v61  ;;  %v999_v59 = vld [vmem:[%s7565_s16 + $0xc38] sm:$0xff]  ;;  %v1014_v61 = vld [vmem:[%s7565_s16 + $0xcb0] sm:$0xff] }
 0x170   : > { %5711 = vmatprep.subr.mxu1 %v981_v62  ;;  %5677 = vmatpush3.msra.mxu0 %v933_v63  ;;  %v1031_v60 = vld [vmem:[%s7565_s16 + $0xd38] sm:$0xff]  ;;  %v1046_v62 = vld [vmem:[%s7565_s16 + $0xdb0] sm:$0xff] }
 0x171   : > { %5712 = vmatpush3.msra.mxu1 %v965_v0  ;;  %5678 = vmatprep.subr.mxu0 %v948_v1  ;;  %v998_v63 = vld [vmem:[%s7565_s16 + $0xc30] sm:$0xff]  ;;  %v1013_v1 = vld [vmem:[%s7565_s16 + $0xca8] sm:$0xff] }
 0x172   : > { %5713 = vmatprep.subr.mxu1 %v980_v2  ;;  %5679 = vmatpush3.msra.mxu0 %v932_v3  ;;  %v1030_v0 = vld [vmem:[%s7565_s16 + $0xd30] sm:$0xff]  ;;  %v1045_v2 = vld [vmem:[%s7565_s16 + $0xda8] sm:$0xff] }
 0x173   : > { %5714 = vmatpush3.msra.mxu1 %v964_v4  ;;  %5680 = vmatprep.subr.mxu0 %v947_v5  ;;  %v997_v3 = vld [vmem:[%s7565_s16 + $0xc28] sm:$0xff]  ;;  %v1012_v5 = vld [vmem:[%s7565_s16 + $0xca0] sm:$0xff] }
 0x174   : > { %5715 = vmatprep.subr.mxu1 %v979_v6  ;;  %5681 = vmatpush3.msra.mxu0 %v931_v7  ;;  %v1029_v4 = vld [vmem:[%s7565_s16 + $0xd28] sm:$0xff]  ;;  %v1044_v6 = vld [vmem:[%s7565_s16 + $0xda0] sm:$0xff] }
 0x175   : > { %5716 = vmatpush3.msra.mxu1 %v963_v8  ;;  %5682 = vmatprep.subr.mxu0 %v946_v9  ;;  %v996_v7 = vld [vmem:[%s7565_s16 + $0xc20] sm:$0xff]  ;;  %v1011_v9 = vld [vmem:[%s7565_s16 + $0xc98] sm:$0xff] }
 0x176   : > { %5717 = vmatprep.subr.mxu1 %v978_v10  ;;  %5683 = vmatpush3.msra.mxu0 %v930_v11  ;;  %v1028_v8 = vld [vmem:[%s7565_s16 + $0xd20] sm:$0xff]  ;;  %v1043_v10 = vld [vmem:[%s7565_s16 + $0xd98] sm:$0xff] }
 0x177   : > { %5718 = vmatpush3.msra.mxu1 %v962_v12  ;;  %5684 = vmatprep.subr.mxu0 %v945_v13  ;;  %v995_v11 = vld [vmem:[%s7565_s16 + $0xc18] sm:$0xff]  ;;  %v1010_v13 = vld [vmem:[%s7565_s16 + $0xc90] sm:$0xff] }
 0x178   : > { %5719 = vmatprep.subr.mxu1 %v977_v14  ;;  %5685 = vmatpush3.msra.mxu0 %v929_v15  ;;  %v1027_v12 = vld [vmem:[%s7565_s16 + $0xd18] sm:$0xff]  ;;  %v1042_v14 = vld [vmem:[%s7565_s16 + $0xd90] sm:$0xff] }
 0x179   : > { %5720 = vmatpush3.msra.mxu1 %v961_v16  ;;  %5686 = vmatprep.subr.mxu0 %v944_v17  ;;  %v994_v15 = vld [vmem:[%s7565_s16 + $0xc10] sm:$0xff]  ;;  %v1009_v17 = vld [vmem:[%s7565_s16 + $0xc88] sm:$0xff] }
 0x17a   : > { %5721 = vmatprep.subr.mxu1 %v976_v18  ;;  %5687 = vmatpush3.msra.mxu0 %v928_v19  ;;  %v1026_v16 = vld [vmem:[%s7565_s16 + $0xd10] sm:$0xff]  ;;  %v1041_v18 = vld [vmem:[%s7565_s16 + $0xd88] sm:$0xff] }
 0x17b   : > { %2716 = vmatprep.mubr.f32.mxu0 %v545_v20  ;;  %5722 = vmatpush3.msra.mxu1 %v960_v21  ;;  %v993_v19 = vld [vmem:[%s7565_s16 + $0xc08] sm:$0xff]  ;;  %v1008_v21 = vld [vmem:[%s7565_s16 + $0xc80] sm:$0xff] }
 0x17c   : > { %2717 = vmatmul.mubr.f32.vlgmr.msra.gmra.mxu0 %v544_v22  ;;  %2786 = vmatprep.mubr.f32.mxu1 %v547_v23  ;;  %v1025_v20 = vld [vmem:[%s7565_s16 + $0xd08] sm:$0xff]  ;;  %v1040_v22 = vld [vmem:[%s7565_s16 + $0xd80] sm:$0xff] }
 0x17d   : > { %5726 = vmatprep.subr.mxu0 %v1023_v24  ;;  %5761 = vmatprep.subr.mxu1 %v1055_v25  ;;  %v992_v23 = vld [vmem:[%s7565_s16 + $0xc00] sm:$0xff] }
 0x17e   : > { %2787 = vmatmul.mubr.f32.vlgmr.msra.gmra.mxu1 %v546_v26  ;;  %5727 = vmatpush3.msra.mxu0 %v1007_v27  ;;  %v549_v24 = vld [vmem:[%s7591_s29 + $0xc8] sm:$0xff]  ;;  %v548_v26 = vld [vmem:[%s7591_s29 + $0xc0] sm:$0xff]  ;;  %v551_v27 = vld [vmem:[%s7591_s29 + $0xd8] sm:$0xff] }
 0x17f   : > { %5762 = vmatpush3.msra.mxu1 %v1039_v28  ;;  %5728 = vmatprep.subr.mxu0 %v1022_v29  ;;  %v1024_v25 = vld [vmem:[%s7565_s16 + $0xd00] sm:$0xff]  ;;  %v1087_v28 = vld [vmem:[%s7565_s16 + $0xef8] sm:$0xff] }
 0x180   : > { %5763 = vmatprep.subr.mxu1 %v1054_v30  ;;  %5729 = vmatpush3.msra.mxu0 %v1006_v31  ;;  %v1119_v29 = vld [vmem:[%s7565_s16 + $0xff8] sm:$0xff]  ;;  %v550_v30 = vld [vmem:[%s7591_s29 + $0xd0] sm:$0xff] }
 0x181   : > { %5764 = vmatpush3.msra.mxu1 %v1038_v32  ;;  %5730 = vmatprep.subr.mxu0 %v1021_v33  ;;  %v1071_v31 = vld [vmem:[%s7565_s16 + $0xe78] sm:$0xff]  ;;  %v1086_v33 = vld [vmem:[%s7565_s16 + $0xef0] sm:$0xff] }
 0x182   : > { %5765 = vmatprep.subr.mxu1 %v1053_v34  ;;  %5731 = vmatpush3.msra.mxu0 %v1005_v35  ;;  %v1103_v32 = vld [vmem:[%s7565_s16 + $0xf78] sm:$0xff]  ;;  %v1118_v34 = vld [vmem:[%s7565_s16 + $0xff0] sm:$0xff] }
 0x183   : > { %5766 = vmatpush3.msra.mxu1 %v1037_v36  ;;  %5732 = vmatprep.subr.mxu0 %v1020_v37  ;;  %v1070_v35 = vld [vmem:[%s7565_s16 + $0xe70] sm:$0xff]  ;;  %v1085_v37 = vld [vmem:[%s7565_s16 + $0xee8] sm:$0xff] }
 0x184   : > { %5767 = vmatprep.subr.mxu1 %v1052_v38  ;;  %5733 = vmatpush3.msra.mxu0 %v1004_v39  ;;  %v1102_v36 = vld [vmem:[%s7565_s16 + $0xf70] sm:$0xff]  ;;  %v1117_v38 = vld [vmem:[%s7565_s16 + $0xfe8] sm:$0xff] }
 0x185   : > { %5768 = vmatpush3.msra.mxu1 %v1036_v40  ;;  %5734 = vmatprep.subr.mxu0 %v1019_v41  ;;  %v1069_v39 = vld [vmem:[%s7565_s16 + $0xe68] sm:$0xff]  ;;  %v1084_v41 = vld [vmem:[%s7565_s16 + $0xee0] sm:$0xff] }
 0x186   : > { %5769 = vmatprep.subr.mxu1 %v1051_v42  ;;  %5735 = vmatpush3.msra.mxu0 %v1003_v43  ;;  %v1101_v40 = vld [vmem:[%s7565_s16 + $0xf68] sm:$0xff]  ;;  %v1116_v42 = vld [vmem:[%s7565_s16 + $0xfe0] sm:$0xff] }
 0x187   : > { %5770 = vmatpush3.msra.mxu1 %v1035_v44  ;;  %5736 = vmatprep.subr.mxu0 %v1018_v45  ;;  %v1068_v43 = vld [vmem:[%s7565_s16 + $0xe60] sm:$0xff]  ;;  %v1083_v45 = vld [vmem:[%s7565_s16 + $0xed8] sm:$0xff] }
 0x188   : > { %5771 = vmatprep.subr.mxu1 %v1050_v46  ;;  %5737 = vmatpush3.msra.mxu0 %v1002_v47  ;;  %v1100_v44 = vld [vmem:[%s7565_s16 + $0xf60] sm:$0xff]  ;;  %v1115_v46 = vld [vmem:[%s7565_s16 + $0xfd8] sm:$0xff] }
 0x189   : > { %5772 = vmatpush3.msra.mxu1 %v1034_v48  ;;  %5738 = vmatprep.subr.mxu0 %v1017_v49  ;;  %v1067_v47 = vld [vmem:[%s7565_s16 + $0xe58] sm:$0xff]  ;;  %v1082_v49 = vld [vmem:[%s7565_s16 + $0xed0] sm:$0xff] }
 0x18a   : > { %5773 = vmatprep.subr.mxu1 %v1049_v50  ;;  %5739 = vmatpush3.msra.mxu0 %v1001_v51  ;;  %v1099_v48 = vld [vmem:[%s7565_s16 + $0xf58] sm:$0xff]  ;;  %v1114_v50 = vld [vmem:[%s7565_s16 + $0xfd0] sm:$0xff] }
 0x18b   : > { %5774 = vmatpush3.msra.mxu1 %v1033_v52  ;;  %5740 = vmatprep.subr.mxu0 %v1016_v53  ;;  %v1066_v51 = vld [vmem:[%s7565_s16 + $0xe50] sm:$0xff]  ;;  %v1081_v53 = vld [vmem:[%s7565_s16 + $0xec8] sm:$0xff] }
 0x18c   : > { %5775 = vmatprep.subr.mxu1 %v1048_v54  ;;  %5741 = vmatpush3.msra.mxu0 %v1000_v55  ;;  %v1098_v52 = vld [vmem:[%s7565_s16 + $0xf50] sm:$0xff]  ;;  %v1113_v54 = vld [vmem:[%s7565_s16 + $0xfc8] sm:$0xff] }
 0x18d   : > { %5776 = vmatpush3.msra.mxu1 %v1032_v56  ;;  %5742 = vmatprep.subr.mxu0 %v1015_v57  ;;  %v1065_v55 = vld [vmem:[%s7565_s16 + $0xe48] sm:$0xff]  ;;  %v1080_v57 = vld [vmem:[%s7565_s16 + $0xec0] sm:$0xff] }
 0x18e   : > { %5777 = vmatprep.subr.mxu1 %v1047_v58  ;;  %5743 = vmatpush3.msra.mxu0 %v999_v59  ;;  %v1097_v56 = vld [vmem:[%s7565_s16 + $0xf48] sm:$0xff]  ;;  %v1112_v58 = vld [vmem:[%s7565_s16 + $0xfc0] sm:$0xff] }
 0x18f   : > { %5778 = vmatpush3.msra.mxu1 %v1031_v60  ;;  %5744 = vmatprep.subr.mxu0 %v1014_v61  ;;  %v1064_v59 = vld [vmem:[%s7565_s16 + $0xe40] sm:$0xff]  ;;  %v1079_v61 = vld [vmem:[%s7565_s16 + $0xeb8] sm:$0xff] }
 0x190   : > { %5779 = vmatprep.subr.mxu1 %v1046_v62  ;;  %5745 = vmatpush3.msra.mxu0 %v998_v63  ;;  %v1096_v60 = vld [vmem:[%s7565_s16 + $0xf40] sm:$0xff]  ;;  %v1111_v62 = vld [vmem:[%s7565_s16 + $0xfb8] sm:$0xff] }
 0x191   : > { %5780 = vmatpush3.msra.mxu1 %v1030_v0  ;;  %5746 = vmatprep.subr.mxu0 %v1013_v1  ;;  %v1063_v63 = vld [vmem:[%s7565_s16 + $0xe38] sm:$0xff]  ;;  %v1078_v1 = vld [vmem:[%s7565_s16 + $0xeb0] sm:$0xff] }
 0x192   : > { %5781 = vmatprep.subr.mxu1 %v1045_v2  ;;  %5747 = vmatpush3.msra.mxu0 %v997_v3  ;;  %v1095_v0 = vld [vmem:[%s7565_s16 + $0xf38] sm:$0xff]  ;;  %v1110_v2 = vld [vmem:[%s7565_s16 + $0xfb0] sm:$0xff] }
 0x193   : > { %5782 = vmatpush3.msra.mxu1 %v1029_v4  ;;  %5748 = vmatprep.subr.mxu0 %v1012_v5  ;;  %v1062_v3 = vld [vmem:[%s7565_s16 + $0xe30] sm:$0xff]  ;;  %v1077_v5 = vld [vmem:[%s7565_s16 + $0xea8] sm:$0xff] }
 0x194   : > { %5783 = vmatprep.subr.mxu1 %v1044_v6  ;;  %5749 = vmatpush3.msra.mxu0 %v996_v7  ;;  %v1094_v4 = vld [vmem:[%s7565_s16 + $0xf30] sm:$0xff]  ;;  %v1109_v6 = vld [vmem:[%s7565_s16 + $0xfa8] sm:$0xff] }
 0x195   : > { %5784 = vmatpush3.msra.mxu1 %v1028_v8  ;;  %5750 = vmatprep.subr.mxu0 %v1011_v9  ;;  %v1061_v7 = vld [vmem:[%s7565_s16 + $0xe28] sm:$0xff]  ;;  %v1076_v9 = vld [vmem:[%s7565_s16 + $0xea0] sm:$0xff] }
 0x196   : > { %5785 = vmatprep.subr.mxu1 %v1043_v10  ;;  %5751 = vmatpush3.msra.mxu0 %v995_v11  ;;  %v1093_v8 = vld [vmem:[%s7565_s16 + $0xf28] sm:$0xff]  ;;  %v1108_v10 = vld [vmem:[%s7565_s16 + $0xfa0] sm:$0xff] }
 0x197   : > { %5786 = vmatpush3.msra.mxu1 %v1027_v12  ;;  %5752 = vmatprep.subr.mxu0 %v1010_v13  ;;  %v1060_v11 = vld [vmem:[%s7565_s16 + $0xe20] sm:$0xff]  ;;  %v1075_v13 = vld [vmem:[%s7565_s16 + $0xe98] sm:$0xff] }
 0x198   : > { %5787 = vmatprep.subr.mxu1 %v1042_v14  ;;  %5753 = vmatpush3.msra.mxu0 %v994_v15  ;;  %v1092_v12 = vld [vmem:[%s7565_s16 + $0xf20] sm:$0xff]  ;;  %v1107_v14 = vld [vmem:[%s7565_s16 + $0xf98] sm:$0xff] }
 0x199   : > { %5788 = vmatpush3.msra.mxu1 %v1026_v16  ;;  %5754 = vmatprep.subr.mxu0 %v1009_v17  ;;  %v1059_v15 = vld [vmem:[%s7565_s16 + $0xe18] sm:$0xff]  ;;  %v1074_v17 = vld [vmem:[%s7565_s16 + $0xe90] sm:$0xff] }
 0x19a   : > { %5789 = vmatprep.subr.mxu1 %v1041_v18  ;;  %5755 = vmatpush3.msra.mxu0 %v993_v19  ;;  %v1091_v16 = vld [vmem:[%s7565_s16 + $0xf18] sm:$0xff]  ;;  %v1106_v18 = vld [vmem:[%s7565_s16 + $0xf90] sm:$0xff] }
 0x19b   : > { %5790 = vmatpush3.msra.mxu1 %v1025_v20  ;;  %5756 = vmatprep.subr.mxu0 %v1008_v21  ;;  %v1058_v19 = vld [vmem:[%s7565_s16 + $0xe10] sm:$0xff]  ;;  %v1073_v21 = vld [vmem:[%s7565_s16 + $0xe88] sm:$0xff] }
 0x19c   : > { %5791 = vmatprep.subr.mxu1 %v1040_v22  ;;  %5757 = vmatpush3.msra.mxu0 %v992_v23  ;;  %v1090_v20 = vld [vmem:[%s7565_s16 + $0xf10] sm:$0xff]  ;;  %v1105_v22 = vld [vmem:[%s7565_s16 + $0xf88] sm:$0xff] }
 0x19d   : > { %2856 = vmatprep.mubr.f32.mxu0 %v549_v24  ;;  %5792 = vmatpush3.msra.mxu1 %v1024_v25  ;;  %v1057_v23 = vld [vmem:[%s7565_s16 + $0xe08] sm:$0xff]  ;;  %v1072_v25 = vld [vmem:[%s7565_s16 + $0xe80] sm:$0xff] }
 0x19e   : > { %2857 = vmatmul.mubr.f32.vlgmr.msra.gmra.mxu0 %v548_v26  ;;  %2926 = vmatprep.mubr.f32.mxu1 %v551_v27  ;;  %v1089_v24 = vld [vmem:[%s7565_s16 + $0xf08] sm:$0xff]  ;;  %v1104_v26 = vld [vmem:[%s7565_s16 + $0xf80] sm:$0xff] }
 0x19f   : > { %5796 = vmatprep.subr.mxu0 %v1087_v28  ;;  %5831 = vmatprep.subr.mxu1 %v1119_v29  ;;  %v1056_v27 = vld [vmem:[%s7565_s16 + $0xe00] sm:$0xff] }
 0x1a0   : > { %2927 = vmatmul.mubr.f32.vlgmr.msra.gmra.mxu1 %v550_v30  ;;  %5797 = vmatpush3.msra.mxu0 %v1071_v31  ;;  %v553_v28 = vld [vmem:[%s7591_s29 + $0xe8] sm:$0xff]  ;;  %v552_v30 = vld [vmem:[%s7591_s29 + $0xe0] sm:$0xff]  ;;  %v555_v31 = vld [vmem:[%s7591_s29 + $0xf8] sm:$0xff] }
 0x1a1   : > { %5832 = vmatpush3.msra.mxu1 %v1103_v32  ;;  %5798 = vmatprep.subr.mxu0 %v1086_v33  ;;  %v1088_v29 = vld [vmem:[%s7565_s16 + $0xf00] sm:$0xff]  ;;  %v1151_v32 = vld [vmem:[%s7565_s16 + $0x10f8] sm:$0xff] }
 0x1a2   : > { %5833 = vmatprep.subr.mxu1 %v1118_v34  ;;  %5799 = vmatpush3.msra.mxu0 %v1070_v35  ;;  %v1183_v33 = vld [vmem:[%s7565_s16 + $0x11f8] sm:$0xff]  ;;  %v554_v34 = vld [vmem:[%s7591_s29 + $0xf0] sm:$0xff] }
 0x1a3   : > { %5834 = vmatpush3.msra.mxu1 %v1102_v36  ;;  %5800 = vmatprep.subr.mxu0 %v1085_v37  ;;  %v1135_v35 = vld [vmem:[%s7565_s16 + $0x1078] sm:$0xff]  ;;  %v1150_v37 = vld [vmem:[%s7565_s16 + $0x10f0] sm:$0xff] }
 0x1a4   : > { %5835 = vmatprep.subr.mxu1 %v1117_v38  ;;  %5801 = vmatpush3.msra.mxu0 %v1069_v39  ;;  %v1167_v36 = vld [vmem:[%s7565_s16 + $0x1178] sm:$0xff]  ;;  %v1182_v38 = vld [vmem:[%s7565_s16 + $0x11f0] sm:$0xff] }
 0x1a5   : > { %5836 = vmatpush3.msra.mxu1 %v1101_v40  ;;  %5802 = vmatprep.subr.mxu0 %v1084_v41  ;;  %v1134_v39 = vld [vmem:[%s7565_s16 + $0x1070] sm:$0xff]  ;;  %v1149_v41 = vld [vmem:[%s7565_s16 + $0x10e8] sm:$0xff] }
 0x1a6   : > { %5837 = vmatprep.subr.mxu1 %v1116_v42  ;;  %5803 = vmatpush3.msra.mxu0 %v1068_v43  ;;  %v1166_v40 = vld [vmem:[%s7565_s16 + $0x1170] sm:$0xff]  ;;  %v1181_v42 = vld [vmem:[%s7565_s16 + $0x11e8] sm:$0xff] }
 0x1a7   : > { %5838 = vmatpush3.msra.mxu1 %v1100_v44  ;;  %5804 = vmatprep.subr.mxu0 %v1083_v45  ;;  %v1133_v43 = vld [vmem:[%s7565_s16 + $0x1068] sm:$0xff]  ;;  %v1148_v45 = vld [vmem:[%s7565_s16 + $0x10e0] sm:$0xff] }
 0x1a8   : > { %5839 = vmatprep.subr.mxu1 %v1115_v46  ;;  %5805 = vmatpush3.msra.mxu0 %v1067_v47  ;;  %v1165_v44 = vld [vmem:[%s7565_s16 + $0x1168] sm:$0xff]  ;;  %v1180_v46 = vld [vmem:[%s7565_s16 + $0x11e0] sm:$0xff] }
 0x1a9   : > { %5840 = vmatpush3.msra.mxu1 %v1099_v48  ;;  %5806 = vmatprep.subr.mxu0 %v1082_v49  ;;  %v1132_v47 = vld [vmem:[%s7565_s16 + $0x1060] sm:$0xff]  ;;  %v1147_v49 = vld [vmem:[%s7565_s16 + $0x10d8] sm:$0xff] }
 0x1aa   : > { %5841 = vmatprep.subr.mxu1 %v1114_v50  ;;  %5807 = vmatpush3.msra.mxu0 %v1066_v51  ;;  %v1164_v48 = vld [vmem:[%s7565_s16 + $0x1160] sm:$0xff]  ;;  %v1179_v50 = vld [vmem:[%s7565_s16 + $0x11d8] sm:$0xff] }
 0x1ab   : > { %5842 = vmatpush3.msra.mxu1 %v1098_v52  ;;  %5808 = vmatprep.subr.mxu0 %v1081_v53  ;;  %v1131_v51 = vld [vmem:[%s7565_s16 + $0x1058] sm:$0xff]  ;;  %v1146_v53 = vld [vmem:[%s7565_s16 + $0x10d0] sm:$0xff] }
 0x1ac   : > { %5843 = vmatprep.subr.mxu1 %v1113_v54  ;;  %5809 = vmatpush3.msra.mxu0 %v1065_v55  ;;  %v1163_v52 = vld [vmem:[%s7565_s16 + $0x1158] sm:$0xff]  ;;  %v1178_v54 = vld [vmem:[%s7565_s16 + $0x11d0] sm:$0xff] }
 0x1ad   : > { %5844 = vmatpush3.msra.mxu1 %v1097_v56  ;;  %5810 = vmatprep.subr.mxu0 %v1080_v57  ;;  %v1130_v55 = vld [vmem:[%s7565_s16 + $0x1050] sm:$0xff]  ;;  %v1145_v57 = vld [vmem:[%s7565_s16 + $0x10c8] sm:$0xff] }
 0x1ae   : > { %5845 = vmatprep.subr.mxu1 %v1112_v58  ;;  %5811 = vmatpush3.msra.mxu0 %v1064_v59  ;;  %v1162_v56 = vld [vmem:[%s7565_s16 + $0x1150] sm:$0xff]  ;;  %v1177_v58 = vld [vmem:[%s7565_s16 + $0x11c8] sm:$0xff] }
 0x1af   : > { %5846 = vmatpush3.msra.mxu1 %v1096_v60  ;;  %5812 = vmatprep.subr.mxu0 %v1079_v61  ;;  %v1129_v59 = vld [vmem:[%s7565_s16 + $0x1048] sm:$0xff]  ;;  %v1144_v61 = vld [vmem:[%s7565_s16 + $0x10c0] sm:$0xff] }
 0x1b0   : > { %5847 = vmatprep.subr.mxu1 %v1111_v62  ;;  %5813 = vmatpush3.msra.mxu0 %v1063_v63  ;;  %v1161_v60 = vld [vmem:[%s7565_s16 + $0x1148] sm:$0xff]  ;;  %v1176_v62 = vld [vmem:[%s7565_s16 + $0x11c0] sm:$0xff] }
 0x1b1   : > { %5848 = vmatpush3.msra.mxu1 %v1095_v0  ;;  %5814 = vmatprep.subr.mxu0 %v1078_v1  ;;  %v1128_v63 = vld [vmem:[%s7565_s16 + $0x1040] sm:$0xff]  ;;  %v1143_v1 = vld [vmem:[%s7565_s16 + $0x10b8] sm:$0xff] }
 0x1b2   : > { %5849 = vmatprep.subr.mxu1 %v1110_v2  ;;  %5815 = vmatpush3.msra.mxu0 %v1062_v3  ;;  %v1160_v0 = vld [vmem:[%s7565_s16 + $0x1140] sm:$0xff]  ;;  %v1175_v2 = vld [vmem:[%s7565_s16 + $0x11b8] sm:$0xff] }
 0x1b3   : > { %5850 = vmatpush3.msra.mxu1 %v1094_v4  ;;  %5816 = vmatprep.subr.mxu0 %v1077_v5  ;;  %v1127_v3 = vld [vmem:[%s7565_s16 + $0x1038] sm:$0xff]  ;;  %v1142_v5 = vld [vmem:[%s7565_s16 + $0x10b0] sm:$0xff] }
 0x1b4   : > { %5851 = vmatprep.subr.mxu1 %v1109_v6  ;;  %5817 = vmatpush3.msra.mxu0 %v1061_v7  ;;  %v1159_v4 = vld [vmem:[%s7565_s16 + $0x1138] sm:$0xff]  ;;  %v1174_v6 = vld [vmem:[%s7565_s16 + $0x11b0] sm:$0xff] }
 0x1b5   : > { %5852 = vmatpush3.msra.mxu1 %v1093_v8  ;;  %5818 = vmatprep.subr.mxu0 %v1076_v9  ;;  %v1126_v7 = vld [vmem:[%s7565_s16 + $0x1030] sm:$0xff]  ;;  %v1141_v9 = vld [vmem:[%s7565_s16 + $0x10a8] sm:$0xff] }
 0x1b6   : > { %5853 = vmatprep.subr.mxu1 %v1108_v10  ;;  %5819 = vmatpush3.msra.mxu0 %v1060_v11  ;;  %v1158_v8 = vld [vmem:[%s7565_s16 + $0x1130] sm:$0xff]  ;;  %v1173_v10 = vld [vmem:[%s7565_s16 + $0x11a8] sm:$0xff] }
 0x1b7   : > { %5854 = vmatpush3.msra.mxu1 %v1092_v12  ;;  %5820 = vmatprep.subr.mxu0 %v1075_v13  ;;  %v1125_v11 = vld [vmem:[%s7565_s16 + $0x1028] sm:$0xff]  ;;  %v1140_v13 = vld [vmem:[%s7565_s16 + $0x10a0] sm:$0xff] }
 0x1b8   : > { %5855 = vmatprep.subr.mxu1 %v1107_v14  ;;  %5821 = vmatpush3.msra.mxu0 %v1059_v15  ;;  %v1157_v12 = vld [vmem:[%s7565_s16 + $0x1128] sm:$0xff]  ;;  %v1172_v14 = vld [vmem:[%s7565_s16 + $0x11a0] sm:$0xff] }
 0x1b9   : > { %5856 = vmatpush3.msra.mxu1 %v1091_v16  ;;  %5822 = vmatprep.subr.mxu0 %v1074_v17  ;;  %v1124_v15 = vld [vmem:[%s7565_s16 + $0x1020] sm:$0xff]  ;;  %v1139_v17 = vld [vmem:[%s7565_s16 + $0x1098] sm:$0xff] }
 0x1ba   : > { %5857 = vmatprep.subr.mxu1 %v1106_v18  ;;  %5823 = vmatpush3.msra.mxu0 %v1058_v19  ;;  %v1156_v16 = vld [vmem:[%s7565_s16 + $0x1120] sm:$0xff]  ;;  %v1171_v18 = vld [vmem:[%s7565_s16 + $0x1198] sm:$0xff] }
 0x1bb   : > { %5858 = vmatpush3.msra.mxu1 %v1090_v20  ;;  %5824 = vmatprep.subr.mxu0 %v1073_v21  ;;  %v1123_v19 = vld [vmem:[%s7565_s16 + $0x1018] sm:$0xff]  ;;  %v1138_v21 = vld [vmem:[%s7565_s16 + $0x1090] sm:$0xff] }
 0x1bc   : > { %5859 = vmatprep.subr.mxu1 %v1105_v22  ;;  %5825 = vmatpush3.msra.mxu0 %v1057_v23  ;;  %v1155_v20 = vld [vmem:[%s7565_s16 + $0x1118] sm:$0xff]  ;;  %v1170_v22 = vld [vmem:[%s7565_s16 + $0x1190] sm:$0xff] }
 0x1bd   : > { %5860 = vmatpush3.msra.mxu1 %v1089_v24  ;;  %5826 = vmatprep.subr.mxu0 %v1072_v25  ;;  %v1122_v23 = vld [vmem:[%s7565_s16 + $0x1010] sm:$0xff]  ;;  %v1137_v25 = vld [vmem:[%s7565_s16 + $0x1088] sm:$0xff] }
 0x1be   : > { %5861 = vmatprep.subr.mxu1 %v1104_v26  ;;  %5827 = vmatpush3.msra.mxu0 %v1056_v27  ;;  %v1154_v24 = vld [vmem:[%s7565_s16 + $0x1110] sm:$0xff]  ;;  %v1169_v26 = vld [vmem:[%s7565_s16 + $0x1188] sm:$0xff] }
 0x1bf   : > { %2996 = vmatprep.mubr.f32.mxu0 %v553_v28  ;;  %5862 = vmatpush3.msra.mxu1 %v1088_v29  ;;  %v1121_v27 = vld [vmem:[%s7565_s16 + $0x1008] sm:$0xff]  ;;  %v1136_v29 = vld [vmem:[%s7565_s16 + $0x1080] sm:$0xff] }
 0x1c0   : > { %2997 = vmatmul.mubr.f32.vlgmr.msra.gmra.mxu0 %v552_v30  ;;  %3066 = vmatprep.mubr.f32.mxu1 %v555_v31  ;;  %v1153_v28 = vld [vmem:[%s7565_s16 + $0x1108] sm:$0xff]  ;;  %v1168_v30 = vld [vmem:[%s7565_s16 + $0x1180] sm:$0xff] }
 0x1c1   : > { %5866 = vmatprep.subr.mxu0 %v1151_v32  ;;  %5901 = vmatprep.subr.mxu1 %v1183_v33  ;;  %v1120_v31 = vld [vmem:[%s7565_s16 + $0x1000] sm:$0xff] }
 0x1c2   : > { %3067 = vmatmul.mubr.f32.vlgmr.msra.gmra.mxu1 %v554_v34  ;;  %5867 = vmatpush3.msra.mxu0 %v1135_v35  ;;  %v557_v32 = vld [vmem:[%s7591_s29 + $0x108] sm:$0xff]  ;;  %v556_v34 = vld [vmem:[%s7591_s29 + $0x100] sm:$0xff]  ;;  %v559_v35 = vld [vmem:[%s7591_s29 + $0x118] sm:$0xff] }
 0x1c3   : > { %5902 = vmatpush3.msra.mxu1 %v1167_v36  ;;  %5868 = vmatprep.subr.mxu0 %v1150_v37  ;;  %v1152_v33 = vld [vmem:[%s7565_s16 + $0x1100] sm:$0xff]  ;;  %v1215_v36 = vld [vmem:[%s7565_s16 + $0x12f8] sm:$0xff] }
 0x1c4   : > { %5903 = vmatprep.subr.mxu1 %v1182_v38  ;;  %5869 = vmatpush3.msra.mxu0 %v1134_v39  ;;  %v1247_v37 = vld [vmem:[%s7565_s16 + $0x13f8] sm:$0xff]  ;;  %v558_v38 = vld [vmem:[%s7591_s29 + $0x110] sm:$0xff] }
 0x1c5   : > { %5904 = vmatpush3.msra.mxu1 %v1166_v40  ;;  %5870 = vmatprep.subr.mxu0 %v1149_v41  ;;  %v1199_v39 = vld [vmem:[%s7565_s16 + $0x1278] sm:$0xff]  ;;  %v1214_v41 = vld [vmem:[%s7565_s16 + $0x12f0] sm:$0xff] }
 0x1c6   : > { %5905 = vmatprep.subr.mxu1 %v1181_v42  ;;  %5871 = vmatpush3.msra.mxu0 %v1133_v43  ;;  %v1231_v40 = vld [vmem:[%s7565_s16 + $0x1378] sm:$0xff]  ;;  %v1246_v42 = vld [vmem:[%s7565_s16 + $0x13f0] sm:$0xff] }
 0x1c7   : > { %5906 = vmatpush3.msra.mxu1 %v1165_v44  ;;  %5872 = vmatprep.subr.mxu0 %v1148_v45  ;;  %v1198_v43 = vld [vmem:[%s7565_s16 + $0x1270] sm:$0xff]  ;;  %v1213_v45 = vld [vmem:[%s7565_s16 + $0x12e8] sm:$0xff] }
 0x1c8   : > { %5907 = vmatprep.subr.mxu1 %v1180_v46  ;;  %5873 = vmatpush3.msra.mxu0 %v1132_v47  ;;  %v1230_v44 = vld [vmem:[%s7565_s16 + $0x1370] sm:$0xff]  ;;  %v1245_v46 = vld [vmem:[%s7565_s16 + $0x13e8] sm:$0xff] }
 0x1c9   : > { %5908 = vmatpush3.msra.mxu1 %v1164_v48  ;;  %5874 = vmatprep.subr.mxu0 %v1147_v49  ;;  %v1197_v47 = vld [vmem:[%s7565_s16 + $0x1268] sm:$0xff]  ;;  %v1212_v49 = vld [vmem:[%s7565_s16 + $0x12e0] sm:$0xff] }
 0x1ca   : > { %5909 = vmatprep.subr.mxu1 %v1179_v50  ;;  %5875 = vmatpush3.msra.mxu0 %v1131_v51  ;;  %v1229_v48 = vld [vmem:[%s7565_s16 + $0x1368] sm:$0xff]  ;;  %v1244_v50 = vld [vmem:[%s7565_s16 + $0x13e0] sm:$0xff] }
 0x1cb   : > { %5910 = vmatpush3.msra.mxu1 %v1163_v52  ;;  %5876 = vmatprep.subr.mxu0 %v1146_v53  ;;  %v1196_v51 = vld [vmem:[%s7565_s16 + $0x1260] sm:$0xff]  ;;  %v1211_v53 = vld [vmem:[%s7565_s16 + $0x12d8] sm:$0xff] }
 0x1cc   : > { %5911 = vmatprep.subr.mxu1 %v1178_v54  ;;  %5877 = vmatpush3.msra.mxu0 %v1130_v55  ;;  %v1228_v52 = vld [vmem:[%s7565_s16 + $0x1360] sm:$0xff]  ;;  %v1243_v54 = vld [vmem:[%s7565_s16 + $0x13d8] sm:$0xff] }
 0x1cd   : > { %5912 = vmatpush3.msra.mxu1 %v1162_v56  ;;  %5878 = vmatprep.subr.mxu0 %v1145_v57  ;;  %v1195_v55 = vld [vmem:[%s7565_s16 + $0x1258] sm:$0xff]  ;;  %v1210_v57 = vld [vmem:[%s7565_s16 + $0x12d0] sm:$0xff] }
 0x1ce   : > { %5913 = vmatprep.subr.mxu1 %v1177_v58  ;;  %5879 = vmatpush3.msra.mxu0 %v1129_v59  ;;  %v1227_v56 = vld [vmem:[%s7565_s16 + $0x1358] sm:$0xff]  ;;  %v1242_v58 = vld [vmem:[%s7565_s16 + $0x13d0] sm:$0xff] }
 0x1cf   : > { %5914 = vmatpush3.msra.mxu1 %v1161_v60  ;;  %5880 = vmatprep.subr.mxu0 %v1144_v61  ;;  %v1194_v59 = vld [vmem:[%s7565_s16 + $0x1250] sm:$0xff]  ;;  %v1209_v61 = vld [vmem:[%s7565_s16 + $0x12c8] sm:$0xff] }
 0x1d0   : > { %5915 = vmatprep.subr.mxu1 %v1176_v62  ;;  %5881 = vmatpush3.msra.mxu0 %v1128_v63  ;;  %v1226_v60 = vld [vmem:[%s7565_s16 + $0x1350] sm:$0xff]  ;;  %v1241_v62 = vld [vmem:[%s7565_s16 + $0x13c8] sm:$0xff] }
 0x1d1   : > { %5916 = vmatpush3.msra.mxu1 %v1160_v0  ;;  %5882 = vmatprep.subr.mxu0 %v1143_v1  ;;  %v1193_v63 = vld [vmem:[%s7565_s16 + $0x1248] sm:$0xff]  ;;  %v1208_v1 = vld [vmem:[%s7565_s16 + $0x12c0] sm:$0xff] }
 0x1d2   : > { %5917 = vmatprep.subr.mxu1 %v1175_v2  ;;  %5883 = vmatpush3.msra.mxu0 %v1127_v3  ;;  %v1225_v0 = vld [vmem:[%s7565_s16 + $0x1348] sm:$0xff]  ;;  %v1240_v2 = vld [vmem:[%s7565_s16 + $0x13c0] sm:$0xff] }
 0x1d3   : > { %5918 = vmatpush3.msra.mxu1 %v1159_v4  ;;  %5884 = vmatprep.subr.mxu0 %v1142_v5  ;;  %v1192_v3 = vld [vmem:[%s7565_s16 + $0x1240] sm:$0xff]  ;;  %v1207_v5 = vld [vmem:[%s7565_s16 + $0x12b8] sm:$0xff] }
 0x1d4   : > { %5919 = vmatprep.subr.mxu1 %v1174_v6  ;;  %5885 = vmatpush3.msra.mxu0 %v1126_v7  ;;  %v1224_v4 = vld [vmem:[%s7565_s16 + $0x1340] sm:$0xff]  ;;  %v1239_v6 = vld [vmem:[%s7565_s16 + $0x13b8] sm:$0xff] }
 0x1d5   : > { %5920 = vmatpush3.msra.mxu1 %v1158_v8  ;;  %5886 = vmatprep.subr.mxu0 %v1141_v9  ;;  %v1191_v7 = vld [vmem:[%s7565_s16 + $0x1238] sm:$0xff]  ;;  %v1206_v9 = vld [vmem:[%s7565_s16 + $0x12b0] sm:$0xff] }
 0x1d6   : > { %5921 = vmatprep.subr.mxu1 %v1173_v10  ;;  %5887 = vmatpush3.msra.mxu0 %v1125_v11  ;;  %v1223_v8 = vld [vmem:[%s7565_s16 + $0x1338] sm:$0xff]  ;;  %v1238_v10 = vld [vmem:[%s7565_s16 + $0x13b0] sm:$0xff] }
 0x1d7   : > { %5922 = vmatpush3.msra.mxu1 %v1157_v12  ;;  %5888 = vmatprep.subr.mxu0 %v1140_v13  ;;  %v1190_v11 = vld [vmem:[%s7565_s16 + $0x1230] sm:$0xff]  ;;  %v1205_v13 = vld [vmem:[%s7565_s16 + $0x12a8] sm:$0xff] }
 0x1d8   : > { %5923 = vmatprep.subr.mxu1 %v1172_v14  ;;  %5889 = vmatpush3.msra.mxu0 %v1124_v15  ;;  %v1222_v12 = vld [vmem:[%s7565_s16 + $0x1330] sm:$0xff]  ;;  %v1237_v14 = vld [vmem:[%s7565_s16 + $0x13a8] sm:$0xff] }
 0x1d9   : > { %5924 = vmatpush3.msra.mxu1 %v1156_v16  ;;  %5890 = vmatprep.subr.mxu0 %v1139_v17  ;;  %v1189_v15 = vld [vmem:[%s7565_s16 + $0x1228] sm:$0xff]  ;;  %v1204_v17 = vld [vmem:[%s7565_s16 + $0x12a0] sm:$0xff] }
 0x1da   : > { %5925 = vmatprep.subr.mxu1 %v1171_v18  ;;  %5891 = vmatpush3.msra.mxu0 %v1123_v19  ;;  %v1221_v16 = vld [vmem:[%s7565_s16 + $0x1328] sm:$0xff]  ;;  %v1236_v18 = vld [vmem:[%s7565_s16 + $0x13a0] sm:$0xff] }
 0x1db   : > { %5926 = vmatpush3.msra.mxu1 %v1155_v20  ;;  %5892 = vmatprep.subr.mxu0 %v1138_v21  ;;  %v1188_v19 = vld [vmem:[%s7565_s16 + $0x1220] sm:$0xff]  ;;  %v1203_v21 = vld [vmem:[%s7565_s16 + $0x1298] sm:$0xff] }
 0x1dc   : > { %5927 = vmatprep.subr.mxu1 %v1170_v22  ;;  %5893 = vmatpush3.msra.mxu0 %v1122_v23  ;;  %v1220_v20 = vld [vmem:[%s7565_s16 + $0x1320] sm:$0xff]  ;;  %v1235_v22 = vld [vmem:[%s7565_s16 + $0x1398] sm:$0xff] }
 0x1dd   : > { %5928 = vmatpush3.msra.mxu1 %v1154_v24  ;;  %5894 = vmatprep.subr.mxu0 %v1137_v25  ;;  %v1187_v23 = vld [vmem:[%s7565_s16 + $0x1218] sm:$0xff]  ;;  %v1202_v25 = vld [vmem:[%s7565_s16 + $0x1290] sm:$0xff] }
 0x1de   : > { %5929 = vmatprep.subr.mxu1 %v1169_v26  ;;  %5895 = vmatpush3.msra.mxu0 %v1121_v27  ;;  %v1219_v24 = vld [vmem:[%s7565_s16 + $0x1318] sm:$0xff]  ;;  %v1234_v26 = vld [vmem:[%s7565_s16 + $0x1390] sm:$0xff] }
 0x1df   : > { %5930 = vmatpush3.msra.mxu1 %v1153_v28  ;;  %5896 = vmatprep.subr.mxu0 %v1136_v29  ;;  %v1186_v27 = vld [vmem:[%s7565_s16 + $0x1210] sm:$0xff]  ;;  %v1201_v29 = vld [vmem:[%s7565_s16 + $0x1288] sm:$0xff] }
 0x1e0   : > { %5931 = vmatprep.subr.mxu1 %v1168_v30  ;;  %5897 = vmatpush3.msra.mxu0 %v1120_v31  ;;  %v1218_v28 = vld [vmem:[%s7565_s16 + $0x1310] sm:$0xff]  ;;  %v1233_v30 = vld [vmem:[%s7565_s16 + $0x1388] sm:$0xff] }
 0x1e1   : > { %3136 = vmatprep.mubr.f32.mxu0 %v557_v32  ;;  %5932 = vmatpush3.msra.mxu1 %v1152_v33  ;;  %v1185_v31 = vld [vmem:[%s7565_s16 + $0x1208] sm:$0xff]  ;;  %v1200_v33 = vld [vmem:[%s7565_s16 + $0x1280] sm:$0xff] }
 0x1e2   : > { %3137 = vmatmul.mubr.f32.vlgmr.msra.gmra.mxu0 %v556_v34  ;;  %3206 = vmatprep.mubr.f32.mxu1 %v559_v35  ;;  %v1217_v32 = vld [vmem:[%s7565_s16 + $0x1308] sm:$0xff]  ;;  %v1232_v34 = vld [vmem:[%s7565_s16 + $0x1380] sm:$0xff] }
 0x1e3   : > { %5936 = vmatprep.subr.mxu0 %v1215_v36  ;;  %5971 = vmatprep.subr.mxu1 %v1247_v37  ;;  %v1184_v35 = vld [vmem:[%s7565_s16 + $0x1200] sm:$0xff] }
 0x1e4   : > { %3207 = vmatmul.mubr.f32.vlgmr.msra.gmra.mxu1 %v558_v38  ;;  %5937 = vmatpush3.msra.mxu0 %v1199_v39  ;;  %v561_v36 = vld [vmem:[%s7591_s29 + $0x128] sm:$0xff]  ;;  %v560_v38 = vld [vmem:[%s7591_s29 + $0x120] sm:$0xff]  ;;  %v563_v39 = vld [vmem:[%s7591_s29 + $0x138] sm:$0xff] }
 0x1e5   : > { %5972 = vmatpush3.msra.mxu1 %v1231_v40  ;;  %5938 = vmatprep.subr.mxu0 %v1214_v41  ;;  %v1216_v37 = vld [vmem:[%s7565_s16 + $0x1300] sm:$0xff]  ;;  %v1279_v40 = vld [vmem:[%s7565_s16 + $0x14f8] sm:$0xff] }
 0x1e6   : > { %5973 = vmatprep.subr.mxu1 %v1246_v42  ;;  %5939 = vmatpush3.msra.mxu0 %v1198_v43  ;;  %v1311_v41 = vld [vmem:[%s7565_s16 + $0x15f8] sm:$0xff]  ;;  %v562_v42 = vld [vmem:[%s7591_s29 + $0x130] sm:$0xff] }
 0x1e7   : > { %5974 = vmatpush3.msra.mxu1 %v1230_v44  ;;  %5940 = vmatprep.subr.mxu0 %v1213_v45  ;;  %v1263_v43 = vld [vmem:[%s7565_s16 + $0x1478] sm:$0xff]  ;;  %v1278_v45 = vld [vmem:[%s7565_s16 + $0x14f0] sm:$0xff] }
 0x1e8   : > { %5975 = vmatprep.subr.mxu1 %v1245_v46  ;;  %5941 = vmatpush3.msra.mxu0 %v1197_v47  ;;  %v1295_v44 = vld [vmem:[%s7565_s16 + $0x1578] sm:$0xff]  ;;  %v1310_v46 = vld [vmem:[%s7565_s16 + $0x15f0] sm:$0xff] }
 0x1e9   : > { %5976 = vmatpush3.msra.mxu1 %v1229_v48  ;;  %5942 = vmatprep.subr.mxu0 %v1212_v49  ;;  %v1262_v47 = vld [vmem:[%s7565_s16 + $0x1470] sm:$0xff]  ;;  %v1277_v49 = vld [vmem:[%s7565_s16 + $0x14e8] sm:$0xff] }
 0x1ea   : > { %5977 = vmatprep.subr.mxu1 %v1244_v50  ;;  %5943 = vmatpush3.msra.mxu0 %v1196_v51  ;;  %v1294_v48 = vld [vmem:[%s7565_s16 + $0x1570] sm:$0xff]  ;;  %v1309_v50 = vld [vmem:[%s7565_s16 + $0x15e8] sm:$0xff] }
 0x1eb   : > { %5978 = vmatpush3.msra.mxu1 %v1228_v52  ;;  %5944 = vmatprep.subr.mxu0 %v1211_v53  ;;  %v1261_v51 = vld [vmem:[%s7565_s16 + $0x1468] sm:$0xff]  ;;  %v1276_v53 = vld [vmem:[%s7565_s16 + $0x14e0] sm:$0xff] }
 0x1ec   : > { %5979 = vmatprep.subr.mxu1 %v1243_v54  ;;  %5945 = vmatpush3.msra.mxu0 %v1195_v55  ;;  %v1293_v52 = vld [vmem:[%s7565_s16 + $0x1568] sm:$0xff]  ;;  %v1308_v54 = vld [vmem:[%s7565_s16 + $0x15e0] sm:$0xff] }
 0x1ed   : > { %5980 = vmatpush3.msra.mxu1 %v1227_v56  ;;  %5946 = vmatprep.subr.mxu0 %v1210_v57  ;;  %v1260_v55 = vld [vmem:[%s7565_s16 + $0x1460] sm:$0xff]  ;;  %v1275_v57 = vld [vmem:[%s7565_s16 + $0x14d8] sm:$0xff] }
 0x1ee   : > { %5981 = vmatprep.subr.mxu1 %v1242_v58  ;;  %5947 = vmatpush3.msra.mxu0 %v1194_v59  ;;  %v1292_v56 = vld [vmem:[%s7565_s16 + $0x1560] sm:$0xff]  ;;  %v1307_v58 = vld [vmem:[%s7565_s16 + $0x15d8] sm:$0xff] }
 0x1ef   : > { %5982 = vmatpush3.msra.mxu1 %v1226_v60  ;;  %5948 = vmatprep.subr.mxu0 %v1209_v61  ;;  %v1259_v59 = vld [vmem:[%s7565_s16 + $0x1458] sm:$0xff]  ;;  %v1274_v61 = vld [vmem:[%s7565_s16 + $0x14d0] sm:$0xff] }
 0x1f0   : > { %5983 = vmatprep.subr.mxu1 %v1241_v62  ;;  %5949 = vmatpush3.msra.mxu0 %v1193_v63  ;;  %v1291_v60 = vld [vmem:[%s7565_s16 + $0x1558] sm:$0xff]  ;;  %v1306_v62 = vld [vmem:[%s7565_s16 + $0x15d0] sm:$0xff] }
 0x1f1   : > { %5984 = vmatpush3.msra.mxu1 %v1225_v0  ;;  %5950 = vmatprep.subr.mxu0 %v1208_v1  ;;  %v1258_v63 = vld [vmem:[%s7565_s16 + $0x1450] sm:$0xff]  ;;  %v1273_v1 = vld [vmem:[%s7565_s16 + $0x14c8] sm:$0xff] }
 0x1f2   : > { %5985 = vmatprep.subr.mxu1 %v1240_v2  ;;  %5951 = vmatpush3.msra.mxu0 %v1192_v3  ;;  %v1290_v0 = vld [vmem:[%s7565_s16 + $0x1550] sm:$0xff]  ;;  %v1305_v2 = vld [vmem:[%s7565_s16 + $0x15c8] sm:$0xff] }
 0x1f3   : > { %5986 = vmatpush3.msra.mxu1 %v1224_v4  ;;  %5952 = vmatprep.subr.mxu0 %v1207_v5  ;;  %v1257_v3 = vld [vmem:[%s7565_s16 + $0x1448] sm:$0xff]  ;;  %v1272_v5 = vld [vmem:[%s7565_s16 + $0x14c0] sm:$0xff] }
 0x1f4   : > { %5987 = vmatprep.subr.mxu1 %v1239_v6  ;;  %5953 = vmatpush3.msra.mxu0 %v1191_v7  ;;  %v1289_v4 = vld [vmem:[%s7565_s16 + $0x1548] sm:$0xff]  ;;  %v1304_v6 = vld [vmem:[%s7565_s16 + $0x15c0] sm:$0xff] }
 0x1f5   : > { %5988 = vmatpush3.msra.mxu1 %v1223_v8  ;;  %5954 = vmatprep.subr.mxu0 %v1206_v9  ;;  %v1256_v7 = vld [vmem:[%s7565_s16 + $0x1440] sm:$0xff]  ;;  %v1271_v9 = vld [vmem:[%s7565_s16 + $0x14b8] sm:$0xff] }
 0x1f6   : > { %5989 = vmatprep.subr.mxu1 %v1238_v10  ;;  %5955 = vmatpush3.msra.mxu0 %v1190_v11  ;;  %v1288_v8 = vld [vmem:[%s7565_s16 + $0x1540] sm:$0xff]  ;;  %v1303_v10 = vld [vmem:[%s7565_s16 + $0x15b8] sm:$0xff] }
 0x1f7   : > { %5990 = vmatpush3.msra.mxu1 %v1222_v12  ;;  %5956 = vmatprep.subr.mxu0 %v1205_v13  ;;  %v1255_v11 = vld [vmem:[%s7565_s16 + $0x1438] sm:$0xff]  ;;  %v1270_v13 = vld [vmem:[%s7565_s16 + $0x14b0] sm:$0xff] }
 0x1f8   : > { %5991 = vmatprep.subr.mxu1 %v1237_v14  ;;  %5957 = vmatpush3.msra.mxu0 %v1189_v15  ;;  %v1287_v12 = vld [vmem:[%s7565_s16 + $0x1538] sm:$0xff]  ;;  %v1302_v14 = vld [vmem:[%s7565_s16 + $0x15b0] sm:$0xff] }
 0x1f9   : > { %5992 = vmatpush3.msra.mxu1 %v1221_v16  ;;  %5958 = vmatprep.subr.mxu0 %v1204_v17  ;;  %v1254_v15 = vld [vmem:[%s7565_s16 + $0x1430] sm:$0xff]  ;;  %v1269_v17 = vld [vmem:[%s7565_s16 + $0x14a8] sm:$0xff] }
 0x1fa   : > { %5993 = vmatprep.subr.mxu1 %v1236_v18  ;;  %5959 = vmatpush3.msra.mxu0 %v1188_v19  ;;  %v1286_v16 = vld [vmem:[%s7565_s16 + $0x1530] sm:$0xff]  ;;  %v1301_v18 = vld [vmem:[%s7565_s16 + $0x15a8] sm:$0xff] }
 0x1fb   : > { %5994 = vmatpush3.msra.mxu1 %v1220_v20  ;;  %5960 = vmatprep.subr.mxu0 %v1203_v21  ;;  %v1253_v19 = vld [vmem:[%s7565_s16 + $0x1428] sm:$0xff]  ;;  %v1268_v21 = vld [vmem:[%s7565_s16 + $0x14a0] sm:$0xff] }
 0x1fc   : > { %5995 = vmatprep.subr.mxu1 %v1235_v22  ;;  %5961 = vmatpush3.msra.mxu0 %v1187_v23  ;;  %v1285_v20 = vld [vmem:[%s7565_s16 + $0x1528] sm:$0xff]  ;;  %v1300_v22 = vld [vmem:[%s7565_s16 + $0x15a0] sm:$0xff] }
 0x1fd   : > { %5996 = vmatpush3.msra.mxu1 %v1219_v24  ;;  %5962 = vmatprep.subr.mxu0 %v1202_v25  ;;  %v1252_v23 = vld [vmem:[%s7565_s16 + $0x1420] sm:$0xff]  ;;  %v1267_v25 = vld [vmem:[%s7565_s16 + $0x1498] sm:$0xff] }
 0x1fe   : > { %5997 = vmatprep.subr.mxu1 %v1234_v26  ;;  %5963 = vmatpush3.msra.mxu0 %v1186_v27  ;;  %v1284_v24 = vld [vmem:[%s7565_s16 + $0x1520] sm:$0xff]  ;;  %v1299_v26 = vld [vmem:[%s7565_s16 + $0x1598] sm:$0xff] }
 0x1ff   : > { %5998 = vmatpush3.msra.mxu1 %v1218_v28  ;;  %5964 = vmatprep.subr.mxu0 %v1201_v29  ;;  %v1251_v27 = vld [vmem:[%s7565_s16 + $0x1418] sm:$0xff]  ;;  %v1266_v29 = vld [vmem:[%s7565_s16 + $0x1490] sm:$0xff] }
 0x200   : > { %5999 = vmatprep.subr.mxu1 %v1233_v30  ;;  %5965 = vmatpush3.msra.mxu0 %v1185_v31  ;;  %v1283_v28 = vld [vmem:[%s7565_s16 + $0x1518] sm:$0xff]  ;;  %v1298_v30 = vld [vmem:[%s7565_s16 + $0x1590] sm:$0xff] }
 0x201   : > { %6000 = vmatpush3.msra.mxu1 %v1217_v32  ;;  %5966 = vmatprep.subr.mxu0 %v1200_v33  ;;  %v1250_v31 = vld [vmem:[%s7565_s16 + $0x1410] sm:$0xff]  ;;  %v1265_v33 = vld [vmem:[%s7565_s16 + $0x1488] sm:$0xff] }
 0x202   : > { %6001 = vmatprep.subr.mxu1 %v1232_v34  ;;  %5967 = vmatpush3.msra.mxu0 %v1184_v35  ;;  %v1282_v32 = vld [vmem:[%s7565_s16 + $0x1510] sm:$0xff]  ;;  %v1297_v34 = vld [vmem:[%s7565_s16 + $0x1588] sm:$0xff] }
 0x203   : > { %3276 = vmatprep.mubr.f32.mxu0 %v561_v36  ;;  %6002 = vmatpush3.msra.mxu1 %v1216_v37  ;;  %v1249_v35 = vld [vmem:[%s7565_s16 + $0x1408] sm:$0xff]  ;;  %v1264_v37 = vld [vmem:[%s7565_s16 + $0x1480] sm:$0xff] }
 0x204   : > { %3277 = vmatmul.mubr.f32.vlgmr.msra.gmra.mxu0 %v560_v38  ;;  %3346 = vmatprep.mubr.f32.mxu1 %v563_v39  ;;  %v1281_v36 = vld [vmem:[%s7565_s16 + $0x1508] sm:$0xff]  ;;  %v1296_v38 = vld [vmem:[%s7565_s16 + $0x1580] sm:$0xff] }
 0x205   : > { %6006 = vmatprep.subr.mxu0 %v1279_v40  ;;  %6041 = vmatprep.subr.mxu1 %v1311_v41  ;;  %v1248_v39 = vld [vmem:[%s7565_s16 + $0x1400] sm:$0xff] }
 0x206   : > { %3347 = vmatmul.mubr.f32.vlgmr.msra.gmra.mxu1 %v562_v42  ;;  %6007 = vmatpush3.msra.mxu0 %v1263_v43  ;;  %v565_v40 = vld [vmem:[%s7591_s29 + $0x148] sm:$0xff]  ;;  %v564_v42 = vld [vmem:[%s7591_s29 + $0x140] sm:$0xff]  ;;  %v567_v43 = vld [vmem:[%s7591_s29 + $0x158] sm:$0xff] }
 0x207   : > { %6042 = vmatpush3.msra.mxu1 %v1295_v44  ;;  %6008 = vmatprep.subr.mxu0 %v1278_v45  ;;  %v1280_v41 = vld [vmem:[%s7565_s16 + $0x1500] sm:$0xff]  ;;  %v1343_v44 = vld [vmem:[%s7565_s16 + $0x16f8] sm:$0xff] }
 0x208   : > { %6043 = vmatprep.subr.mxu1 %v1310_v46  ;;  %6009 = vmatpush3.msra.mxu0 %v1262_v47  ;;  %v1375_v45 = vld [vmem:[%s7565_s16 + $0x17f8] sm:$0xff]  ;;  %v566_v46 = vld [vmem:[%s7591_s29 + $0x150] sm:$0xff] }
 0x209   : > { %6044 = vmatpush3.msra.mxu1 %v1294_v48  ;;  %6010 = vmatprep.subr.mxu0 %v1277_v49  ;;  %v1327_v47 = vld [vmem:[%s7565_s16 + $0x1678] sm:$0xff]  ;;  %v1342_v49 = vld [vmem:[%s7565_s16 + $0x16f0] sm:$0xff] }
 0x20a   : > { %6045 = vmatprep.subr.mxu1 %v1309_v50  ;;  %6011 = vmatpush3.msra.mxu0 %v1261_v51  ;;  %v1359_v48 = vld [vmem:[%s7565_s16 + $0x1778] sm:$0xff]  ;;  %v1374_v50 = vld [vmem:[%s7565_s16 + $0x17f0] sm:$0xff] }
 0x20b   : > { %6046 = vmatpush3.msra.mxu1 %v1293_v52  ;;  %6012 = vmatprep.subr.mxu0 %v1276_v53  ;;  %v1326_v51 = vld [vmem:[%s7565_s16 + $0x1670] sm:$0xff]  ;;  %v1341_v53 = vld [vmem:[%s7565_s16 + $0x16e8] sm:$0xff] }
 0x20c   : > { %6047 = vmatprep.subr.mxu1 %v1308_v54  ;;  %6013 = vmatpush3.msra.mxu0 %v1260_v55  ;;  %v1358_v52 = vld [vmem:[%s7565_s16 + $0x1770] sm:$0xff]  ;;  %v1373_v54 = vld [vmem:[%s7565_s16 + $0x17e8] sm:$0xff] }
 0x20d   : > { %6048 = vmatpush3.msra.mxu1 %v1292_v56  ;;  %6014 = vmatprep.subr.mxu0 %v1275_v57  ;;  %v1325_v55 = vld [vmem:[%s7565_s16 + $0x1668] sm:$0xff]  ;;  %v1340_v57 = vld [vmem:[%s7565_s16 + $0x16e0] sm:$0xff] }
 0x20e   : > { %6049 = vmatprep.subr.mxu1 %v1307_v58  ;;  %6015 = vmatpush3.msra.mxu0 %v1259_v59  ;;  %v1357_v56 = vld [vmem:[%s7565_s16 + $0x1768] sm:$0xff]  ;;  %v1372_v58 = vld [vmem:[%s7565_s16 + $0x17e0] sm:$0xff] }
 0x20f   : > { %6050 = vmatpush3.msra.mxu1 %v1291_v60  ;;  %6016 = vmatprep.subr.mxu0 %v1274_v61  ;;  %v1324_v59 = vld [vmem:[%s7565_s16 + $0x1660] sm:$0xff]  ;;  %v1339_v61 = vld [vmem:[%s7565_s16 + $0x16d8] sm:$0xff] }
 0x210   : > { %6051 = vmatprep.subr.mxu1 %v1306_v62  ;;  %6017 = vmatpush3.msra.mxu0 %v1258_v63  ;;  %v1356_v60 = vld [vmem:[%s7565_s16 + $0x1760] sm:$0xff]  ;;  %v1371_v62 = vld [vmem:[%s7565_s16 + $0x17d8] sm:$0xff] }
 0x211   : > { %6052 = vmatpush3.msra.mxu1 %v1290_v0  ;;  %6018 = vmatprep.subr.mxu0 %v1273_v1  ;;  %v1323_v63 = vld [vmem:[%s7565_s16 + $0x1658] sm:$0xff]  ;;  %v1338_v1 = vld [vmem:[%s7565_s16 + $0x16d0] sm:$0xff] }
 0x212   : > { %6053 = vmatprep.subr.mxu1 %v1305_v2  ;;  %6019 = vmatpush3.msra.mxu0 %v1257_v3  ;;  %v1355_v0 = vld [vmem:[%s7565_s16 + $0x1758] sm:$0xff]  ;;  %v1370_v2 = vld [vmem:[%s7565_s16 + $0x17d0] sm:$0xff] }
 0x213   : > { %6054 = vmatpush3.msra.mxu1 %v1289_v4  ;;  %6020 = vmatprep.subr.mxu0 %v1272_v5  ;;  %v1322_v3 = vld [vmem:[%s7565_s16 + $0x1650] sm:$0xff]  ;;  %v1337_v5 = vld [vmem:[%s7565_s16 + $0x16c8] sm:$0xff] }
 0x214   : > { %6055 = vmatprep.subr.mxu1 %v1304_v6  ;;  %6021 = vmatpush3.msra.mxu0 %v1256_v7  ;;  %v1354_v4 = vld [vmem:[%s7565_s16 + $0x1750] sm:$0xff]  ;;  %v1369_v6 = vld [vmem:[%s7565_s16 + $0x17c8] sm:$0xff] }
 0x215   : > { %6056 = vmatpush3.msra.mxu1 %v1288_v8  ;;  %6022 = vmatprep.subr.mxu0 %v1271_v9  ;;  %v1321_v7 = vld [vmem:[%s7565_s16 + $0x1648] sm:$0xff]  ;;  %v1336_v9 = vld [vmem:[%s7565_s16 + $0x16c0] sm:$0xff] }
 0x216   : > { %6057 = vmatprep.subr.mxu1 %v1303_v10  ;;  %6023 = vmatpush3.msra.mxu0 %v1255_v11  ;;  %v1353_v8 = vld [vmem:[%s7565_s16 + $0x1748] sm:$0xff]  ;;  %v1368_v10 = vld [vmem:[%s7565_s16 + $0x17c0] sm:$0xff] }
 0x217   : > { %6058 = vmatpush3.msra.mxu1 %v1287_v12  ;;  %6024 = vmatprep.subr.mxu0 %v1270_v13  ;;  %v1320_v11 = vld [vmem:[%s7565_s16 + $0x1640] sm:$0xff]  ;;  %v1335_v13 = vld [vmem:[%s7565_s16 + $0x16b8] sm:$0xff] }
 0x218   : > { %6059 = vmatprep.subr.mxu1 %v1302_v14  ;;  %6025 = vmatpush3.msra.mxu0 %v1254_v15  ;;  %v1352_v12 = vld [vmem:[%s7565_s16 + $0x1740] sm:$0xff]  ;;  %v1367_v14 = vld [vmem:[%s7565_s16 + $0x17b8] sm:$0xff] }
 0x219   : > { %6060 = vmatpush3.msra.mxu1 %v1286_v16  ;;  %6026 = vmatprep.subr.mxu0 %v1269_v17  ;;  %v1319_v15 = vld [vmem:[%s7565_s16 + $0x1638] sm:$0xff]  ;;  %v1334_v17 = vld [vmem:[%s7565_s16 + $0x16b0] sm:$0xff] }
 0x21a   : > { %6061 = vmatprep.subr.mxu1 %v1301_v18  ;;  %6027 = vmatpush3.msra.mxu0 %v1253_v19  ;;  %v1351_v16 = vld [vmem:[%s7565_s16 + $0x1738] sm:$0xff]  ;;  %v1366_v18 = vld [vmem:[%s7565_s16 + $0x17b0] sm:$0xff] }
 0x21b   : > { %6062 = vmatpush3.msra.mxu1 %v1285_v20  ;;  %6028 = vmatprep.subr.mxu0 %v1268_v21  ;;  %v1318_v19 = vld [vmem:[%s7565_s16 + $0x1630] sm:$0xff]  ;;  %v1333_v21 = vld [vmem:[%s7565_s16 + $0x16a8] sm:$0xff] }
 0x21c   : > { %6063 = vmatprep.subr.mxu1 %v1300_v22  ;;  %6029 = vmatpush3.msra.mxu0 %v1252_v23  ;;  %v1350_v20 = vld [vmem:[%s7565_s16 + $0x1730] sm:$0xff]  ;;  %v1365_v22 = vld [vmem:[%s7565_s16 + $0x17a8] sm:$0xff] }
 0x21d   : > { %6064 = vmatpush3.msra.mxu1 %v1284_v24  ;;  %6030 = vmatprep.subr.mxu0 %v1267_v25  ;;  %v1317_v23 = vld [vmem:[%s7565_s16 + $0x1628] sm:$0xff]  ;;  %v1332_v25 = vld [vmem:[%s7565_s16 + $0x16a0] sm:$0xff] }
 0x21e   : > { %6065 = vmatprep.subr.mxu1 %v1299_v26  ;;  %6031 = vmatpush3.msra.mxu0 %v1251_v27  ;;  %v1349_v24 = vld [vmem:[%s7565_s16 + $0x1728] sm:$0xff]  ;;  %v1364_v26 = vld [vmem:[%s7565_s16 + $0x17a0] sm:$0xff] }
 0x21f   : > { %6066 = vmatpush3.msra.mxu1 %v1283_v28  ;;  %6032 = vmatprep.subr.mxu0 %v1266_v29  ;;  %v1316_v27 = vld [vmem:[%s7565_s16 + $0x1620] sm:$0xff]  ;;  %v1331_v29 = vld [vmem:[%s7565_s16 + $0x1698] sm:$0xff] }
 0x220   : > { %6067 = vmatprep.subr.mxu1 %v1298_v30  ;;  %6033 = vmatpush3.msra.mxu0 %v1250_v31  ;;  %v1348_v28 = vld [vmem:[%s7565_s16 + $0x1720] sm:$0xff]  ;;  %v1363_v30 = vld [vmem:[%s7565_s16 + $0x1798] sm:$0xff] }
 0x221   : > { %6068 = vmatpush3.msra.mxu1 %v1282_v32  ;;  %6034 = vmatprep.subr.mxu0 %v1265_v33  ;;  %v1315_v31 = vld [vmem:[%s7565_s16 + $0x1618] sm:$0xff]  ;;  %v1330_v33 = vld [vmem:[%s7565_s16 + $0x1690] sm:$0xff] }
 0x222   : > { %6069 = vmatprep.subr.mxu1 %v1297_v34  ;;  %6035 = vmatpush3.msra.mxu0 %v1249_v35  ;;  %v1347_v32 = vld [vmem:[%s7565_s16 + $0x1718] sm:$0xff]  ;;  %v1362_v34 = vld [vmem:[%s7565_s16 + $0x1790] sm:$0xff] }
 0x223   : > { %6070 = vmatpush3.msra.mxu1 %v1281_v36  ;;  %6036 = vmatprep.subr.mxu0 %v1264_v37  ;;  %v1314_v35 = vld [vmem:[%s7565_s16 + $0x1610] sm:$0xff]  ;;  %v1329_v37 = vld [vmem:[%s7565_s16 + $0x1688] sm:$0xff] }
 0x224   : > { %6071 = vmatprep.subr.mxu1 %v1296_v38  ;;  %6037 = vmatpush3.msra.mxu0 %v1248_v39  ;;  %v1346_v36 = vld [vmem:[%s7565_s16 + $0x1710] sm:$0xff]  ;;  %v1361_v38 = vld [vmem:[%s7565_s16 + $0x1788] sm:$0xff] }
 0x225   : > { %3416 = vmatprep.mubr.f32.mxu0 %v565_v40  ;;  %6072 = vmatpush3.msra.mxu1 %v1280_v41  ;;  %v1313_v39 = vld [vmem:[%s7565_s16 + $0x1608] sm:$0xff]  ;;  %v1328_v41 = vld [vmem:[%s7565_s16 + $0x1680] sm:$0xff] }
 0x226   : > { %3417 = vmatmul.mubr.f32.vlgmr.msra.gmra.mxu0 %v564_v42  ;;  %3486 = vmatprep.mubr.f32.mxu1 %v567_v43  ;;  %v1345_v40 = vld [vmem:[%s7565_s16 + $0x1708] sm:$0xff]  ;;  %v1360_v42 = vld [vmem:[%s7565_s16 + $0x1780] sm:$0xff] }
 0x227   : > { %6076 = vmatprep.subr.mxu0 %v1343_v44  ;;  %6111 = vmatprep.subr.mxu1 %v1375_v45  ;;  %v1312_v43 = vld [vmem:[%s7565_s16 + $0x1600] sm:$0xff] }
 0x228   : > { %3487 = vmatmul.mubr.f32.vlgmr.msra.gmra.mxu1 %v566_v46  ;;  %6077 = vmatpush3.msra.mxu0 %v1327_v47  ;;  %v569_v44 = vld [vmem:[%s7591_s29 + $0x168] sm:$0xff]  ;;  %v568_v46 = vld [vmem:[%s7591_s29 + $0x160] sm:$0xff]  ;;  %v571_v47 = vld [vmem:[%s7591_s29 + $0x178] sm:$0xff] }
 0x229   : > { %6112 = vmatpush3.msra.mxu1 %v1359_v48  ;;  %6078 = vmatprep.subr.mxu0 %v1342_v49  ;;  %v1344_v45 = vld [vmem:[%s7565_s16 + $0x1700] sm:$0xff]  ;;  %v1407_v48 = vld [vmem:[%s7565_s16 + $0x18f8] sm:$0xff] }
 0x22a   : > { %6113 = vmatprep.subr.mxu1 %v1374_v50  ;;  %6079 = vmatpush3.msra.mxu0 %v1326_v51  ;;  %v1439_v49 = vld [vmem:[%s7565_s16 + $0x19f8] sm:$0xff]  ;;  %v570_v50 = vld [vmem:[%s7591_s29 + $0x170] sm:$0xff] }
 0x22b   : > { %6114 = vmatpush3.msra.mxu1 %v1358_v52  ;;  %6080 = vmatprep.subr.mxu0 %v1341_v53  ;;  %v1391_v51 = vld [vmem:[%s7565_s16 + $0x1878] sm:$0xff]  ;;  %v1406_v53 = vld [vmem:[%s7565_s16 + $0x18f0] sm:$0xff] }
 0x22c   : > { %6115 = vmatprep.subr.mxu1 %v1373_v54  ;;  %6081 = vmatpush3.msra.mxu0 %v1325_v55  ;;  %v1423_v52 = vld [vmem:[%s7565_s16 + $0x1978] sm:$0xff]  ;;  %v1438_v54 = vld [vmem:[%s7565_s16 + $0x19f0] sm:$0xff] }
 0x22d   : > { %6116 = vmatpush3.msra.mxu1 %v1357_v56  ;;  %6082 = vmatprep.subr.mxu0 %v1340_v57  ;;  %v1390_v55 = vld [vmem:[%s7565_s16 + $0x1870] sm:$0xff]  ;;  %v1405_v57 = vld [vmem:[%s7565_s16 + $0x18e8] sm:$0xff] }
 0x22e   : > { %6117 = vmatprep.subr.mxu1 %v1372_v58  ;;  %6083 = vmatpush3.msra.mxu0 %v1324_v59  ;;  %v1422_v56 = vld [vmem:[%s7565_s16 + $0x1970] sm:$0xff]  ;;  %v1437_v58 = vld [vmem:[%s7565_s16 + $0x19e8] sm:$0xff] }
 0x22f   : > { %6118 = vmatpush3.msra.mxu1 %v1356_v60  ;;  %6084 = vmatprep.subr.mxu0 %v1339_v61  ;;  %v1389_v59 = vld [vmem:[%s7565_s16 + $0x1868] sm:$0xff]  ;;  %v1404_v61 = vld [vmem:[%s7565_s16 + $0x18e0] sm:$0xff] }
 0x230   : > { %6119 = vmatprep.subr.mxu1 %v1371_v62  ;;  %6085 = vmatpush3.msra.mxu0 %v1323_v63  ;;  %v1421_v60 = vld [vmem:[%s7565_s16 + $0x1968] sm:$0xff]  ;;  %v1436_v62 = vld [vmem:[%s7565_s16 + $0x19e0] sm:$0xff] }
 0x231   : > { %6120 = vmatpush3.msra.mxu1 %v1355_v0  ;;  %6086 = vmatprep.subr.mxu0 %v1338_v1  ;;  %v1388_v63 = vld [vmem:[%s7565_s16 + $0x1860] sm:$0xff]  ;;  %v1403_v1 = vld [vmem:[%s7565_s16 + $0x18d8] sm:$0xff] }
 0x232   : > { %6121 = vmatprep.subr.mxu1 %v1370_v2  ;;  %6087 = vmatpush3.msra.mxu0 %v1322_v3  ;;  %v1420_v0 = vld [vmem:[%s7565_s16 + $0x1960] sm:$0xff]  ;;  %v1435_v2 = vld [vmem:[%s7565_s16 + $0x19d8] sm:$0xff] }
 0x233   : > { %6122 = vmatpush3.msra.mxu1 %v1354_v4  ;;  %6088 = vmatprep.subr.mxu0 %v1337_v5  ;;  %v1387_v3 = vld [vmem:[%s7565_s16 + $0x1858] sm:$0xff]  ;;  %v1402_v5 = vld [vmem:[%s7565_s16 + $0x18d0] sm:$0xff] }
 0x234   : > { %6123 = vmatprep.subr.mxu1 %v1369_v6  ;;  %6089 = vmatpush3.msra.mxu0 %v1321_v7  ;;  %v1419_v4 = vld [vmem:[%s7565_s16 + $0x1958] sm:$0xff]  ;;  %v1434_v6 = vld [vmem:[%s7565_s16 + $0x19d0] sm:$0xff] }
 0x235   : > { %6124 = vmatpush3.msra.mxu1 %v1353_v8  ;;  %6090 = vmatprep.subr.mxu0 %v1336_v9  ;;  %v1386_v7 = vld [vmem:[%s7565_s16 + $0x1850] sm:$0xff]  ;;  %v1401_v9 = vld [vmem:[%s7565_s16 + $0x18c8] sm:$0xff] }
 0x236   : > { %6125 = vmatprep.subr.mxu1 %v1368_v10  ;;  %6091 = vmatpush3.msra.mxu0 %v1320_v11  ;;  %v1418_v8 = vld [vmem:[%s7565_s16 + $0x1950] sm:$0xff]  ;;  %v1433_v10 = vld [vmem:[%s7565_s16 + $0x19c8] sm:$0xff] }
 0x237   : > { %6126 = vmatpush3.msra.mxu1 %v1352_v12  ;;  %6092 = vmatprep.subr.mxu0 %v1335_v13  ;;  %v1385_v11 = vld [vmem:[%s7565_s16 + $0x1848] sm:$0xff]  ;;  %v1400_v13 = vld [vmem:[%s7565_s16 + $0x18c0] sm:$0xff] }
 0x238   : > { %6127 = vmatprep.subr.mxu1 %v1367_v14  ;;  %6093 = vmatpush3.msra.mxu0 %v1319_v15  ;;  %v1417_v12 = vld [vmem:[%s7565_s16 + $0x1948] sm:$0xff]  ;;  %v1432_v14 = vld [vmem:[%s7565_s16 + $0x19c0] sm:$0xff] }
 0x239   : > { %6128 = vmatpush3.msra.mxu1 %v1351_v16  ;;  %6094 = vmatprep.subr.mxu0 %v1334_v17  ;;  %v1384_v15 = vld [vmem:[%s7565_s16 + $0x1840] sm:$0xff]  ;;  %v1399_v17 = vld [vmem:[%s7565_s16 + $0x18b8] sm:$0xff] }
 0x23a   : > { %6129 = vmatprep.subr.mxu1 %v1366_v18  ;;  %6095 = vmatpush3.msra.mxu0 %v1318_v19  ;;  %v1416_v16 = vld [vmem:[%s7565_s16 + $0x1940] sm:$0xff]  ;;  %v1431_v18 = vld [vmem:[%s7565_s16 + $0x19b8] sm:$0xff] }
 0x23b   : > { %6130 = vmatpush3.msra.mxu1 %v1350_v20  ;;  %6096 = vmatprep.subr.mxu0 %v1333_v21  ;;  %v1383_v19 = vld [vmem:[%s7565_s16 + $0x1838] sm:$0xff]  ;;  %v1398_v21 = vld [vmem:[%s7565_s16 + $0x18b0] sm:$0xff] }
 0x23c   : > { %6131 = vmatprep.subr.mxu1 %v1365_v22  ;;  %6097 = vmatpush3.msra.mxu0 %v1317_v23  ;;  %v1415_v20 = vld [vmem:[%s7565_s16 + $0x1938] sm:$0xff]  ;;  %v1430_v22 = vld [vmem:[%s7565_s16 + $0x19b0] sm:$0xff] }
 0x23d   : > { %6132 = vmatpush3.msra.mxu1 %v1349_v24  ;;  %6098 = vmatprep.subr.mxu0 %v1332_v25  ;;  %v1382_v23 = vld [vmem:[%s7565_s16 + $0x1830] sm:$0xff]  ;;  %v1397_v25 = vld [vmem:[%s7565_s16 + $0x18a8] sm:$0xff] }
 0x23e   : > { %6133 = vmatprep.subr.mxu1 %v1364_v26  ;;  %6099 = vmatpush3.msra.mxu0 %v1316_v27  ;;  %v1414_v24 = vld [vmem:[%s7565_s16 + $0x1930] sm:$0xff]  ;;  %v1429_v26 = vld [vmem:[%s7565_s16 + $0x19a8] sm:$0xff] }
 0x23f   : > { %6134 = vmatpush3.msra.mxu1 %v1348_v28  ;;  %6100 = vmatprep.subr.mxu0 %v1331_v29  ;;  %v1381_v27 = vld [vmem:[%s7565_s16 + $0x1828] sm:$0xff]  ;;  %v1396_v29 = vld [vmem:[%s7565_s16 + $0x18a0] sm:$0xff] }
 0x240   : > { %6135 = vmatprep.subr.mxu1 %v1363_v30  ;;  %6101 = vmatpush3.msra.mxu0 %v1315_v31  ;;  %v1413_v28 = vld [vmem:[%s7565_s16 + $0x1928] sm:$0xff]  ;;  %v1428_v30 = vld [vmem:[%s7565_s16 + $0x19a0] sm:$0xff] }
 0x241   : > { %6136 = vmatpush3.msra.mxu1 %v1347_v32  ;;  %6102 = vmatprep.subr.mxu0 %v1330_v33  ;;  %v1380_v31 = vld [vmem:[%s7565_s16 + $0x1820] sm:$0xff]  ;;  %v1395_v33 = vld [vmem:[%s7565_s16 + $0x1898] sm:$0xff] }
 0x242   : > { %6137 = vmatprep.subr.mxu1 %v1362_v34  ;;  %6103 = vmatpush3.msra.mxu0 %v1314_v35  ;;  %v1412_v32 = vld [vmem:[%s7565_s16 + $0x1920] sm:$0xff]  ;;  %v1427_v34 = vld [vmem:[%s7565_s16 + $0x1998] sm:$0xff] }
 0x243   : > { %6138 = vmatpush3.msra.mxu1 %v1346_v36  ;;  %6104 = vmatprep.subr.mxu0 %v1329_v37  ;;  %v1379_v35 = vld [vmem:[%s7565_s16 + $0x1818] sm:$0xff]  ;;  %v1394_v37 = vld [vmem:[%s7565_s16 + $0x1890] sm:$0xff] }
 0x244   : > { %6139 = vmatprep.subr.mxu1 %v1361_v38  ;;  %6105 = vmatpush3.msra.mxu0 %v1313_v39  ;;  %v1411_v36 = vld [vmem:[%s7565_s16 + $0x1918] sm:$0xff]  ;;  %v1426_v38 = vld [vmem:[%s7565_s16 + $0x1990] sm:$0xff] }
 0x245   : > { %6140 = vmatpush3.msra.mxu1 %v1345_v40  ;;  %6106 = vmatprep.subr.mxu0 %v1328_v41  ;;  %v1378_v39 = vld [vmem:[%s7565_s16 + $0x1810] sm:$0xff]  ;;  %v1393_v41 = vld [vmem:[%s7565_s16 + $0x1888] sm:$0xff] }
 0x246   : > { %6141 = vmatprep.subr.mxu1 %v1360_v42  ;;  %6107 = vmatpush3.msra.mxu0 %v1312_v43  ;;  %v1410_v40 = vld [vmem:[%s7565_s16 + $0x1910] sm:$0xff]  ;;  %v1425_v42 = vld [vmem:[%s7565_s16 + $0x1988] sm:$0xff] }
 0x247   : > { %3556 = vmatprep.mubr.f32.mxu0 %v569_v44  ;;  %6142 = vmatpush3.msra.mxu1 %v1344_v45  ;;  %v1377_v43 = vld [vmem:[%s7565_s16 + $0x1808] sm:$0xff]  ;;  %v1392_v45 = vld [vmem:[%s7565_s16 + $0x1880] sm:$0xff] }
 0x248   : > { %3557 = vmatmul.mubr.f32.vlgmr.msra.gmra.mxu0 %v568_v46  ;;  %3626 = vmatprep.mubr.f32.mxu1 %v571_v47  ;;  %v1409_v44 = vld [vmem:[%s7565_s16 + $0x1908] sm:$0xff]  ;;  %v1424_v46 = vld [vmem:[%s7565_s16 + $0x1980] sm:$0xff] }
 0x249   : > { %6146 = vmatprep.subr.mxu0 %v1407_v48  ;;  %6181 = vmatprep.subr.mxu1 %v1439_v49  ;;  %v1376_v47 = vld [vmem:[%s7565_s16 + $0x1800] sm:$0xff] }
 0x24a   : > { %3627 = vmatmul.mubr.f32.vlgmr.msra.gmra.mxu1 %v570_v50  ;;  %6147 = vmatpush3.msra.mxu0 %v1391_v51  ;;  %v573_v48 = vld [vmem:[%s7591_s29 + $0x188] sm:$0xff]  ;;  %v572_v50 = vld [vmem:[%s7591_s29 + $0x180] sm:$0xff]  ;;  %v575_v51 = vld [vmem:[%s7591_s29 + $0x198] sm:$0xff] }
 0x24b   : > { %6182 = vmatpush3.msra.mxu1 %v1423_v52  ;;  %6148 = vmatprep.subr.mxu0 %v1406_v53  ;;  %v1408_v49 = vld [vmem:[%s7565_s16 + $0x1900] sm:$0xff]  ;;  %v1471_v52 = vld [vmem:[%s7565_s16 + $0x1af8] sm:$0xff] }
 0x24c   : > { %6183 = vmatprep.subr.mxu1 %v1438_v54  ;;  %6149 = vmatpush3.msra.mxu0 %v1390_v55  ;;  %v1503_v53 = vld [vmem:[%s7565_s16 + $0x1bf8] sm:$0xff]  ;;  %v574_v54 = vld [vmem:[%s7591_s29 + $0x190] sm:$0xff] }
 0x24d   : > { %6184 = vmatpush3.msra.mxu1 %v1422_v56  ;;  %6150 = vmatprep.subr.mxu0 %v1405_v57  ;;  %v1455_v55 = vld [vmem:[%s7565_s16 + $0x1a78] sm:$0xff]  ;;  %v1470_v57 = vld [vmem:[%s7565_s16 + $0x1af0] sm:$0xff] }
 0x24e   : > { %6185 = vmatprep.subr.mxu1 %v1437_v58  ;;  %6151 = vmatpush3.msra.mxu0 %v1389_v59  ;;  %v1487_v56 = vld [vmem:[%s7565_s16 + $0x1b78] sm:$0xff]  ;;  %v1502_v58 = vld [vmem:[%s7565_s16 + $0x1bf0] sm:$0xff] }
 0x24f   : > { %6186 = vmatpush3.msra.mxu1 %v1421_v60  ;;  %6152 = vmatprep.subr.mxu0 %v1404_v61  ;;  %v1454_v59 = vld [vmem:[%s7565_s16 + $0x1a70] sm:$0xff]  ;;  %v1469_v61 = vld [vmem:[%s7565_s16 + $0x1ae8] sm:$0xff] }
 0x250   : > { %6187 = vmatprep.subr.mxu1 %v1436_v62  ;;  %6153 = vmatpush3.msra.mxu0 %v1388_v63  ;;  %v1486_v60 = vld [vmem:[%s7565_s16 + $0x1b70] sm:$0xff]  ;;  %v1501_v62 = vld [vmem:[%s7565_s16 + $0x1be8] sm:$0xff] }
 0x251   : > { %6188 = vmatpush3.msra.mxu1 %v1420_v0  ;;  %6154 = vmatprep.subr.mxu0 %v1403_v1  ;;  %v1453_v63 = vld [vmem:[%s7565_s16 + $0x1a68] sm:$0xff]  ;;  %v1468_v1 = vld [vmem:[%s7565_s16 + $0x1ae0] sm:$0xff] }
 0x252   : > { %6189 = vmatprep.subr.mxu1 %v1435_v2  ;;  %6155 = vmatpush3.msra.mxu0 %v1387_v3  ;;  %v1485_v0 = vld [vmem:[%s7565_s16 + $0x1b68] sm:$0xff]  ;;  %v1500_v2 = vld [vmem:[%s7565_s16 + $0x1be0] sm:$0xff] }
 0x253   : > { %6190 = vmatpush3.msra.mxu1 %v1419_v4  ;;  %6156 = vmatprep.subr.mxu0 %v1402_v5  ;;  %v1452_v3 = vld [vmem:[%s7565_s16 + $0x1a60] sm:$0xff]  ;;  %v1467_v5 = vld [vmem:[%s7565_s16 + $0x1ad8] sm:$0xff] }
 0x254   : > { %6191 = vmatprep.subr.mxu1 %v1434_v6  ;;  %6157 = vmatpush3.msra.mxu0 %v1386_v7  ;;  %v1484_v4 = vld [vmem:[%s7565_s16 + $0x1b60] sm:$0xff]  ;;  %v1499_v6 = vld [vmem:[%s7565_s16 + $0x1bd8] sm:$0xff] }
 0x255   : > { %6192 = vmatpush3.msra.mxu1 %v1418_v8  ;;  %6158 = vmatprep.subr.mxu0 %v1401_v9  ;;  %v1451_v7 = vld [vmem:[%s7565_s16 + $0x1a58] sm:$0xff]  ;;  %v1466_v9 = vld [vmem:[%s7565_s16 + $0x1ad0] sm:$0xff] }
 0x256   : > { %6193 = vmatprep.subr.mxu1 %v1433_v10  ;;  %6159 = vmatpush3.msra.mxu0 %v1385_v11  ;;  %v1483_v8 = vld [vmem:[%s7565_s16 + $0x1b58] sm:$0xff]  ;;  %v1498_v10 = vld [vmem:[%s7565_s16 + $0x1bd0] sm:$0xff] }
 0x257   : > { %6194 = vmatpush3.msra.mxu1 %v1417_v12  ;;  %6160 = vmatprep.subr.mxu0 %v1400_v13  ;;  %v1450_v11 = vld [vmem:[%s7565_s16 + $0x1a50] sm:$0xff]  ;;  %v1465_v13 = vld [vmem:[%s7565_s16 + $0x1ac8] sm:$0xff] }
 0x258   : > { %6195 = vmatprep.subr.mxu1 %v1432_v14  ;;  %6161 = vmatpush3.msra.mxu0 %v1384_v15  ;;  %v1482_v12 = vld [vmem:[%s7565_s16 + $0x1b50] sm:$0xff]  ;;  %v1497_v14 = vld [vmem:[%s7565_s16 + $0x1bc8] sm:$0xff] }
 0x259   : > { %6196 = vmatpush3.msra.mxu1 %v1416_v16  ;;  %6162 = vmatprep.subr.mxu0 %v1399_v17  ;;  %v1449_v15 = vld [vmem:[%s7565_s16 + $0x1a48] sm:$0xff]  ;;  %v1464_v17 = vld [vmem:[%s7565_s16 + $0x1ac0] sm:$0xff] }
 0x25a   : > { %6197 = vmatprep.subr.mxu1 %v1431_v18  ;;  %6163 = vmatpush3.msra.mxu0 %v1383_v19  ;;  %v1481_v16 = vld [vmem:[%s7565_s16 + $0x1b48] sm:$0xff]  ;;  %v1496_v18 = vld [vmem:[%s7565_s16 + $0x1bc0] sm:$0xff] }
 0x25b   : > { %6198 = vmatpush3.msra.mxu1 %v1415_v20  ;;  %6164 = vmatprep.subr.mxu0 %v1398_v21  ;;  %v1448_v19 = vld [vmem:[%s7565_s16 + $0x1a40] sm:$0xff]  ;;  %v1463_v21 = vld [vmem:[%s7565_s16 + $0x1ab8] sm:$0xff] }
 0x25c   : > { %6199 = vmatprep.subr.mxu1 %v1430_v22  ;;  %6165 = vmatpush3.msra.mxu0 %v1382_v23  ;;  %v1480_v20 = vld [vmem:[%s7565_s16 + $0x1b40] sm:$0xff]  ;;  %v1495_v22 = vld [vmem:[%s7565_s16 + $0x1bb8] sm:$0xff] }
 0x25d   : > { %6200 = vmatpush3.msra.mxu1 %v1414_v24  ;;  %6166 = vmatprep.subr.mxu0 %v1397_v25  ;;  %v1447_v23 = vld [vmem:[%s7565_s16 + $0x1a38] sm:$0xff]  ;;  %v1462_v25 = vld [vmem:[%s7565_s16 + $0x1ab0] sm:$0xff] }
 0x25e   : > { %6201 = vmatprep.subr.mxu1 %v1429_v26  ;;  %6167 = vmatpush3.msra.mxu0 %v1381_v27  ;;  %v1479_v24 = vld [vmem:[%s7565_s16 + $0x1b38] sm:$0xff]  ;;  %v1494_v26 = vld [vmem:[%s7565_s16 + $0x1bb0] sm:$0xff] }
 0x25f   : > { %6202 = vmatpush3.msra.mxu1 %v1413_v28  ;;  %6168 = vmatprep.subr.mxu0 %v1396_v29  ;;  %v1446_v27 = vld [vmem:[%s7565_s16 + $0x1a30] sm:$0xff]  ;;  %v1461_v29 = vld [vmem:[%s7565_s16 + $0x1aa8] sm:$0xff] }
 0x260   : > { %6203 = vmatprep.subr.mxu1 %v1428_v30  ;;  %6169 = vmatpush3.msra.mxu0 %v1380_v31  ;;  %v1478_v28 = vld [vmem:[%s7565_s16 + $0x1b30] sm:$0xff]  ;;  %v1493_v30 = vld [vmem:[%s7565_s16 + $0x1ba8] sm:$0xff] }
 0x261   : > { %6204 = vmatpush3.msra.mxu1 %v1412_v32  ;;  %6170 = vmatprep.subr.mxu0 %v1395_v33  ;;  %v1445_v31 = vld [vmem:[%s7565_s16 + $0x1a28] sm:$0xff]  ;;  %v1460_v33 = vld [vmem:[%s7565_s16 + $0x1aa0] sm:$0xff] }
 0x262   : > { %6205 = vmatprep.subr.mxu1 %v1427_v34  ;;  %6171 = vmatpush3.msra.mxu0 %v1379_v35  ;;  %v1477_v32 = vld [vmem:[%s7565_s16 + $0x1b28] sm:$0xff]  ;;  %v1492_v34 = vld [vmem:[%s7565_s16 + $0x1ba0] sm:$0xff] }
 0x263   : > { %6206 = vmatpush3.msra.mxu1 %v1411_v36  ;;  %6172 = vmatprep.subr.mxu0 %v1394_v37  ;;  %v1444_v35 = vld [vmem:[%s7565_s16 + $0x1a20] sm:$0xff]  ;;  %v1459_v37 = vld [vmem:[%s7565_s16 + $0x1a98] sm:$0xff] }
 0x264   : > { %6207 = vmatprep.subr.mxu1 %v1426_v38  ;;  %6173 = vmatpush3.msra.mxu0 %v1378_v39  ;;  %v1476_v36 = vld [vmem:[%s7565_s16 + $0x1b20] sm:$0xff]  ;;  %v1491_v38 = vld [vmem:[%s7565_s16 + $0x1b98] sm:$0xff] }
 0x265   : > { %6208 = vmatpush3.msra.mxu1 %v1410_v40  ;;  %6174 = vmatprep.subr.mxu0 %v1393_v41  ;;  %v1443_v39 = vld [vmem:[%s7565_s16 + $0x1a18] sm:$0xff]  ;;  %v1458_v41 = vld [vmem:[%s7565_s16 + $0x1a90] sm:$0xff] }
 0x266   : > { %6209 = vmatprep.subr.mxu1 %v1425_v42  ;;  %6175 = vmatpush3.msra.mxu0 %v1377_v43  ;;  %v1475_v40 = vld [vmem:[%s7565_s16 + $0x1b18] sm:$0xff]  ;;  %v1490_v42 = vld [vmem:[%s7565_s16 + $0x1b90] sm:$0xff] }
 0x267   : > { %6210 = vmatpush3.msra.mxu1 %v1409_v44  ;;  %6176 = vmatprep.subr.mxu0 %v1392_v45  ;;  %v1442_v43 = vld [vmem:[%s7565_s16 + $0x1a10] sm:$0xff]  ;;  %v1457_v45 = vld [vmem:[%s7565_s16 + $0x1a88] sm:$0xff] }
 0x268   : > { %6211 = vmatprep.subr.mxu1 %v1424_v46  ;;  %6177 = vmatpush3.msra.mxu0 %v1376_v47  ;;  %v1474_v44 = vld [vmem:[%s7565_s16 + $0x1b10] sm:$0xff]  ;;  %v1489_v46 = vld [vmem:[%s7565_s16 + $0x1b88] sm:$0xff] }
 0x269   : > { %3696 = vmatprep.mubr.f32.mxu0 %v573_v48  ;;  %6212 = vmatpush3.msra.mxu1 %v1408_v49  ;;  %v1441_v47 = vld [vmem:[%s7565_s16 + $0x1a08] sm:$0xff]  ;;  %v1456_v49 = vld [vmem:[%s7565_s16 + $0x1a80] sm:$0xff] }
 0x26a   : > { %3697 = vmatmul.mubr.f32.vlgmr.msra.gmra.mxu0 %v572_v50  ;;  %3766 = vmatprep.mubr.f32.mxu1 %v575_v51  ;;  %v1473_v48 = vld [vmem:[%s7565_s16 + $0x1b08] sm:$0xff]  ;;  %v1488_v50 = vld [vmem:[%s7565_s16 + $0x1b80] sm:$0xff] }
 0x26b   : > { %6216 = vmatprep.subr.mxu0 %v1471_v52  ;;  %6251 = vmatprep.subr.mxu1 %v1503_v53  ;;  %v1440_v51 = vld [vmem:[%s7565_s16 + $0x1a00] sm:$0xff] }
 0x26c   : > { %3767 = vmatmul.mubr.f32.vlgmr.msra.gmra.mxu1 %v574_v54  ;;  %6217 = vmatpush3.msra.mxu0 %v1455_v55  ;;  %v577_v52 = vld [vmem:[%s7591_s29 + $0x1a8] sm:$0xff]  ;;  %v576_v54 = vld [vmem:[%s7591_s29 + $0x1a0] sm:$0xff]  ;;  %v579_v55 = vld [vmem:[%s7591_s29 + $0x1b8] sm:$0xff] }
 0x26d   : > { %6252 = vmatpush3.msra.mxu1 %v1487_v56  ;;  %6218 = vmatprep.subr.mxu0 %v1470_v57  ;;  %v1472_v53 = vld [vmem:[%s7565_s16 + $0x1b00] sm:$0xff]  ;;  %v1535_v56 = vld [vmem:[%s7565_s16 + $0x1cf8] sm:$0xff] }
 0x26e   : > { %6253 = vmatprep.subr.mxu1 %v1502_v58  ;;  %6219 = vmatpush3.msra.mxu0 %v1454_v59  ;;  %v1567_v57 = vld [vmem:[%s7565_s16 + $0x1df8] sm:$0xff]  ;;  %v578_v58 = vld [vmem:[%s7591_s29 + $0x1b0] sm:$0xff] }
 0x26f   : > { %6254 = vmatpush3.msra.mxu1 %v1486_v60  ;;  %6220 = vmatprep.subr.mxu0 %v1469_v61  ;;  %v1519_v59 = vld [vmem:[%s7565_s16 + $0x1c78] sm:$0xff]  ;;  %v1534_v61 = vld [vmem:[%s7565_s16 + $0x1cf0] sm:$0xff] }
 0x270   : > { %6255 = vmatprep.subr.mxu1 %v1501_v62  ;;  %6221 = vmatpush3.msra.mxu0 %v1453_v63  ;;  %v1551_v60 = vld [vmem:[%s7565_s16 + $0x1d78] sm:$0xff]  ;;  %v1566_v62 = vld [vmem:[%s7565_s16 + $0x1df0] sm:$0xff] }
 0x271   : > { %6256 = vmatpush3.msra.mxu1 %v1485_v0  ;;  %6222 = vmatprep.subr.mxu0 %v1468_v1  ;;  %v1518_v63 = vld [vmem:[%s7565_s16 + $0x1c70] sm:$0xff]  ;;  %v1533_v1 = vld [vmem:[%s7565_s16 + $0x1ce8] sm:$0xff] }
 0x272   : > { %6257 = vmatprep.subr.mxu1 %v1500_v2  ;;  %6223 = vmatpush3.msra.mxu0 %v1452_v3  ;;  %v1550_v0 = vld [vmem:[%s7565_s16 + $0x1d70] sm:$0xff]  ;;  %v1565_v2 = vld [vmem:[%s7565_s16 + $0x1de8] sm:$0xff] }
 0x273   : > { %6258 = vmatpush3.msra.mxu1 %v1484_v4  ;;  %6224 = vmatprep.subr.mxu0 %v1467_v5  ;;  %v1517_v3 = vld [vmem:[%s7565_s16 + $0x1c68] sm:$0xff]  ;;  %v1532_v5 = vld [vmem:[%s7565_s16 + $0x1ce0] sm:$0xff] }
 0x274   : > { %6259 = vmatprep.subr.mxu1 %v1499_v6  ;;  %6225 = vmatpush3.msra.mxu0 %v1451_v7  ;;  %v1549_v4 = vld [vmem:[%s7565_s16 + $0x1d68] sm:$0xff]  ;;  %v1564_v6 = vld [vmem:[%s7565_s16 + $0x1de0] sm:$0xff] }
 0x275   : > { %6260 = vmatpush3.msra.mxu1 %v1483_v8  ;;  %6226 = vmatprep.subr.mxu0 %v1466_v9  ;;  %v1516_v7 = vld [vmem:[%s7565_s16 + $0x1c60] sm:$0xff]  ;;  %v1531_v9 = vld [vmem:[%s7565_s16 + $0x1cd8] sm:$0xff] }
 0x276   : > { %6261 = vmatprep.subr.mxu1 %v1498_v10  ;;  %6227 = vmatpush3.msra.mxu0 %v1450_v11  ;;  %v1548_v8 = vld [vmem:[%s7565_s16 + $0x1d60] sm:$0xff]  ;;  %v1563_v10 = vld [vmem:[%s7565_s16 + $0x1dd8] sm:$0xff] }
 0x277   : > { %6262 = vmatpush3.msra.mxu1 %v1482_v12  ;;  %6228 = vmatprep.subr.mxu0 %v1465_v13  ;;  %v1515_v11 = vld [vmem:[%s7565_s16 + $0x1c58] sm:$0xff]  ;;  %v1530_v13 = vld [vmem:[%s7565_s16 + $0x1cd0] sm:$0xff] }
 0x278   : > { %6263 = vmatprep.subr.mxu1 %v1497_v14  ;;  %6229 = vmatpush3.msra.mxu0 %v1449_v15  ;;  %v1547_v12 = vld [vmem:[%s7565_s16 + $0x1d58] sm:$0xff]  ;;  %v1562_v14 = vld [vmem:[%s7565_s16 + $0x1dd0] sm:$0xff] }
 0x279   : > { %6264 = vmatpush3.msra.mxu1 %v1481_v16  ;;  %6230 = vmatprep.subr.mxu0 %v1464_v17  ;;  %v1514_v15 = vld [vmem:[%s7565_s16 + $0x1c50] sm:$0xff]  ;;  %v1529_v17 = vld [vmem:[%s7565_s16 + $0x1cc8] sm:$0xff] }
 0x27a   : > { %6265 = vmatprep.subr.mxu1 %v1496_v18  ;;  %6231 = vmatpush3.msra.mxu0 %v1448_v19  ;;  %v1546_v16 = vld [vmem:[%s7565_s16 + $0x1d50] sm:$0xff]  ;;  %v1561_v18 = vld [vmem:[%s7565_s16 + $0x1dc8] sm:$0xff] }
 0x27b   : > { %6266 = vmatpush3.msra.mxu1 %v1480_v20  ;;  %6232 = vmatprep.subr.mxu0 %v1463_v21  ;;  %v1513_v19 = vld [vmem:[%s7565_s16 + $0x1c48] sm:$0xff]  ;;  %v1528_v21 = vld [vmem:[%s7565_s16 + $0x1cc0] sm:$0xff] }
 0x27c   : > { %6267 = vmatprep.subr.mxu1 %v1495_v22  ;;  %6233 = vmatpush3.msra.mxu0 %v1447_v23  ;;  %v1545_v20 = vld [vmem:[%s7565_s16 + $0x1d48] sm:$0xff]  ;;  %v1560_v22 = vld [vmem:[%s7565_s16 + $0x1dc0] sm:$0xff] }
 0x27d   : > { %6268 = vmatpush3.msra.mxu1 %v1479_v24  ;;  %6234 = vmatprep.subr.mxu0 %v1462_v25  ;;  %v1512_v23 = vld [vmem:[%s7565_s16 + $0x1c40] sm:$0xff]  ;;  %v1527_v25 = vld [vmem:[%s7565_s16 + $0x1cb8] sm:$0xff] }
 0x27e   : > { %6269 = vmatprep.subr.mxu1 %v1494_v26  ;;  %6235 = vmatpush3.msra.mxu0 %v1446_v27  ;;  %v1544_v24 = vld [vmem:[%s7565_s16 + $0x1d40] sm:$0xff]  ;;  %v1559_v26 = vld [vmem:[%s7565_s16 + $0x1db8] sm:$0xff] }
 0x27f   : > { %6270 = vmatpush3.msra.mxu1 %v1478_v28  ;;  %6236 = vmatprep.subr.mxu0 %v1461_v29  ;;  %v1511_v27 = vld [vmem:[%s7565_s16 + $0x1c38] sm:$0xff]  ;;  %v1526_v29 = vld [vmem:[%s7565_s16 + $0x1cb0] sm:$0xff] }
 0x280   : > { %6271 = vmatprep.subr.mxu1 %v1493_v30  ;;  %6237 = vmatpush3.msra.mxu0 %v1445_v31  ;;  %v1543_v28 = vld [vmem:[%s7565_s16 + $0x1d38] sm:$0xff]  ;;  %v1558_v30 = vld [vmem:[%s7565_s16 + $0x1db0] sm:$0xff] }
 0x281   : > { %6272 = vmatpush3.msra.mxu1 %v1477_v32  ;;  %6238 = vmatprep.subr.mxu0 %v1460_v33  ;;  %v1510_v31 = vld [vmem:[%s7565_s16 + $0x1c30] sm:$0xff]  ;;  %v1525_v33 = vld [vmem:[%s7565_s16 + $0x1ca8] sm:$0xff] }
 0x282   : > { %6273 = vmatprep.subr.mxu1 %v1492_v34  ;;  %6239 = vmatpush3.msra.mxu0 %v1444_v35  ;;  %v1542_v32 = vld [vmem:[%s7565_s16 + $0x1d30] sm:$0xff]  ;;  %v1557_v34 = vld [vmem:[%s7565_s16 + $0x1da8] sm:$0xff] }
 0x283   : > { %6274 = vmatpush3.msra.mxu1 %v1476_v36  ;;  %6240 = vmatprep.subr.mxu0 %v1459_v37  ;;  %v1509_v35 = vld [vmem:[%s7565_s16 + $0x1c28] sm:$0xff]  ;;  %v1524_v37 = vld [vmem:[%s7565_s16 + $0x1ca0] sm:$0xff] }
 0x284   : > { %6275 = vmatprep.subr.mxu1 %v1491_v38  ;;  %6241 = vmatpush3.msra.mxu0 %v1443_v39  ;;  %v1541_v36 = vld [vmem:[%s7565_s16 + $0x1d28] sm:$0xff]  ;;  %v1556_v38 = vld [vmem:[%s7565_s16 + $0x1da0] sm:$0xff] }
 0x285   : > { %6276 = vmatpush3.msra.mxu1 %v1475_v40  ;;  %6242 = vmatprep.subr.mxu0 %v1458_v41  ;;  %v1508_v39 = vld [vmem:[%s7565_s16 + $0x1c20] sm:$0xff]  ;;  %v1523_v41 = vld [vmem:[%s7565_s16 + $0x1c98] sm:$0xff] }
 0x286   : > { %6277 = vmatprep.subr.mxu1 %v1490_v42  ;;  %6243 = vmatpush3.msra.mxu0 %v1442_v43  ;;  %v1540_v40 = vld [vmem:[%s7565_s16 + $0x1d20] sm:$0xff]  ;;  %v1555_v42 = vld [vmem:[%s7565_s16 + $0x1d98] sm:$0xff] }
 0x287   : > { %6278 = vmatpush3.msra.mxu1 %v1474_v44  ;;  %6244 = vmatprep.subr.mxu0 %v1457_v45  ;;  %v1507_v43 = vld [vmem:[%s7565_s16 + $0x1c18] sm:$0xff]  ;;  %v1522_v45 = vld [vmem:[%s7565_s16 + $0x1c90] sm:$0xff] }
 0x288   : > { %6279 = vmatprep.subr.mxu1 %v1489_v46  ;;  %6245 = vmatpush3.msra.mxu0 %v1441_v47  ;;  %v1539_v44 = vld [vmem:[%s7565_s16 + $0x1d18] sm:$0xff]  ;;  %v1554_v46 = vld [vmem:[%s7565_s16 + $0x1d90] sm:$0xff] }
 0x289   : > { %6280 = vmatpush3.msra.mxu1 %v1473_v48  ;;  %6246 = vmatprep.subr.mxu0 %v1456_v49  ;;  %v1506_v47 = vld [vmem:[%s7565_s16 + $0x1c10] sm:$0xff]  ;;  %v1521_v49 = vld [vmem:[%s7565_s16 + $0x1c88] sm:$0xff] }
 0x28a   : > { %6281 = vmatprep.subr.mxu1 %v1488_v50  ;;  %6247 = vmatpush3.msra.mxu0 %v1440_v51  ;;  %v1538_v48 = vld [vmem:[%s7565_s16 + $0x1d10] sm:$0xff]  ;;  %v1553_v50 = vld [vmem:[%s7565_s16 + $0x1d88] sm:$0xff] }
 0x28b   : > { %3836 = vmatprep.mubr.f32.mxu0 %v577_v52  ;;  %6282 = vmatpush3.msra.mxu1 %v1472_v53  ;;  %v1505_v51 = vld [vmem:[%s7565_s16 + $0x1c08] sm:$0xff]  ;;  %v1520_v53 = vld [vmem:[%s7565_s16 + $0x1c80] sm:$0xff] }
 0x28c   : > { %3837 = vmatmul.mubr.f32.vlgmr.msra.gmra.mxu0 %v576_v54  ;;  %3906 = vmatprep.mubr.f32.mxu1 %v579_v55  ;;  %v1537_v52 = vld [vmem:[%s7565_s16 + $0x1d08] sm:$0xff]  ;;  %v1552_v54 = vld [vmem:[%s7565_s16 + $0x1d80] sm:$0xff] }
 0x28d   : > { %6286 = vmatprep.subr.mxu0 %v1535_v56  ;;  %6321 = vmatprep.subr.mxu1 %v1567_v57  ;;  %v1504_v55 = vld [vmem:[%s7565_s16 + $0x1c00] sm:$0xff] }
 0x28e   : > { %3907 = vmatmul.mubr.f32.vlgmr.msra.gmra.mxu1 %v578_v58  ;;  %6287 = vmatpush3.msra.mxu0 %v1519_v59  ;;  %v581_v56 = vld [vmem:[%s7591_s29 + $0x1c8] sm:$0xff]  ;;  %v580_v58 = vld [vmem:[%s7591_s29 + $0x1c0] sm:$0xff]  ;;  %v583_v59 = vld [vmem:[%s7591_s29 + $0x1d8] sm:$0xff] }
 0x28f   : > { %6322 = vmatpush3.msra.mxu1 %v1551_v60  ;;  %6288 = vmatprep.subr.mxu0 %v1534_v61  ;;  %v1536_v57 = vld [vmem:[%s7565_s16 + $0x1d00] sm:$0xff]  ;;  %v1599_v60 = vld [vmem:[%s7565_s16 + $0x1ef8] sm:$0xff] }
 0x290   : > { %6323 = vmatprep.subr.mxu1 %v1566_v62  ;;  %6289 = vmatpush3.msra.mxu0 %v1518_v63  ;;  %v1631_v61 = vld [vmem:[%s7565_s16 + $0x1ff8] sm:$0xff]  ;;  %v582_v62 = vld [vmem:[%s7591_s29 + $0x1d0] sm:$0xff] }
 0x291   : > { %6324 = vmatpush3.msra.mxu1 %v1550_v0  ;;  %6290 = vmatprep.subr.mxu0 %v1533_v1  ;;  %v1583_v63 = vld [vmem:[%s7565_s16 + $0x1e78] sm:$0xff]  ;;  %v1598_v1 = vld [vmem:[%s7565_s16 + $0x1ef0] sm:$0xff] }
 0x292   : > { %6325 = vmatprep.subr.mxu1 %v1565_v2  ;;  %6291 = vmatpush3.msra.mxu0 %v1517_v3  ;;  %v1615_v0 = vld [vmem:[%s7565_s16 + $0x1f78] sm:$0xff]  ;;  %v1630_v2 = vld [vmem:[%s7565_s16 + $0x1ff0] sm:$0xff] }
 0x293   : > { %6326 = vmatpush3.msra.mxu1 %v1549_v4  ;;  %6292 = vmatprep.subr.mxu0 %v1532_v5  ;;  %v1582_v3 = vld [vmem:[%s7565_s16 + $0x1e70] sm:$0xff]  ;;  %v1597_v5 = vld [vmem:[%s7565_s16 + $0x1ee8] sm:$0xff] }
 0x294   : > { %6327 = vmatprep.subr.mxu1 %v1564_v6  ;;  %6293 = vmatpush3.msra.mxu0 %v1516_v7  ;;  %v1614_v4 = vld [vmem:[%s7565_s16 + $0x1f70] sm:$0xff]  ;;  %v1629_v6 = vld [vmem:[%s7565_s16 + $0x1fe8] sm:$0xff] }
 0x295   : > { %6328 = vmatpush3.msra.mxu1 %v1548_v8  ;;  %6294 = vmatprep.subr.mxu0 %v1531_v9  ;;  %v1581_v7 = vld [vmem:[%s7565_s16 + $0x1e68] sm:$0xff]  ;;  %v1596_v9 = vld [vmem:[%s7565_s16 + $0x1ee0] sm:$0xff] }
 0x296   : > { %6329 = vmatprep.subr.mxu1 %v1563_v10  ;;  %6295 = vmatpush3.msra.mxu0 %v1515_v11  ;;  %v1613_v8 = vld [vmem:[%s7565_s16 + $0x1f68] sm:$0xff]  ;;  %v1628_v10 = vld [vmem:[%s7565_s16 + $0x1fe0] sm:$0xff] }
 0x297   : > { %6330 = vmatpush3.msra.mxu1 %v1547_v12  ;;  %6296 = vmatprep.subr.mxu0 %v1530_v13  ;;  %v1580_v11 = vld [vmem:[%s7565_s16 + $0x1e60] sm:$0xff]  ;;  %v1595_v13 = vld [vmem:[%s7565_s16 + $0x1ed8] sm:$0xff] }
 0x298   : > { %6331 = vmatprep.subr.mxu1 %v1562_v14  ;;  %6297 = vmatpush3.msra.mxu0 %v1514_v15  ;;  %v1612_v12 = vld [vmem:[%s7565_s16 + $0x1f60] sm:$0xff]  ;;  %v1627_v14 = vld [vmem:[%s7565_s16 + $0x1fd8] sm:$0xff] }
 0x299   : > { %6332 = vmatpush3.msra.mxu1 %v1546_v16  ;;  %6298 = vmatprep.subr.mxu0 %v1529_v17  ;;  %v1579_v15 = vld [vmem:[%s7565_s16 + $0x1e58] sm:$0xff]  ;;  %v1594_v17 = vld [vmem:[%s7565_s16 + $0x1ed0] sm:$0xff] }
 0x29a   : > { %6333 = vmatprep.subr.mxu1 %v1561_v18  ;;  %6299 = vmatpush3.msra.mxu0 %v1513_v19  ;;  %v1611_v16 = vld [vmem:[%s7565_s16 + $0x1f58] sm:$0xff]  ;;  %v1626_v18 = vld [vmem:[%s7565_s16 + $0x1fd0] sm:$0xff] }
 0x29b   : > { %6334 = vmatpush3.msra.mxu1 %v1545_v20  ;;  %6300 = vmatprep.subr.mxu0 %v1528_v21  ;;  %v1578_v19 = vld [vmem:[%s7565_s16 + $0x1e50] sm:$0xff]  ;;  %v1593_v21 = vld [vmem:[%s7565_s16 + $0x1ec8] sm:$0xff] }
 0x29c   : > { %6335 = vmatprep.subr.mxu1 %v1560_v22  ;;  %6301 = vmatpush3.msra.mxu0 %v1512_v23  ;;  %v1610_v20 = vld [vmem:[%s7565_s16 + $0x1f50] sm:$0xff]  ;;  %v1625_v22 = vld [vmem:[%s7565_s16 + $0x1fc8] sm:$0xff] }
 0x29d   : > { %6336 = vmatpush3.msra.mxu1 %v1544_v24  ;;  %6302 = vmatprep.subr.mxu0 %v1527_v25  ;;  %v1577_v23 = vld [vmem:[%s7565_s16 + $0x1e48] sm:$0xff]  ;;  %v1592_v25 = vld [vmem:[%s7565_s16 + $0x1ec0] sm:$0xff] }
 0x29e   : > { %6337 = vmatprep.subr.mxu1 %v1559_v26  ;;  %6303 = vmatpush3.msra.mxu0 %v1511_v27  ;;  %v1609_v24 = vld [vmem:[%s7565_s16 + $0x1f48] sm:$0xff]  ;;  %v1624_v26 = vld [vmem:[%s7565_s16 + $0x1fc0] sm:$0xff] }
 0x29f   : > { %6338 = vmatpush3.msra.mxu1 %v1543_v28  ;;  %6304 = vmatprep.subr.mxu0 %v1526_v29  ;;  %v1576_v27 = vld [vmem:[%s7565_s16 + $0x1e40] sm:$0xff]  ;;  %v1591_v29 = vld [vmem:[%s7565_s16 + $0x1eb8] sm:$0xff] }
 0x2a0   : > { %6339 = vmatprep.subr.mxu1 %v1558_v30  ;;  %6305 = vmatpush3.msra.mxu0 %v1510_v31  ;;  %v1608_v28 = vld [vmem:[%s7565_s16 + $0x1f40] sm:$0xff]  ;;  %v1623_v30 = vld [vmem:[%s7565_s16 + $0x1fb8] sm:$0xff] }
 0x2a1   : > { %6340 = vmatpush3.msra.mxu1 %v1542_v32  ;;  %6306 = vmatprep.subr.mxu0 %v1525_v33  ;;  %v1575_v31 = vld [vmem:[%s7565_s16 + $0x1e38] sm:$0xff]  ;;  %v1590_v33 = vld [vmem:[%s7565_s16 + $0x1eb0] sm:$0xff] }
 0x2a2   : > { %6341 = vmatprep.subr.mxu1 %v1557_v34  ;;  %6307 = vmatpush3.msra.mxu0 %v1509_v35  ;;  %v1607_v32 = vld [vmem:[%s7565_s16 + $0x1f38] sm:$0xff]  ;;  %v1622_v34 = vld [vmem:[%s7565_s16 + $0x1fb0] sm:$0xff] }
 0x2a3   : > { %6342 = vmatpush3.msra.mxu1 %v1541_v36  ;;  %6308 = vmatprep.subr.mxu0 %v1524_v37  ;;  %v1574_v35 = vld [vmem:[%s7565_s16 + $0x1e30] sm:$0xff]  ;;  %v1589_v37 = vld [vmem:[%s7565_s16 + $0x1ea8] sm:$0xff] }
 0x2a4   : > { %6343 = vmatprep.subr.mxu1 %v1556_v38  ;;  %6309 = vmatpush3.msra.mxu0 %v1508_v39  ;;  %v1606_v36 = vld [vmem:[%s7565_s16 + $0x1f30] sm:$0xff]  ;;  %v1621_v38 = vld [vmem:[%s7565_s16 + $0x1fa8] sm:$0xff] }
 0x2a5   : > { %6344 = vmatpush3.msra.mxu1 %v1540_v40  ;;  %6310 = vmatprep.subr.mxu0 %v1523_v41  ;;  %v1573_v39 = vld [vmem:[%s7565_s16 + $0x1e28] sm:$0xff]  ;;  %v1588_v41 = vld [vmem:[%s7565_s16 + $0x1ea0] sm:$0xff] }
 0x2a6   : > { %6345 = vmatprep.subr.mxu1 %v1555_v42  ;;  %6311 = vmatpush3.msra.mxu0 %v1507_v43  ;;  %v1605_v40 = vld [vmem:[%s7565_s16 + $0x1f28] sm:$0xff]  ;;  %v1620_v42 = vld [vmem:[%s7565_s16 + $0x1fa0] sm:$0xff] }
 0x2a7   : > { %6346 = vmatpush3.msra.mxu1 %v1539_v44  ;;  %6312 = vmatprep.subr.mxu0 %v1522_v45  ;;  %v1572_v43 = vld [vmem:[%s7565_s16 + $0x1e20] sm:$0xff]  ;;  %v1587_v45 = vld [vmem:[%s7565_s16 + $0x1e98] sm:$0xff] }
 0x2a8   : > { %6347 = vmatprep.subr.mxu1 %v1554_v46  ;;  %6313 = vmatpush3.msra.mxu0 %v1506_v47  ;;  %v1604_v44 = vld [vmem:[%s7565_s16 + $0x1f20] sm:$0xff]  ;;  %v1619_v46 = vld [vmem:[%s7565_s16 + $0x1f98] sm:$0xff] }
 0x2a9   : > { %6348 = vmatpush3.msra.mxu1 %v1538_v48  ;;  %6314 = vmatprep.subr.mxu0 %v1521_v49  ;;  %v1571_v47 = vld [vmem:[%s7565_s16 + $0x1e18] sm:$0xff]  ;;  %v1586_v49 = vld [vmem:[%s7565_s16 + $0x1e90] sm:$0xff] }
 0x2aa   : > { %6349 = vmatprep.subr.mxu1 %v1553_v50  ;;  %6315 = vmatpush3.msra.mxu0 %v1505_v51  ;;  %v1603_v48 = vld [vmem:[%s7565_s16 + $0x1f18] sm:$0xff]  ;;  %v1618_v50 = vld [vmem:[%s7565_s16 + $0x1f90] sm:$0xff] }
 0x2ab   : > { %6350 = vmatpush3.msra.mxu1 %v1537_v52  ;;  %6316 = vmatprep.subr.mxu0 %v1520_v53  ;;  %v1570_v51 = vld [vmem:[%s7565_s16 + $0x1e10] sm:$0xff]  ;;  %v1585_v53 = vld [vmem:[%s7565_s16 + $0x1e88] sm:$0xff] }
 0x2ac   : > { %6351 = vmatprep.subr.mxu1 %v1552_v54  ;;  %6317 = vmatpush3.msra.mxu0 %v1504_v55  ;;  %v1602_v52 = vld [vmem:[%s7565_s16 + $0x1f10] sm:$0xff]  ;;  %v1617_v54 = vld [vmem:[%s7565_s16 + $0x1f88] sm:$0xff] }
 0x2ad   : > { %3976 = vmatprep.mubr.f32.mxu0 %v581_v56  ;;  %6352 = vmatpush3.msra.mxu1 %v1536_v57  ;;  %v1569_v55 = vld [vmem:[%s7565_s16 + $0x1e08] sm:$0xff]  ;;  %v1584_v57 = vld [vmem:[%s7565_s16 + $0x1e80] sm:$0xff] }
 0x2ae   : > { %3977 = vmatmul.mubr.f32.vlgmr.msra.gmra.mxu0 %v580_v58  ;;  %4046 = vmatprep.mubr.f32.mxu1 %v583_v59  ;;  %v1601_v56 = vld [vmem:[%s7565_s16 + $0x1f08] sm:$0xff]  ;;  %v1616_v58 = vld [vmem:[%s7565_s16 + $0x1f80] sm:$0xff] }
 0x2af   : > { %6356 = vmatprep.subr.mxu0 %v1599_v60  ;;  %6391 = vmatprep.subr.mxu1 %v1631_v61  ;;  %v1568_v59 = vld [vmem:[%s7565_s16 + $0x1e00] sm:$0xff] }
 0x2b0   : > { %4047 = vmatmul.mubr.f32.vlgmr.msra.gmra.mxu1 %v582_v62  ;;  %6357 = vmatpush3.msra.mxu0 %v1583_v63  ;;  %v585_v60 = vld [vmem:[%s7591_s29 + $0x1e8] sm:$0xff]  ;;  %v584_v62 = vld [vmem:[%s7591_s29 + $0x1e0] sm:$0xff]  ;;  %v587_v63 = vld [vmem:[%s7591_s29 + $0x1f8] sm:$0xff] }
 0x2b1   : > { %6392 = vmatpush3.msra.mxu1 %v1615_v0  ;;  %6358 = vmatprep.subr.mxu0 %v1598_v1  ;;  %v1600_v61 = vld [vmem:[%s7565_s16 + $0x1f00] sm:$0xff]  ;;  %v1663_v0 = vld [vmem:[%s7565_s16 + $0x20f8] sm:$0xff] }
 0x2b2   : > { %6393 = vmatprep.subr.mxu1 %v1630_v2  ;;  %6359 = vmatpush3.msra.mxu0 %v1582_v3  ;;  %v1695_v1 = vld [vmem:[%s7565_s16 + $0x21f8] sm:$0xff]  ;;  %v586_v2 = vld [vmem:[%s7591_s29 + $0x1f0] sm:$0xff] }
 0x2b3   : > { %6394 = vmatpush3.msra.mxu1 %v1614_v4  ;;  %6360 = vmatprep.subr.mxu0 %v1597_v5  ;;  %v1647_v3 = vld [vmem:[%s7565_s16 + $0x2078] sm:$0xff]  ;;  %v1662_v5 = vld [vmem:[%s7565_s16 + $0x20f0] sm:$0xff] }
 0x2b4   : > { %6395 = vmatprep.subr.mxu1 %v1629_v6  ;;  %6361 = vmatpush3.msra.mxu0 %v1581_v7  ;;  %v1679_v4 = vld [vmem:[%s7565_s16 + $0x2178] sm:$0xff]  ;;  %v1694_v6 = vld [vmem:[%s7565_s16 + $0x21f0] sm:$0xff] }
 0x2b5   : > { %6396 = vmatpush3.msra.mxu1 %v1613_v8  ;;  %6362 = vmatprep.subr.mxu0 %v1596_v9  ;;  %v1646_v7 = vld [vmem:[%s7565_s16 + $0x2070] sm:$0xff]  ;;  %v1661_v9 = vld [vmem:[%s7565_s16 + $0x20e8] sm:$0xff] }
 0x2b6   : > { %6397 = vmatprep.subr.mxu1 %v1628_v10  ;;  %6363 = vmatpush3.msra.mxu0 %v1580_v11  ;;  %v1678_v8 = vld [vmem:[%s7565_s16 + $0x2170] sm:$0xff]  ;;  %v1693_v10 = vld [vmem:[%s7565_s16 + $0x21e8] sm:$0xff] }
 0x2b7   : > { %6398 = vmatpush3.msra.mxu1 %v1612_v12  ;;  %6364 = vmatprep.subr.mxu0 %v1595_v13  ;;  %v1645_v11 = vld [vmem:[%s7565_s16 + $0x2068] sm:$0xff]  ;;  %v1660_v13 = vld [vmem:[%s7565_s16 + $0x20e0] sm:$0xff] }
 0x2b8   : > { %6399 = vmatprep.subr.mxu1 %v1627_v14  ;;  %6365 = vmatpush3.msra.mxu0 %v1579_v15  ;;  %v1677_v12 = vld [vmem:[%s7565_s16 + $0x2168] sm:$0xff]  ;;  %v1692_v14 = vld [vmem:[%s7565_s16 + $0x21e0] sm:$0xff] }
 0x2b9   : > { %6400 = vmatpush3.msra.mxu1 %v1611_v16  ;;  %6366 = vmatprep.subr.mxu0 %v1594_v17  ;;  %v1644_v15 = vld [vmem:[%s7565_s16 + $0x2060] sm:$0xff]  ;;  %v1659_v17 = vld [vmem:[%s7565_s16 + $0x20d8] sm:$0xff] }
 0x2ba   : > { %6401 = vmatprep.subr.mxu1 %v1626_v18  ;;  %6367 = vmatpush3.msra.mxu0 %v1578_v19  ;;  %v1676_v16 = vld [vmem:[%s7565_s16 + $0x2160] sm:$0xff]  ;;  %v1691_v18 = vld [vmem:[%s7565_s16 + $0x21d8] sm:$0xff] }
 0x2bb   : > { %6402 = vmatpush3.msra.mxu1 %v1610_v20  ;;  %6368 = vmatprep.subr.mxu0 %v1593_v21  ;;  %v1643_v19 = vld [vmem:[%s7565_s16 + $0x2058] sm:$0xff]  ;;  %v1658_v21 = vld [vmem:[%s7565_s16 + $0x20d0] sm:$0xff] }
 0x2bc   : > { %6403 = vmatprep.subr.mxu1 %v1625_v22  ;;  %6369 = vmatpush3.msra.mxu0 %v1577_v23  ;;  %v1675_v20 = vld [vmem:[%s7565_s16 + $0x2158] sm:$0xff]  ;;  %v1690_v22 = vld [vmem:[%s7565_s16 + $0x21d0] sm:$0xff] }
 0x2bd   : > { %6404 = vmatpush3.msra.mxu1 %v1609_v24  ;;  %6370 = vmatprep.subr.mxu0 %v1592_v25  ;;  %v1642_v23 = vld [vmem:[%s7565_s16 + $0x2050] sm:$0xff]  ;;  %v1657_v25 = vld [vmem:[%s7565_s16 + $0x20c8] sm:$0xff] }
 0x2be   : > { %6405 = vmatprep.subr.mxu1 %v1624_v26  ;;  %6371 = vmatpush3.msra.mxu0 %v1576_v27  ;;  %v1674_v24 = vld [vmem:[%s7565_s16 + $0x2150] sm:$0xff]  ;;  %v1689_v26 = vld [vmem:[%s7565_s16 + $0x21c8] sm:$0xff] }
 0x2bf   : > { %6406 = vmatpush3.msra.mxu1 %v1608_v28  ;;  %6372 = vmatprep.subr.mxu0 %v1591_v29  ;;  %v1641_v27 = vld [vmem:[%s7565_s16 + $0x2048] sm:$0xff]  ;;  %v1656_v29 = vld [vmem:[%s7565_s16 + $0x20c0] sm:$0xff] }
 0x2c0   : > { %6407 = vmatprep.subr.mxu1 %v1623_v30  ;;  %6373 = vmatpush3.msra.mxu0 %v1575_v31  ;;  %v1673_v28 = vld [vmem:[%s7565_s16 + $0x2148] sm:$0xff]  ;;  %v1688_v30 = vld [vmem:[%s7565_s16 + $0x21c0] sm:$0xff] }
 0x2c1   : > { %6408 = vmatpush3.msra.mxu1 %v1607_v32  ;;  %6374 = vmatprep.subr.mxu0 %v1590_v33  ;;  %v1640_v31 = vld [vmem:[%s7565_s16 + $0x2040] sm:$0xff]  ;;  %v1655_v33 = vld [vmem:[%s7565_s16 + $0x20b8] sm:$0xff] }
 0x2c2   : > { %6409 = vmatprep.subr.mxu1 %v1622_v34  ;;  %6375 = vmatpush3.msra.mxu0 %v1574_v35  ;;  %v1672_v32 = vld [vmem:[%s7565_s16 + $0x2140] sm:$0xff]  ;;  %v1687_v34 = vld [vmem:[%s7565_s16 + $0x21b8] sm:$0xff] }
 0x2c3   : > { %6410 = vmatpush3.msra.mxu1 %v1606_v36  ;;  %6376 = vmatprep.subr.mxu0 %v1589_v37  ;;  %v1639_v35 = vld [vmem:[%s7565_s16 + $0x2038] sm:$0xff]  ;;  %v1654_v37 = vld [vmem:[%s7565_s16 + $0x20b0] sm:$0xff] }
 0x2c4   : > { %6411 = vmatprep.subr.mxu1 %v1621_v38  ;;  %6377 = vmatpush3.msra.mxu0 %v1573_v39  ;;  %v1671_v36 = vld [vmem:[%s7565_s16 + $0x2138] sm:$0xff]  ;;  %v1686_v38 = vld [vmem:[%s7565_s16 + $0x21b0] sm:$0xff] }
 0x2c5   : > { %6412 = vmatpush3.msra.mxu1 %v1605_v40  ;;  %6378 = vmatprep.subr.mxu0 %v1588_v41  ;;  %v1638_v39 = vld [vmem:[%s7565_s16 + $0x2030] sm:$0xff]  ;;  %v1653_v41 = vld [vmem:[%s7565_s16 + $0x20a8] sm:$0xff] }
 0x2c6   : > { %6413 = vmatprep.subr.mxu1 %v1620_v42  ;;  %6379 = vmatpush3.msra.mxu0 %v1572_v43  ;;  %v1670_v40 = vld [vmem:[%s7565_s16 + $0x2130] sm:$0xff]  ;;  %v1685_v42 = vld [vmem:[%s7565_s16 + $0x21a8] sm:$0xff] }
 0x2c7   : > { %6414 = vmatpush3.msra.mxu1 %v1604_v44  ;;  %6380 = vmatprep.subr.mxu0 %v1587_v45  ;;  %v1637_v43 = vld [vmem:[%s7565_s16 + $0x2028] sm:$0xff]  ;;  %v1652_v45 = vld [vmem:[%s7565_s16 + $0x20a0] sm:$0xff] }
 0x2c8   : > { %6415 = vmatprep.subr.mxu1 %v1619_v46  ;;  %6381 = vmatpush3.msra.mxu0 %v1571_v47  ;;  %v1669_v44 = vld [vmem:[%s7565_s16 + $0x2128] sm:$0xff]  ;;  %v1684_v46 = vld [vmem:[%s7565_s16 + $0x21a0] sm:$0xff] }
 0x2c9   : > { %6416 = vmatpush3.msra.mxu1 %v1603_v48  ;;  %6382 = vmatprep.subr.mxu0 %v1586_v49  ;;  %v1636_v47 = vld [vmem:[%s7565_s16 + $0x2020] sm:$0xff]  ;;  %v1651_v49 = vld [vmem:[%s7565_s16 + $0x2098] sm:$0xff] }
 0x2ca   : > { %6417 = vmatprep.subr.mxu1 %v1618_v50  ;;  %6383 = vmatpush3.msra.mxu0 %v1570_v51  ;;  %v1668_v48 = vld [vmem:[%s7565_s16 + $0x2120] sm:$0xff]  ;;  %v1683_v50 = vld [vmem:[%s7565_s16 + $0x2198] sm:$0xff] }
 0x2cb   : > { %6418 = vmatpush3.msra.mxu1 %v1602_v52  ;;  %6384 = vmatprep.subr.mxu0 %v1585_v53  ;;  %v1635_v51 = vld [vmem:[%s7565_s16 + $0x2018] sm:$0xff]  ;;  %v1650_v53 = vld [vmem:[%s7565_s16 + $0x2090] sm:$0xff] }
 0x2cc   : > { %6419 = vmatprep.subr.mxu1 %v1617_v54  ;;  %6385 = vmatpush3.msra.mxu0 %v1569_v55  ;;  %v1667_v52 = vld [vmem:[%s7565_s16 + $0x2118] sm:$0xff]  ;;  %v1682_v54 = vld [vmem:[%s7565_s16 + $0x2190] sm:$0xff] }
 0x2cd   : > { %6420 = vmatpush3.msra.mxu1 %v1601_v56  ;;  %6386 = vmatprep.subr.mxu0 %v1584_v57  ;;  %v1634_v55 = vld [vmem:[%s7565_s16 + $0x2010] sm:$0xff]  ;;  %v1649_v57 = vld [vmem:[%s7565_s16 + $0x2088] sm:$0xff] }
 0x2ce   : > { %6421 = vmatprep.subr.mxu1 %v1616_v58  ;;  %6387 = vmatpush3.msra.mxu0 %v1568_v59  ;;  %v1666_v56 = vld [vmem:[%s7565_s16 + $0x2110] sm:$0xff]  ;;  %v1681_v58 = vld [vmem:[%s7565_s16 + $0x2188] sm:$0xff] }
 0x2cf   : > { %4116 = vmatprep.mubr.f32.mxu0 %v585_v60  ;;  %6422 = vmatpush3.msra.mxu1 %v1600_v61  ;;  %v1633_v59 = vld [vmem:[%s7565_s16 + $0x2008] sm:$0xff]  ;;  %v1648_v61 = vld [vmem:[%s7565_s16 + $0x2080] sm:$0xff] }
 0x2d0   : > { %4117 = vmatmul.mubr.f32.vlgmr.msra.gmra.mxu0 %v584_v62  ;;  %4186 = vmatprep.mubr.f32.mxu1 %v587_v63  ;;  %v1665_v60 = vld [vmem:[%s7565_s16 + $0x2108] sm:$0xff]  ;;  %v1680_v62 = vld [vmem:[%s7565_s16 + $0x2180] sm:$0xff] }
 0x2d1   : > { %6426 = vmatprep.subr.mxu0 %v1663_v0  ;;  %6461 = vmatprep.subr.mxu1 %v1695_v1  ;;  %v1632_v63 = vld [vmem:[%s7565_s16 + $0x2000] sm:$0xff] }
 0x2d2   : > { %4187 = vmatmul.mubr.f32.vlgmr.msra.gmra.mxu1 %v586_v2  ;;  %6427 = vmatpush3.msra.mxu0 %v1647_v3  ;;  %v589_v0 = vld [vmem:[%s7591_s29 + $0x208] sm:$0xff]  ;;  %v588_v2 = vld [vmem:[%s7591_s29 + $0x200] sm:$0xff]  ;;  %v591_v3 = vld [vmem:[%s7591_s29 + $0x218] sm:$0xff] }
 0x2d3   : > { %6462 = vmatpush3.msra.mxu1 %v1679_v4  ;;  %6428 = vmatprep.subr.mxu0 %v1662_v5  ;;  %v1664_v1 = vld [vmem:[%s7565_s16 + $0x2100] sm:$0xff]  ;;  %v1727_v4 = vld [vmem:[%s7565_s16 + $0x22f8] sm:$0xff] }
 0x2d4   : > { %6463 = vmatprep.subr.mxu1 %v1694_v6  ;;  %6429 = vmatpush3.msra.mxu0 %v1646_v7  ;;  %v1759_v5 = vld [vmem:[%s7565_s16 + $0x23f8] sm:$0xff]  ;;  %v590_v6 = vld [vmem:[%s7591_s29 + $0x210] sm:$0xff] }
 0x2d5   : > { %6464 = vmatpush3.msra.mxu1 %v1678_v8  ;;  %6430 = vmatprep.subr.mxu0 %v1661_v9  ;;  %v1711_v7 = vld [vmem:[%s7565_s16 + $0x2278] sm:$0xff]  ;;  %v1726_v9 = vld [vmem:[%s7565_s16 + $0x22f0] sm:$0xff] }
 0x2d6   : > { %6465 = vmatprep.subr.mxu1 %v1693_v10  ;;  %6431 = vmatpush3.msra.mxu0 %v1645_v11  ;;  %v1743_v8 = vld [vmem:[%s7565_s16 + $0x2378] sm:$0xff]  ;;  %v1758_v10 = vld [vmem:[%s7565_s16 + $0x23f0] sm:$0xff] }
 0x2d7   : > { %6466 = vmatpush3.msra.mxu1 %v1677_v12  ;;  %6432 = vmatprep.subr.mxu0 %v1660_v13  ;;  %v1710_v11 = vld [vmem:[%s7565_s16 + $0x2270] sm:$0xff]  ;;  %v1725_v13 = vld [vmem:[%s7565_s16 + $0x22e8] sm:$0xff] }
 0x2d8   : > { %6467 = vmatprep.subr.mxu1 %v1692_v14  ;;  %6433 = vmatpush3.msra.mxu0 %v1644_v15  ;;  %v1742_v12 = vld [vmem:[%s7565_s16 + $0x2370] sm:$0xff]  ;;  %v1757_v14 = vld [vmem:[%s7565_s16 + $0x23e8] sm:$0xff] }
 0x2d9   : > { %6468 = vmatpush3.msra.mxu1 %v1676_v16  ;;  %6434 = vmatprep.subr.mxu0 %v1659_v17  ;;  %v1709_v15 = vld [vmem:[%s7565_s16 + $0x2268] sm:$0xff]  ;;  %v1724_v17 = vld [vmem:[%s7565_s16 + $0x22e0] sm:$0xff] }
 0x2da   : > { %6469 = vmatprep.subr.mxu1 %v1691_v18  ;;  %6435 = vmatpush3.msra.mxu0 %v1643_v19  ;;  %v1741_v16 = vld [vmem:[%s7565_s16 + $0x2368] sm:$0xff]  ;;  %v1756_v18 = vld [vmem:[%s7565_s16 + $0x23e0] sm:$0xff] }
 0x2db   : > { %6470 = vmatpush3.msra.mxu1 %v1675_v20  ;;  %6436 = vmatprep.subr.mxu0 %v1658_v21  ;;  %v1708_v19 = vld [vmem:[%s7565_s16 + $0x2260] sm:$0xff]  ;;  %v1723_v21 = vld [vmem:[%s7565_s16 + $0x22d8] sm:$0xff] }
 0x2dc   : > { %6471 = vmatprep.subr.mxu1 %v1690_v22  ;;  %6437 = vmatpush3.msra.mxu0 %v1642_v23  ;;  %v1740_v20 = vld [vmem:[%s7565_s16 + $0x2360] sm:$0xff]  ;;  %v1755_v22 = vld [vmem:[%s7565_s16 + $0x23d8] sm:$0xff] }
 0x2dd   : > { %6472 = vmatpush3.msra.mxu1 %v1674_v24  ;;  %6438 = vmatprep.subr.mxu0 %v1657_v25  ;;  %v1707_v23 = vld [vmem:[%s7565_s16 + $0x2258] sm:$0xff]  ;;  %v1722_v25 = vld [vmem:[%s7565_s16 + $0x22d0] sm:$0xff] }
 0x2de   : > { %6473 = vmatprep.subr.mxu1 %v1689_v26  ;;  %6439 = vmatpush3.msra.mxu0 %v1641_v27  ;;  %v1739_v24 = vld [vmem:[%s7565_s16 + $0x2358] sm:$0xff]  ;;  %v1754_v26 = vld [vmem:[%s7565_s16 + $0x23d0] sm:$0xff] }
 0x2df   : > { %6474 = vmatpush3.msra.mxu1 %v1673_v28  ;;  %6440 = vmatprep.subr.mxu0 %v1656_v29  ;;  %v1706_v27 = vld [vmem:[%s7565_s16 + $0x2250] sm:$0xff]  ;;  %v1721_v29 = vld [vmem:[%s7565_s16 + $0x22c8] sm:$0xff] }
 0x2e0   : > { %6475 = vmatprep.subr.mxu1 %v1688_v30  ;;  %6441 = vmatpush3.msra.mxu0 %v1640_v31  ;;  %v1738_v28 = vld [vmem:[%s7565_s16 + $0x2350] sm:$0xff]  ;;  %v1753_v30 = vld [vmem:[%s7565_s16 + $0x23c8] sm:$0xff] }
 0x2e1   : > { %6476 = vmatpush3.msra.mxu1 %v1672_v32  ;;  %6442 = vmatprep.subr.mxu0 %v1655_v33  ;;  %v1705_v31 = vld [vmem:[%s7565_s16 + $0x2248] sm:$0xff]  ;;  %v1720_v33 = vld [vmem:[%s7565_s16 + $0x22c0] sm:$0xff] }
 0x2e2   : > { %6477 = vmatprep.subr.mxu1 %v1687_v34  ;;  %6443 = vmatpush3.msra.mxu0 %v1639_v35  ;;  %v1737_v32 = vld [vmem:[%s7565_s16 + $0x2348] sm:$0xff]  ;;  %v1752_v34 = vld [vmem:[%s7565_s16 + $0x23c0] sm:$0xff] }
 0x2e3   : > { %6478 = vmatpush3.msra.mxu1 %v1671_v36  ;;  %6444 = vmatprep.subr.mxu0 %v1654_v37  ;;  %v1704_v35 = vld [vmem:[%s7565_s16 + $0x2240] sm:$0xff]  ;;  %v1719_v37 = vld [vmem:[%s7565_s16 + $0x22b8] sm:$0xff] }
 0x2e4   : > { %6479 = vmatprep.subr.mxu1 %v1686_v38  ;;  %6445 = vmatpush3.msra.mxu0 %v1638_v39  ;;  %v1736_v36 = vld [vmem:[%s7565_s16 + $0x2340] sm:$0xff]  ;;  %v1751_v38 = vld [vmem:[%s7565_s16 + $0x23b8] sm:$0xff] }
 0x2e5   : > { %6480 = vmatpush3.msra.mxu1 %v1670_v40  ;;  %6446 = vmatprep.subr.mxu0 %v1653_v41  ;;  %v1703_v39 = vld [vmem:[%s7565_s16 + $0x2238] sm:$0xff]  ;;  %v1718_v41 = vld [vmem:[%s7565_s16 + $0x22b0] sm:$0xff] }
 0x2e6   : > { %6481 = vmatprep.subr.mxu1 %v1685_v42  ;;  %6447 = vmatpush3.msra.mxu0 %v1637_v43  ;;  %v1735_v40 = vld [vmem:[%s7565_s16 + $0x2338] sm:$0xff]  ;;  %v1750_v42 = vld [vmem:[%s7565_s16 + $0x23b0] sm:$0xff] }
 0x2e7   : > { %6482 = vmatpush3.msra.mxu1 %v1669_v44  ;;  %6448 = vmatprep.subr.mxu0 %v1652_v45  ;;  %v1702_v43 = vld [vmem:[%s7565_s16 + $0x2230] sm:$0xff]  ;;  %v1717_v45 = vld [vmem:[%s7565_s16 + $0x22a8] sm:$0xff] }
 0x2e8   : > { %6483 = vmatprep.subr.mxu1 %v1684_v46  ;;  %6449 = vmatpush3.msra.mxu0 %v1636_v47  ;;  %v1734_v44 = vld [vmem:[%s7565_s16 + $0x2330] sm:$0xff]  ;;  %v1749_v46 = vld [vmem:[%s7565_s16 + $0x23a8] sm:$0xff] }
 0x2e9   : > { %6484 = vmatpush3.msra.mxu1 %v1668_v48  ;;  %6450 = vmatprep.subr.mxu0 %v1651_v49  ;;  %v1701_v47 = vld [vmem:[%s7565_s16 + $0x2228] sm:$0xff]  ;;  %v1716_v49 = vld [vmem:[%s7565_s16 + $0x22a0] sm:$0xff] }
 0x2ea   : > { %6485 = vmatprep.subr.mxu1 %v1683_v50  ;;  %6451 = vmatpush3.msra.mxu0 %v1635_v51  ;;  %v1733_v48 = vld [vmem:[%s7565_s16 + $0x2328] sm:$0xff]  ;;  %v1748_v50 = vld [vmem:[%s7565_s16 + $0x23a0] sm:$0xff] }
 0x2eb   : > { %6486 = vmatpush3.msra.mxu1 %v1667_v52  ;;  %6452 = vmatprep.subr.mxu0 %v1650_v53  ;;  %v1700_v51 = vld [vmem:[%s7565_s16 + $0x2220] sm:$0xff]  ;;  %v1715_v53 = vld [vmem:[%s7565_s16 + $0x2298] sm:$0xff] }
 0x2ec   : > { %6487 = vmatprep.subr.mxu1 %v1682_v54  ;;  %6453 = vmatpush3.msra.mxu0 %v1634_v55  ;;  %v1732_v52 = vld [vmem:[%s7565_s16 + $0x2320] sm:$0xff]  ;;  %v1747_v54 = vld [vmem:[%s7565_s16 + $0x2398] sm:$0xff] }
 0x2ed   : > { %6488 = vmatpush3.msra.mxu1 %v1666_v56  ;;  %6454 = vmatprep.subr.mxu0 %v1649_v57  ;;  %v1699_v55 = vld [vmem:[%s7565_s16 + $0x2218] sm:$0xff]  ;;  %v1714_v57 = vld [vmem:[%s7565_s16 + $0x2290] sm:$0xff] }
 0x2ee   : > { %6489 = vmatprep.subr.mxu1 %v1681_v58  ;;  %6455 = vmatpush3.msra.mxu0 %v1633_v59  ;;  %v1731_v56 = vld [vmem:[%s7565_s16 + $0x2318] sm:$0xff]  ;;  %v1746_v58 = vld [vmem:[%s7565_s16 + $0x2390] sm:$0xff] }
 0x2ef   : > { %6490 = vmatpush3.msra.mxu1 %v1665_v60  ;;  %6456 = vmatprep.subr.mxu0 %v1648_v61  ;;  %v1698_v59 = vld [vmem:[%s7565_s16 + $0x2210] sm:$0xff]  ;;  %v1713_v61 = vld [vmem:[%s7565_s16 + $0x2288] sm:$0xff] }
 0x2f0   : > { %6491 = vmatprep.subr.mxu1 %v1680_v62  ;;  %6457 = vmatpush3.msra.mxu0 %v1632_v63  ;;  %v1730_v60 = vld [vmem:[%s7565_s16 + $0x2310] sm:$0xff]  ;;  %v1745_v62 = vld [vmem:[%s7565_s16 + $0x2388] sm:$0xff] }
 0x2f1   : > { %4256 = vmatprep.mubr.f32.mxu0 %v589_v0  ;;  %6492 = vmatpush3.msra.mxu1 %v1664_v1  ;;  %v1697_v63 = vld [vmem:[%s7565_s16 + $0x2208] sm:$0xff]  ;;  %v1712_v1 = vld [vmem:[%s7565_s16 + $0x2280] sm:$0xff] }
 0x2f2   : > { %4257 = vmatmul.mubr.f32.vlgmr.msra.gmra.mxu0 %v588_v2  ;;  %4326 = vmatprep.mubr.f32.mxu1 %v591_v3  ;;  %v1729_v0 = vld [vmem:[%s7565_s16 + $0x2308] sm:$0xff]  ;;  %v1744_v2 = vld [vmem:[%s7565_s16 + $0x2380] sm:$0xff] }
 0x2f3   : > { %6496 = vmatprep.subr.mxu0 %v1727_v4  ;;  %6531 = vmatprep.subr.mxu1 %v1759_v5  ;;  %v1696_v3 = vld [vmem:[%s7565_s16 + $0x2200] sm:$0xff] }
 0x2f4   : > { %4327 = vmatmul.mubr.f32.vlgmr.msra.gmra.mxu1 %v590_v6  ;;  %6497 = vmatpush3.msra.mxu0 %v1711_v7  ;;  %v593_v4 = vld [vmem:[%s7591_s29 + $0x228] sm:$0xff]  ;;  %v592_v6 = vld [vmem:[%s7591_s29 + $0x220] sm:$0xff]  ;;  %v595_v7 = vld [vmem:[%s7591_s29 + $0x238] sm:$0xff] }
 0x2f5   : > { %6532 = vmatpush3.msra.mxu1 %v1743_v8  ;;  %6498 = vmatprep.subr.mxu0 %v1726_v9  ;;  %v1728_v5 = vld [vmem:[%s7565_s16 + $0x2300] sm:$0xff]  ;;  %v1791_v8 = vld [vmem:[%s7565_s16 + $0x24f8] sm:$0xff] }
 0x2f6   : > { %6533 = vmatprep.subr.mxu1 %v1758_v10  ;;  %6499 = vmatpush3.msra.mxu0 %v1710_v11  ;;  %v1823_v9 = vld [vmem:[%s7565_s16 + $0x25f8] sm:$0xff]  ;;  %v594_v10 = vld [vmem:[%s7591_s29 + $0x230] sm:$0xff] }
 0x2f7   : > { %6534 = vmatpush3.msra.mxu1 %v1742_v12  ;;  %6500 = vmatprep.subr.mxu0 %v1725_v13  ;;  %v1775_v11 = vld [vmem:[%s7565_s16 + $0x2478] sm:$0xff]  ;;  %v1790_v13 = vld [vmem:[%s7565_s16 + $0x24f0] sm:$0xff] }
 0x2f8   : > { %6535 = vmatprep.subr.mxu1 %v1757_v14  ;;  %6501 = vmatpush3.msra.mxu0 %v1709_v15  ;;  %v1807_v12 = vld [vmem:[%s7565_s16 + $0x2578] sm:$0xff]  ;;  %v1822_v14 = vld [vmem:[%s7565_s16 + $0x25f0] sm:$0xff] }
 0x2f9   : > { %6536 = vmatpush3.msra.mxu1 %v1741_v16  ;;  %6502 = vmatprep.subr.mxu0 %v1724_v17  ;;  %v1774_v15 = vld [vmem:[%s7565_s16 + $0x2470] sm:$0xff]  ;;  %v1789_v17 = vld [vmem:[%s7565_s16 + $0x24e8] sm:$0xff] }
 0x2fa   : > { %6537 = vmatprep.subr.mxu1 %v1756_v18  ;;  %6503 = vmatpush3.msra.mxu0 %v1708_v19  ;;  %v1806_v16 = vld [vmem:[%s7565_s16 + $0x2570] sm:$0xff]  ;;  %v1821_v18 = vld [vmem:[%s7565_s16 + $0x25e8] sm:$0xff] }
 0x2fb   : > { %6538 = vmatpush3.msra.mxu1 %v1740_v20  ;;  %6504 = vmatprep.subr.mxu0 %v1723_v21  ;;  %v1773_v19 = vld [vmem:[%s7565_s16 + $0x2468] sm:$0xff]  ;;  %v1788_v21 = vld [vmem:[%s7565_s16 + $0x24e0] sm:$0xff] }
 0x2fc   : > { %6539 = vmatprep.subr.mxu1 %v1755_v22  ;;  %6505 = vmatpush3.msra.mxu0 %v1707_v23  ;;  %v1805_v20 = vld [vmem:[%s7565_s16 + $0x2568] sm:$0xff]  ;;  %v1820_v22 = vld [vmem:[%s7565_s16 + $0x25e0] sm:$0xff] }
 0x2fd   : > { %6540 = vmatpush3.msra.mxu1 %v1739_v24  ;;  %6506 = vmatprep.subr.mxu0 %v1722_v25  ;;  %v1772_v23 = vld [vmem:[%s7565_s16 + $0x2460] sm:$0xff]  ;;  %v1787_v25 = vld [vmem:[%s7565_s16 + $0x24d8] sm:$0xff] }
 0x2fe   : > { %6541 = vmatprep.subr.mxu1 %v1754_v26  ;;  %6507 = vmatpush3.msra.mxu0 %v1706_v27  ;;  %v1804_v24 = vld [vmem:[%s7565_s16 + $0x2560] sm:$0xff]  ;;  %v1819_v26 = vld [vmem:[%s7565_s16 + $0x25d8] sm:$0xff] }
 0x2ff   : > { %6542 = vmatpush3.msra.mxu1 %v1738_v28  ;;  %6508 = vmatprep.subr.mxu0 %v1721_v29  ;;  %v1771_v27 = vld [vmem:[%s7565_s16 + $0x2458] sm:$0xff]  ;;  %v1786_v29 = vld [vmem:[%s7565_s16 + $0x24d0] sm:$0xff] }
 0x300   : > { %6543 = vmatprep.subr.mxu1 %v1753_v30  ;;  %6509 = vmatpush3.msra.mxu0 %v1705_v31  ;;  %v1803_v28 = vld [vmem:[%s7565_s16 + $0x2558] sm:$0xff]  ;;  %v1818_v30 = vld [vmem:[%s7565_s16 + $0x25d0] sm:$0xff] }
 0x301   : > { %6544 = vmatpush3.msra.mxu1 %v1737_v32  ;;  %6510 = vmatprep.subr.mxu0 %v1720_v33  ;;  %v1770_v31 = vld [vmem:[%s7565_s16 + $0x2450] sm:$0xff]  ;;  %v1785_v33 = vld [vmem:[%s7565_s16 + $0x24c8] sm:$0xff] }
 0x302   : > { %6545 = vmatprep.subr.mxu1 %v1752_v34  ;;  %6511 = vmatpush3.msra.mxu0 %v1704_v35  ;;  %v1802_v32 = vld [vmem:[%s7565_s16 + $0x2550] sm:$0xff]  ;;  %v1817_v34 = vld [vmem:[%s7565_s16 + $0x25c8] sm:$0xff] }
 0x303   : > { %6546 = vmatpush3.msra.mxu1 %v1736_v36  ;;  %6512 = vmatprep.subr.mxu0 %v1719_v37  ;;  %v1769_v35 = vld [vmem:[%s7565_s16 + $0x2448] sm:$0xff]  ;;  %v1784_v37 = vld [vmem:[%s7565_s16 + $0x24c0] sm:$0xff] }
 0x304   : > { %6547 = vmatprep.subr.mxu1 %v1751_v38  ;;  %6513 = vmatpush3.msra.mxu0 %v1703_v39  ;;  %v1801_v36 = vld [vmem:[%s7565_s16 + $0x2548] sm:$0xff]  ;;  %v1816_v38 = vld [vmem:[%s7565_s16 + $0x25c0] sm:$0xff] }
 0x305   : > { %6548 = vmatpush3.msra.mxu1 %v1735_v40  ;;  %6514 = vmatprep.subr.mxu0 %v1718_v41  ;;  %v1768_v39 = vld [vmem:[%s7565_s16 + $0x2440] sm:$0xff]  ;;  %v1783_v41 = vld [vmem:[%s7565_s16 + $0x24b8] sm:$0xff] }
 0x306   : > { %6549 = vmatprep.subr.mxu1 %v1750_v42  ;;  %6515 = vmatpush3.msra.mxu0 %v1702_v43  ;;  %v1800_v40 = vld [vmem:[%s7565_s16 + $0x2540] sm:$0xff]  ;;  %v1815_v42 = vld [vmem:[%s7565_s16 + $0x25b8] sm:$0xff] }
 0x307   : > { %6550 = vmatpush3.msra.mxu1 %v1734_v44  ;;  %6516 = vmatprep.subr.mxu0 %v1717_v45  ;;  %v1767_v43 = vld [vmem:[%s7565_s16 + $0x2438] sm:$0xff]  ;;  %v1782_v45 = vld [vmem:[%s7565_s16 + $0x24b0] sm:$0xff] }
 0x308   : > { %6551 = vmatprep.subr.mxu1 %v1749_v46  ;;  %6517 = vmatpush3.msra.mxu0 %v1701_v47  ;;  %v1799_v44 = vld [vmem:[%s7565_s16 + $0x2538] sm:$0xff]  ;;  %v1814_v46 = vld [vmem:[%s7565_s16 + $0x25b0] sm:$0xff] }
 0x309   : > { %6552 = vmatpush3.msra.mxu1 %v1733_v48  ;;  %6518 = vmatprep.subr.mxu0 %v1716_v49  ;;  %v1766_v47 = vld [vmem:[%s7565_s16 + $0x2430] sm:$0xff]  ;;  %v1781_v49 = vld [vmem:[%s7565_s16 + $0x24a8] sm:$0xff] }
 0x30a   : > { %6553 = vmatprep.subr.mxu1 %v1748_v50  ;;  %6519 = vmatpush3.msra.mxu0 %v1700_v51  ;;  %v1798_v48 = vld [vmem:[%s7565_s16 + $0x2530] sm:$0xff]  ;;  %v1813_v50 = vld [vmem:[%s7565_s16 + $0x25a8] sm:$0xff] }
 0x30b   : > { %6554 = vmatpush3.msra.mxu1 %v1732_v52  ;;  %6520 = vmatprep.subr.mxu0 %v1715_v53  ;;  %v1765_v51 = vld [vmem:[%s7565_s16 + $0x2428] sm:$0xff]  ;;  %v1780_v53 = vld [vmem:[%s7565_s16 + $0x24a0] sm:$0xff] }
 0x30c   : > { %6555 = vmatprep.subr.mxu1 %v1747_v54  ;;  %6521 = vmatpush3.msra.mxu0 %v1699_v55  ;;  %v1797_v52 = vld [vmem:[%s7565_s16 + $0x2528] sm:$0xff]  ;;  %v1812_v54 = vld [vmem:[%s7565_s16 + $0x25a0] sm:$0xff] }
 0x30d   : > { %6556 = vmatpush3.msra.mxu1 %v1731_v56  ;;  %6522 = vmatprep.subr.mxu0 %v1714_v57  ;;  %v1764_v55 = vld [vmem:[%s7565_s16 + $0x2420] sm:$0xff]  ;;  %v1779_v57 = vld [vmem:[%s7565_s16 + $0x2498] sm:$0xff] }
 0x30e   : > { %6557 = vmatprep.subr.mxu1 %v1746_v58  ;;  %6523 = vmatpush3.msra.mxu0 %v1698_v59  ;;  %v1796_v56 = vld [vmem:[%s7565_s16 + $0x2520] sm:$0xff]  ;;  %v1811_v58 = vld [vmem:[%s7565_s16 + $0x2598] sm:$0xff] }
 0x30f   : > { %6558 = vmatpush3.msra.mxu1 %v1730_v60  ;;  %6524 = vmatprep.subr.mxu0 %v1713_v61  ;;  %v1763_v59 = vld [vmem:[%s7565_s16 + $0x2418] sm:$0xff]  ;;  %v1778_v61 = vld [vmem:[%s7565_s16 + $0x2490] sm:$0xff] }
 0x310   : > { %6559 = vmatprep.subr.mxu1 %v1745_v62  ;;  %6525 = vmatpush3.msra.mxu0 %v1697_v63  ;;  %v1795_v60 = vld [vmem:[%s7565_s16 + $0x2518] sm:$0xff]  ;;  %v1810_v62 = vld [vmem:[%s7565_s16 + $0x2590] sm:$0xff] }
 0x311   : > { %6560 = vmatpush3.msra.mxu1 %v1729_v0  ;;  %6526 = vmatprep.subr.mxu0 %v1712_v1  ;;  %v1762_v63 = vld [vmem:[%s7565_s16 + $0x2410] sm:$0xff]  ;;  %v1777_v1 = vld [vmem:[%s7565_s16 + $0x2488] sm:$0xff] }
 0x312   : > { %6561 = vmatprep.subr.mxu1 %v1744_v2  ;;  %6527 = vmatpush3.msra.mxu0 %v1696_v3  ;;  %v1794_v0 = vld [vmem:[%s7565_s16 + $0x2510] sm:$0xff]  ;;  %v1809_v2 = vld [vmem:[%s7565_s16 + $0x2588] sm:$0xff] }
 0x313   : > { %4396 = vmatprep.mubr.f32.mxu0 %v593_v4  ;;  %6562 = vmatpush3.msra.mxu1 %v1728_v5  ;;  %v1761_v3 = vld [vmem:[%s7565_s16 + $0x2408] sm:$0xff]  ;;  %v1776_v5 = vld [vmem:[%s7565_s16 + $0x2480] sm:$0xff] }
 0x314   : > { %4397 = vmatmul.mubr.f32.vlgmr.msra.gmra.mxu0 %v592_v6  ;;  %4466 = vmatprep.mubr.f32.mxu1 %v595_v7  ;;  %v1793_v4 = vld [vmem:[%s7565_s16 + $0x2508] sm:$0xff]  ;;  %v1808_v6 = vld [vmem:[%s7565_s16 + $0x2580] sm:$0xff] }
 0x315   : > { %6566 = vmatprep.subr.mxu0 %v1791_v8  ;;  %6601 = vmatprep.subr.mxu1 %v1823_v9  ;;  %v1760_v7 = vld [vmem:[%s7565_s16 + $0x2400] sm:$0xff] }
 0x316   : > { %4467 = vmatmul.mubr.f32.vlgmr.msra.gmra.mxu1 %v594_v10  ;;  %6567 = vmatpush3.msra.mxu0 %v1775_v11  ;;  %v597_v8 = vld [vmem:[%s7591_s29 + $0x248] sm:$0xff]  ;;  %v596_v10 = vld [vmem:[%s7591_s29 + $0x240] sm:$0xff]  ;;  %v599_v11 = vld [vmem:[%s7591_s29 + $0x258] sm:$0xff] }
 0x317   : > { %6602 = vmatpush3.msra.mxu1 %v1807_v12  ;;  %6568 = vmatprep.subr.mxu0 %v1790_v13  ;;  %v1792_v9 = vld [vmem:[%s7565_s16 + $0x2500] sm:$0xff]  ;;  %v1855_v12 = vld [vmem:[%s7565_s16 + $0x26f8] sm:$0xff] }
 0x318   : > { %6603 = vmatprep.subr.mxu1 %v1822_v14  ;;  %6569 = vmatpush3.msra.mxu0 %v1774_v15  ;;  %v1887_v13 = vld [vmem:[%s7565_s16 + $0x27f8] sm:$0xff]  ;;  %v598_v14 = vld [vmem:[%s7591_s29 + $0x250] sm:$0xff] }
 0x319   : > { %6604 = vmatpush3.msra.mxu1 %v1806_v16  ;;  %6570 = vmatprep.subr.mxu0 %v1789_v17  ;;  %v1839_v15 = vld [vmem:[%s7565_s16 + $0x2678] sm:$0xff]  ;;  %v1854_v17 = vld [vmem:[%s7565_s16 + $0x26f0] sm:$0xff] }
 0x31a   : > { %6605 = vmatprep.subr.mxu1 %v1821_v18  ;;  %6571 = vmatpush3.msra.mxu0 %v1773_v19  ;;  %v1871_v16 = vld [vmem:[%s7565_s16 + $0x2778] sm:$0xff]  ;;  %v1886_v18 = vld [vmem:[%s7565_s16 + $0x27f0] sm:$0xff] }
 0x31b   : > { %6606 = vmatpush3.msra.mxu1 %v1805_v20  ;;  %6572 = vmatprep.subr.mxu0 %v1788_v21  ;;  %v1838_v19 = vld [vmem:[%s7565_s16 + $0x2670] sm:$0xff]  ;;  %v1853_v21 = vld [vmem:[%s7565_s16 + $0x26e8] sm:$0xff] }
 0x31c   : > { %6607 = vmatprep.subr.mxu1 %v1820_v22  ;;  %6573 = vmatpush3.msra.mxu0 %v1772_v23  ;;  %v1870_v20 = vld [vmem:[%s7565_s16 + $0x2770] sm:$0xff]  ;;  %v1885_v22 = vld [vmem:[%s7565_s16 + $0x27e8] sm:$0xff] }
 0x31d   : > { %6608 = vmatpush3.msra.mxu1 %v1804_v24  ;;  %6574 = vmatprep.subr.mxu0 %v1787_v25  ;;  %v1837_v23 = vld [vmem:[%s7565_s16 + $0x2668] sm:$0xff]  ;;  %v1852_v25 = vld [vmem:[%s7565_s16 + $0x26e0] sm:$0xff] }
 0x31e   : > { %6609 = vmatprep.subr.mxu1 %v1819_v26  ;;  %6575 = vmatpush3.msra.mxu0 %v1771_v27  ;;  %v1869_v24 = vld [vmem:[%s7565_s16 + $0x2768] sm:$0xff]  ;;  %v1884_v26 = vld [vmem:[%s7565_s16 + $0x27e0] sm:$0xff] }
 0x31f   : > { %6610 = vmatpush3.msra.mxu1 %v1803_v28  ;;  %6576 = vmatprep.subr.mxu0 %v1786_v29  ;;  %v1836_v27 = vld [vmem:[%s7565_s16 + $0x2660] sm:$0xff]  ;;  %v1851_v29 = vld [vmem:[%s7565_s16 + $0x26d8] sm:$0xff] }
 0x320   : > { %6611 = vmatprep.subr.mxu1 %v1818_v30  ;;  %6577 = vmatpush3.msra.mxu0 %v1770_v31  ;;  %v1868_v28 = vld [vmem:[%s7565_s16 + $0x2760] sm:$0xff]  ;;  %v1883_v30 = vld [vmem:[%s7565_s16 + $0x27d8] sm:$0xff] }
 0x321   : > { %6612 = vmatpush3.msra.mxu1 %v1802_v32  ;;  %6578 = vmatprep.subr.mxu0 %v1785_v33  ;;  %v1835_v31 = vld [vmem:[%s7565_s16 + $0x2658] sm:$0xff]  ;;  %v1850_v33 = vld [vmem:[%s7565_s16 + $0x26d0] sm:$0xff] }
 0x322   : > { %6613 = vmatprep.subr.mxu1 %v1817_v34  ;;  %6579 = vmatpush3.msra.mxu0 %v1769_v35  ;;  %v1867_v32 = vld [vmem:[%s7565_s16 + $0x2758] sm:$0xff]  ;;  %v1882_v34 = vld [vmem:[%s7565_s16 + $0x27d0] sm:$0xff] }
 0x323   : > { %6614 = vmatpush3.msra.mxu1 %v1801_v36  ;;  %6580 = vmatprep.subr.mxu0 %v1784_v37  ;;  %v1834_v35 = vld [vmem:[%s7565_s16 + $0x2650] sm:$0xff]  ;;  %v1849_v37 = vld [vmem:[%s7565_s16 + $0x26c8] sm:$0xff] }
 0x324   : > { %6615 = vmatprep.subr.mxu1 %v1816_v38  ;;  %6581 = vmatpush3.msra.mxu0 %v1768_v39  ;;  %v1866_v36 = vld [vmem:[%s7565_s16 + $0x2750] sm:$0xff]  ;;  %v1881_v38 = vld [vmem:[%s7565_s16 + $0x27c8] sm:$0xff] }
 0x325   : > { %6616 = vmatpush3.msra.mxu1 %v1800_v40  ;;  %6582 = vmatprep.subr.mxu0 %v1783_v41  ;;  %v1833_v39 = vld [vmem:[%s7565_s16 + $0x2648] sm:$0xff]  ;;  %v1848_v41 = vld [vmem:[%s7565_s16 + $0x26c0] sm:$0xff] }
 0x326   : > { %6617 = vmatprep.subr.mxu1 %v1815_v42  ;;  %6583 = vmatpush3.msra.mxu0 %v1767_v43  ;;  %v1865_v40 = vld [vmem:[%s7565_s16 + $0x2748] sm:$0xff]  ;;  %v1880_v42 = vld [vmem:[%s7565_s16 + $0x27c0] sm:$0xff] }
 0x327   : > { %6618 = vmatpush3.msra.mxu1 %v1799_v44  ;;  %6584 = vmatprep.subr.mxu0 %v1782_v45  ;;  %v1832_v43 = vld [vmem:[%s7565_s16 + $0x2640] sm:$0xff]  ;;  %v1847_v45 = vld [vmem:[%s7565_s16 + $0x26b8] sm:$0xff] }
 0x328   : > { %6619 = vmatprep.subr.mxu1 %v1814_v46  ;;  %6585 = vmatpush3.msra.mxu0 %v1766_v47  ;;  %v1864_v44 = vld [vmem:[%s7565_s16 + $0x2740] sm:$0xff]  ;;  %v1879_v46 = vld [vmem:[%s7565_s16 + $0x27b8] sm:$0xff] }
 0x329   : > { %6620 = vmatpush3.msra.mxu1 %v1798_v48  ;;  %6586 = vmatprep.subr.mxu0 %v1781_v49  ;;  %v1831_v47 = vld [vmem:[%s7565_s16 + $0x2638] sm:$0xff]  ;;  %v1846_v49 = vld [vmem:[%s7565_s16 + $0x26b0] sm:$0xff] }
 0x32a   : > { %6621 = vmatprep.subr.mxu1 %v1813_v50  ;;  %6587 = vmatpush3.msra.mxu0 %v1765_v51  ;;  %v1863_v48 = vld [vmem:[%s7565_s16 + $0x2738] sm:$0xff]  ;;  %v1878_v50 = vld [vmem:[%s7565_s16 + $0x27b0] sm:$0xff] }
 0x32b   : > { %6622 = vmatpush3.msra.mxu1 %v1797_v52  ;;  %6588 = vmatprep.subr.mxu0 %v1780_v53  ;;  %v1830_v51 = vld [vmem:[%s7565_s16 + $0x2630] sm:$0xff]  ;;  %v1845_v53 = vld [vmem:[%s7565_s16 + $0x26a8] sm:$0xff] }
 0x32c   : > { %6623 = vmatprep.subr.mxu1 %v1812_v54  ;;  %6589 = vmatpush3.msra.mxu0 %v1764_v55  ;;  %v1862_v52 = vld [vmem:[%s7565_s16 + $0x2730] sm:$0xff]  ;;  %v1877_v54 = vld [vmem:[%s7565_s16 + $0x27a8] sm:$0xff] }
 0x32d   : > { %6624 = vmatpush3.msra.mxu1 %v1796_v56  ;;  %6590 = vmatprep.subr.mxu0 %v1779_v57  ;;  %v1829_v55 = vld [vmem:[%s7565_s16 + $0x2628] sm:$0xff]  ;;  %v1844_v57 = vld [vmem:[%s7565_s16 + $0x26a0] sm:$0xff] }
 0x32e   : > { %6625 = vmatprep.subr.mxu1 %v1811_v58  ;;  %6591 = vmatpush3.msra.mxu0 %v1763_v59  ;;  %v1861_v56 = vld [vmem:[%s7565_s16 + $0x2728] sm:$0xff]  ;;  %v1876_v58 = vld [vmem:[%s7565_s16 + $0x27a0] sm:$0xff] }
 0x32f   : > { %6626 = vmatpush3.msra.mxu1 %v1795_v60  ;;  %6592 = vmatprep.subr.mxu0 %v1778_v61  ;;  %v1828_v59 = vld [vmem:[%s7565_s16 + $0x2620] sm:$0xff]  ;;  %v1843_v61 = vld [vmem:[%s7565_s16 + $0x2698] sm:$0xff] }
 0x330   : > { %6627 = vmatprep.subr.mxu1 %v1810_v62  ;;  %6593 = vmatpush3.msra.mxu0 %v1762_v63  ;;  %v1860_v60 = vld [vmem:[%s7565_s16 + $0x2720] sm:$0xff]  ;;  %v1875_v62 = vld [vmem:[%s7565_s16 + $0x2798] sm:$0xff] }
 0x331   : > { %6628 = vmatpush3.msra.mxu1 %v1794_v0  ;;  %6594 = vmatprep.subr.mxu0 %v1777_v1  ;;  %v1827_v63 = vld [vmem:[%s7565_s16 + $0x2618] sm:$0xff]  ;;  %v1842_v1 = vld [vmem:[%s7565_s16 + $0x2690] sm:$0xff] }
 0x332   : > { %6629 = vmatprep.subr.mxu1 %v1809_v2  ;;  %6595 = vmatpush3.msra.mxu0 %v1761_v3  ;;  %v1859_v0 = vld [vmem:[%s7565_s16 + $0x2718] sm:$0xff]  ;;  %v1874_v2 = vld [vmem:[%s7565_s16 + $0x2790] sm:$0xff] }
 0x333   : > { %6630 = vmatpush3.msra.mxu1 %v1793_v4  ;;  %6596 = vmatprep.subr.mxu0 %v1776_v5  ;;  %v1826_v3 = vld [vmem:[%s7565_s16 + $0x2610] sm:$0xff]  ;;  %v1841_v5 = vld [vmem:[%s7565_s16 + $0x2688] sm:$0xff] }
 0x334   : > { %6631 = vmatprep.subr.mxu1 %v1808_v6  ;;  %6597 = vmatpush3.msra.mxu0 %v1760_v7  ;;  %v1858_v4 = vld [vmem:[%s7565_s16 + $0x2710] sm:$0xff]  ;;  %v1873_v6 = vld [vmem:[%s7565_s16 + $0x2788] sm:$0xff] }
 0x335   : > { %4536 = vmatprep.mubr.f32.mxu0 %v597_v8  ;;  %6632 = vmatpush3.msra.mxu1 %v1792_v9  ;;  %v1825_v7 = vld [vmem:[%s7565_s16 + $0x2608] sm:$0xff]  ;;  %v1840_v9 = vld [vmem:[%s7565_s16 + $0x2680] sm:$0xff] }
 0x336   : > { %4537 = vmatmul.mubr.f32.vlgmr.msra.gmra.mxu0 %v596_v10  ;;  %4606 = vmatprep.mubr.f32.mxu1 %v599_v11  ;;  %v1857_v8 = vld [vmem:[%s7565_s16 + $0x2708] sm:$0xff]  ;;  %v1872_v10 = vld [vmem:[%s7565_s16 + $0x2780] sm:$0xff] }
 0x337   : > { %6636 = vmatprep.subr.mxu0 %v1855_v12  ;;  %6671 = vmatprep.subr.mxu1 %v1887_v13  ;;  %v1824_v11 = vld [vmem:[%s7565_s16 + $0x2600] sm:$0xff] }
 0x338   : > { %4607 = vmatmul.mubr.f32.vlgmr.msra.gmra.mxu1 %v598_v14  ;;  %6637 = vmatpush3.msra.mxu0 %v1839_v15  ;;  %v601_v12 = vld [vmem:[%s7591_s29 + $0x268] sm:$0xff]  ;;  %v600_v14 = vld [vmem:[%s7591_s29 + $0x260] sm:$0xff]  ;;  %v603_v15 = vld [vmem:[%s7591_s29 + $0x278] sm:$0xff] }
 0x339   : > { %6672 = vmatpush3.msra.mxu1 %v1871_v16  ;;  %6638 = vmatprep.subr.mxu0 %v1854_v17  ;;  %v1856_v13 = vld [vmem:[%s7565_s16 + $0x2700] sm:$0xff]  ;;  %v1919_v16 = vld [vmem:[%s7565_s16 + $0x28f8] sm:$0xff] }
 0x33a   : > { %6673 = vmatprep.subr.mxu1 %v1886_v18  ;;  %6639 = vmatpush3.msra.mxu0 %v1838_v19  ;;  %v1951_v17 = vld [vmem:[%s7565_s16 + $0x29f8] sm:$0xff]  ;;  %v602_v18 = vld [vmem:[%s7591_s29 + $0x270] sm:$0xff] }
 0x33b   : > { %6674 = vmatpush3.msra.mxu1 %v1870_v20  ;;  %6640 = vmatprep.subr.mxu0 %v1853_v21  ;;  %v1903_v19 = vld [vmem:[%s7565_s16 + $0x2878] sm:$0xff]  ;;  %v1918_v21 = vld [vmem:[%s7565_s16 + $0x28f0] sm:$0xff] }
 0x33c   : > { %6675 = vmatprep.subr.mxu1 %v1885_v22  ;;  %6641 = vmatpush3.msra.mxu0 %v1837_v23  ;;  %v1935_v20 = vld [vmem:[%s7565_s16 + $0x2978] sm:$0xff]  ;;  %v1950_v22 = vld [vmem:[%s7565_s16 + $0x29f0] sm:$0xff] }
 0x33d   : > { %6676 = vmatpush3.msra.mxu1 %v1869_v24  ;;  %6642 = vmatprep.subr.mxu0 %v1852_v25  ;;  %v1902_v23 = vld [vmem:[%s7565_s16 + $0x2870] sm:$0xff]  ;;  %v1917_v25 = vld [vmem:[%s7565_s16 + $0x28e8] sm:$0xff] }
 0x33e   : > { %6677 = vmatprep.subr.mxu1 %v1884_v26  ;;  %6643 = vmatpush3.msra.mxu0 %v1836_v27  ;;  %v1934_v24 = vld [vmem:[%s7565_s16 + $0x2970] sm:$0xff]  ;;  %v1949_v26 = vld [vmem:[%s7565_s16 + $0x29e8] sm:$0xff] }
 0x33f   : > { %6678 = vmatpush3.msra.mxu1 %v1868_v28  ;;  %6644 = vmatprep.subr.mxu0 %v1851_v29  ;;  %v1901_v27 = vld [vmem:[%s7565_s16 + $0x2868] sm:$0xff]  ;;  %v1916_v29 = vld [vmem:[%s7565_s16 + $0x28e0] sm:$0xff] }
 0x340   : > { %6679 = vmatprep.subr.mxu1 %v1883_v30  ;;  %6645 = vmatpush3.msra.mxu0 %v1835_v31  ;;  %v1933_v28 = vld [vmem:[%s7565_s16 + $0x2968] sm:$0xff]  ;;  %v1948_v30 = vld [vmem:[%s7565_s16 + $0x29e0] sm:$0xff] }
 0x341   : > { %6680 = vmatpush3.msra.mxu1 %v1867_v32  ;;  %6646 = vmatprep.subr.mxu0 %v1850_v33  ;;  %v1900_v31 = vld [vmem:[%s7565_s16 + $0x2860] sm:$0xff]  ;;  %v1915_v33 = vld [vmem:[%s7565_s16 + $0x28d8] sm:$0xff] }
 0x342   : > { %6681 = vmatprep.subr.mxu1 %v1882_v34  ;;  %6647 = vmatpush3.msra.mxu0 %v1834_v35  ;;  %v1932_v32 = vld [vmem:[%s7565_s16 + $0x2960] sm:$0xff]  ;;  %v1947_v34 = vld [vmem:[%s7565_s16 + $0x29d8] sm:$0xff] }
 0x343   : > { %6682 = vmatpush3.msra.mxu1 %v1866_v36  ;;  %6648 = vmatprep.subr.mxu0 %v1849_v37  ;;  %v1899_v35 = vld [vmem:[%s7565_s16 + $0x2858] sm:$0xff]  ;;  %v1914_v37 = vld [vmem:[%s7565_s16 + $0x28d0] sm:$0xff] }
 0x344   : > { %6683 = vmatprep.subr.mxu1 %v1881_v38  ;;  %6649 = vmatpush3.msra.mxu0 %v1833_v39  ;;  %v1931_v36 = vld [vmem:[%s7565_s16 + $0x2958] sm:$0xff]  ;;  %v1946_v38 = vld [vmem:[%s7565_s16 + $0x29d0] sm:$0xff] }
 0x345   : > { %6684 = vmatpush3.msra.mxu1 %v1865_v40  ;;  %6650 = vmatprep.subr.mxu0 %v1848_v41  ;;  %v1898_v39 = vld [vmem:[%s7565_s16 + $0x2850] sm:$0xff]  ;;  %v1913_v41 = vld [vmem:[%s7565_s16 + $0x28c8] sm:$0xff] }
 0x346   : > { %6685 = vmatprep.subr.mxu1 %v1880_v42  ;;  %6651 = vmatpush3.msra.mxu0 %v1832_v43  ;;  %v1930_v40 = vld [vmem:[%s7565_s16 + $0x2950] sm:$0xff]  ;;  %v1945_v42 = vld [vmem:[%s7565_s16 + $0x29c8] sm:$0xff] }
 0x347   : > { %6686 = vmatpush3.msra.mxu1 %v1864_v44  ;;  %6652 = vmatprep.subr.mxu0 %v1847_v45  ;;  %v1897_v43 = vld [vmem:[%s7565_s16 + $0x2848] sm:$0xff]  ;;  %v1912_v45 = vld [vmem:[%s7565_s16 + $0x28c0] sm:$0xff] }
 0x348   : > { %6687 = vmatprep.subr.mxu1 %v1879_v46  ;;  %6653 = vmatpush3.msra.mxu0 %v1831_v47  ;;  %v1929_v44 = vld [vmem:[%s7565_s16 + $0x2948] sm:$0xff]  ;;  %v1944_v46 = vld [vmem:[%s7565_s16 + $0x29c0] sm:$0xff] }
 0x349   : > { %6688 = vmatpush3.msra.mxu1 %v1863_v48  ;;  %6654 = vmatprep.subr.mxu0 %v1846_v49  ;;  %v1896_v47 = vld [vmem:[%s7565_s16 + $0x2840] sm:$0xff]  ;;  %v1911_v49 = vld [vmem:[%s7565_s16 + $0x28b8] sm:$0xff] }
 0x34a   : > { %6689 = vmatprep.subr.mxu1 %v1878_v50  ;;  %6655 = vmatpush3.msra.mxu0 %v1830_v51  ;;  %v1928_v48 = vld [vmem:[%s7565_s16 + $0x2940] sm:$0xff]  ;;  %v1943_v50 = vld [vmem:[%s7565_s16 + $0x29b8] sm:$0xff] }
 0x34b   : > { %6690 = vmatpush3.msra.mxu1 %v1862_v52  ;;  %6656 = vmatprep.subr.mxu0 %v1845_v53  ;;  %v1895_v51 = vld [vmem:[%s7565_s16 + $0x2838] sm:$0xff]  ;;  %v1910_v53 = vld [vmem:[%s7565_s16 + $0x28b0] sm:$0xff] }
 0x34c   : > { %6691 = vmatprep.subr.mxu1 %v1877_v54  ;;  %6657 = vmatpush3.msra.mxu0 %v1829_v55  ;;  %v1927_v52 = vld [vmem:[%s7565_s16 + $0x2938] sm:$0xff]  ;;  %v1942_v54 = vld [vmem:[%s7565_s16 + $0x29b0] sm:$0xff] }
 0x34d   : > { %6692 = vmatpush3.msra.mxu1 %v1861_v56  ;;  %6658 = vmatprep.subr.mxu0 %v1844_v57  ;;  %v1894_v55 = vld [vmem:[%s7565_s16 + $0x2830] sm:$0xff]  ;;  %v1909_v57 = vld [vmem:[%s7565_s16 + $0x28a8] sm:$0xff] }
 0x34e   : > { %6693 = vmatprep.subr.mxu1 %v1876_v58  ;;  %6659 = vmatpush3.msra.mxu0 %v1828_v59  ;;  %v1926_v56 = vld [vmem:[%s7565_s16 + $0x2930] sm:$0xff]  ;;  %v1941_v58 = vld [vmem:[%s7565_s16 + $0x29a8] sm:$0xff] }
 0x34f   : > { %6694 = vmatpush3.msra.mxu1 %v1860_v60  ;;  %6660 = vmatprep.subr.mxu0 %v1843_v61  ;;  %v1893_v59 = vld [vmem:[%s7565_s16 + $0x2828] sm:$0xff]  ;;  %v1908_v61 = vld [vmem:[%s7565_s16 + $0x28a0] sm:$0xff] }
 0x350   : > { %6695 = vmatprep.subr.mxu1 %v1875_v62  ;;  %6661 = vmatpush3.msra.mxu0 %v1827_v63  ;;  %v1925_v60 = vld [vmem:[%s7565_s16 + $0x2928] sm:$0xff]  ;;  %v1940_v62 = vld [vmem:[%s7565_s16 + $0x29a0] sm:$0xff] }
 0x351   : > { %6696 = vmatpush3.msra.mxu1 %v1859_v0  ;;  %6662 = vmatprep.subr.mxu0 %v1842_v1  ;;  %v1892_v63 = vld [vmem:[%s7565_s16 + $0x2820] sm:$0xff]  ;;  %v1907_v1 = vld [vmem:[%s7565_s16 + $0x2898] sm:$0xff] }
 0x352   : > { %6697 = vmatprep.subr.mxu1 %v1874_v2  ;;  %6663 = vmatpush3.msra.mxu0 %v1826_v3  ;;  %v1924_v0 = vld [vmem:[%s7565_s16 + $0x2920] sm:$0xff]  ;;  %v1939_v2 = vld [vmem:[%s7565_s16 + $0x2998] sm:$0xff] }
 0x353   : > { %6698 = vmatpush3.msra.mxu1 %v1858_v4  ;;  %6664 = vmatprep.subr.mxu0 %v1841_v5  ;;  %v1891_v3 = vld [vmem:[%s7565_s16 + $0x2818] sm:$0xff]  ;;  %v1906_v5 = vld [vmem:[%s7565_s16 + $0x2890] sm:$0xff] }
 0x354   : > { %6699 = vmatprep.subr.mxu1 %v1873_v6  ;;  %6665 = vmatpush3.msra.mxu0 %v1825_v7  ;;  %v1923_v4 = vld [vmem:[%s7565_s16 + $0x2918] sm:$0xff]  ;;  %v1938_v6 = vld [vmem:[%s7565_s16 + $0x2990] sm:$0xff] }
 0x355   : > { %6700 = vmatpush3.msra.mxu1 %v1857_v8  ;;  %6666 = vmatprep.subr.mxu0 %v1840_v9  ;;  %v1890_v7 = vld [vmem:[%s7565_s16 + $0x2810] sm:$0xff]  ;;  %v1905_v9 = vld [vmem:[%s7565_s16 + $0x2888] sm:$0xff] }
 0x356   : > { %6701 = vmatprep.subr.mxu1 %v1872_v10  ;;  %6667 = vmatpush3.msra.mxu0 %v1824_v11  ;;  %v1922_v8 = vld [vmem:[%s7565_s16 + $0x2910] sm:$0xff]  ;;  %v1937_v10 = vld [vmem:[%s7565_s16 + $0x2988] sm:$0xff] }
 0x357   : > { %4676 = vmatprep.mubr.f32.mxu0 %v601_v12  ;;  %6702 = vmatpush3.msra.mxu1 %v1856_v13  ;;  %v1889_v11 = vld [vmem:[%s7565_s16 + $0x2808] sm:$0xff]  ;;  %v1904_v13 = vld [vmem:[%s7565_s16 + $0x2880] sm:$0xff] }
 0x358   : > { %4677 = vmatmul.mubr.f32.vlgmr.msra.gmra.mxu0 %v600_v14  ;;  %4746 = vmatprep.mubr.f32.mxu1 %v603_v15  ;;  %v1921_v12 = vld [vmem:[%s7565_s16 + $0x2908] sm:$0xff]  ;;  %v1936_v14 = vld [vmem:[%s7565_s16 + $0x2980] sm:$0xff] }
 0x359   : > { %6706 = vmatprep.subr.mxu0 %v1919_v16  ;;  %6741 = vmatprep.subr.mxu1 %v1951_v17  ;;  %v1888_v15 = vld [vmem:[%s7565_s16 + $0x2800] sm:$0xff] }
 0x35a   : > { %4747 = vmatmul.mubr.f32.vlgmr.msra.gmra.mxu1 %v602_v18  ;;  %6707 = vmatpush3.msra.mxu0 %v1903_v19  ;;  %v605_v16 = vld [vmem:[%s7591_s29 + $0x288] sm:$0xff]  ;;  %v607_v18 = vld [vmem:[%s7591_s29 + $0x298] sm:$0xff]  ;;  %v604_v19 = vld [vmem:[%s7591_s29 + $0x280] sm:$0xff] }
 0x35b   : > { %6742 = vmatpush3.msra.mxu1 %v1935_v20  ;;  %6708 = vmatprep.subr.mxu0 %v1918_v21  ;;  %v1920_v17 = vld [vmem:[%s7565_s16 + $0x2900] sm:$0xff]  ;;  %v606_v20 = vld [vmem:[%s7591_s29 + $0x290] sm:$0xff]  ;;  %v5338_v21 = vpop.f32.mrf.mxu0 }
 0x35c   : > { %6743 = vmatprep.subr.mxu1 %v1950_v22  ;;  %6709 = vmatpush3.msra.mxu0 %v1902_v23  ;;  %v5373_v22 = vpop.f32.mrf.mxu1 }
 0x35d   : > { %6744 = vmatpush3.msra.mxu1 %v1934_v24  ;;  %6710 = vmatprep.subr.mxu0 %v1917_v25  ;;  %v5339_v23 = vpop.f32.mrf.mxu0 }
 0x35e   : > { %6745 = vmatprep.subr.mxu1 %v1949_v26  ;;  %6711 = vmatpush3.msra.mxu0 %v1901_v27  ;;  %v5374_v25 = vpop.f32.mrf.mxu1 }
 0x35f   : > { %6746 = vmatpush3.msra.mxu1 %v1933_v28  ;;  %6712 = vmatprep.subr.mxu0 %v1916_v29  ;;  %v5408_v24 = vpop.f32.mrf.mxu0  ;;  %v5340_v28 = vadd.f32 %v5339_v23, %v5338_v21  ;;  %v5375_v29 = vadd.f32 %v5374_v25, %v5373_v22 }
 0x360   : > { %6747 = vmatprep.subr.mxu1 %v1948_v30  ;;  %6713 = vmatpush3.msra.mxu0 %v1900_v31  ;;  %v5443_v26 = vpop.f32.mrf.mxu1 }
 0x361   : > { %6748 = vmatpush3.msra.mxu1 %v1932_v32  ;;  %6714 = vmatprep.subr.mxu0 %v1915_v33  ;;  %v5409_v27 = vpop.f32.mrf.mxu0  ;;  %v2089_v33 = vadd.f32 %v5375_v29, %v5340_v28 }
 0x362   : > { %6749 = vmatprep.subr.mxu1 %v1947_v34  ;;  %6715 = vmatpush3.msra.mxu0 %v1899_v35  ;;  %v5410_v31 = vadd.f32 %v5409_v27, %v5408_v24  ;;  %v5444_v32 = vpop.f32.mrf.mxu1 }
 0x363   : > { %6750 = vmatpush3.msra.mxu1 %v1931_v36  ;;  %6716 = vmatprep.subr.mxu0 %v1914_v37  ;;  %v5478_v30 = vpop.f32.mrf.mxu0  ;;  %v5445_v37 = vadd.f32 %v5444_v32, %v5443_v26 }
 0x364   : > { %6751 = vmatprep.subr.mxu1 %v1946_v38  ;;  %6717 = vmatpush3.msra.mxu0 %v1898_v39  ;;  %v5513_v34 = vpop.f32.mrf.mxu1  ;;  %v2159_v36 = vadd.f32 %v5410_v31, %v2089_v33 }
 0x365   : > { %6752 = vmatpush3.msra.mxu1 %v1930_v40  ;;  %6718 = vmatprep.subr.mxu0 %v1913_v41  ;;  %v5479_v35 = vpop.f32.mrf.mxu0 }
 0x366   : > { %6753 = vmatprep.subr.mxu1 %v1945_v42  ;;  %6719 = vmatpush3.msra.mxu0 %v1897_v43  ;;  %v5480_v39 = vadd.f32 %v5479_v35, %v5478_v30  ;;  %v5514_v40 = vpop.f32.mrf.mxu1  ;;  %v2229_v41 = vadd.f32 %v5445_v37, %v2159_v36 }
 0x367   : > { %6754 = vmatpush3.msra.mxu1 %v1929_v44  ;;  %6720 = vmatprep.subr.mxu0 %v1912_v45  ;;  %v5548_v38 = vpop.f32.mrf.mxu0  ;;  %v5515_v45 = vadd.f32 %v5514_v40, %v5513_v34 }
 0x368   : > { %6755 = vmatprep.subr.mxu1 %v1944_v46  ;;  %6721 = vmatpush3.msra.mxu0 %v1896_v47  ;;  %v5583_v42 = vpop.f32.mrf.mxu1  ;;  %v2299_v44 = vadd.f32 %v5480_v39, %v2229_v41 }
 0x369   : > { %6756 = vmatpush3.msra.mxu1 %v1928_v48  ;;  %6722 = vmatprep.subr.mxu0 %v1911_v49  ;;  %v5549_v43 = vpop.f32.mrf.mxu0 }
 0x36a   : > { %6757 = vmatprep.subr.mxu1 %v1943_v50  ;;  %6723 = vmatpush3.msra.mxu0 %v1895_v51  ;;  %v5550_v47 = vadd.f32 %v5549_v43, %v5548_v38  ;;  %v5584_v48 = vpop.f32.mrf.mxu1  ;;  %v2369_v49 = vadd.f32 %v5515_v45, %v2299_v44 }
 0x36b   : > { %6758 = vmatpush3.msra.mxu1 %v1927_v52  ;;  %6724 = vmatprep.subr.mxu0 %v1910_v53  ;;  %v5618_v46 = vpop.f32.mrf.mxu0  ;;  %v5585_v53 = vadd.f32 %v5584_v48, %v5583_v42 }
 0x36c   : > { %6759 = vmatprep.subr.mxu1 %v1942_v54  ;;  %6725 = vmatpush3.msra.mxu0 %v1894_v55  ;;  %v5653_v50 = vpop.f32.mrf.mxu1  ;;  %v2439_v52 = vadd.f32 %v5550_v47, %v2369_v49 }
 0x36d   : > { %6760 = vmatpush3.msra.mxu1 %v1926_v56  ;;  %6726 = vmatprep.subr.mxu0 %v1909_v57  ;;  %v5619_v51 = vpop.f32.mrf.mxu0 }
 0x36e   : > { %6761 = vmatprep.subr.mxu1 %v1941_v58  ;;  %6727 = vmatpush3.msra.mxu0 %v1893_v59  ;;  %v5620_v55 = vadd.f32 %v5619_v51, %v5618_v46  ;;  %v5654_v56 = vpop.f32.mrf.mxu1  ;;  %v2509_v57 = vadd.f32 %v5585_v53, %v2439_v52 }
 0x36f   : > { %6762 = vmatpush3.msra.mxu1 %v1925_v60  ;;  %6728 = vmatprep.subr.mxu0 %v1908_v61  ;;  %v5688_v54 = vpop.f32.mrf.mxu0  ;;  %v5655_v61 = vadd.f32 %v5654_v56, %v5653_v50 }
 0x370   : > { %6763 = vmatprep.subr.mxu1 %v1940_v62  ;;  %6729 = vmatpush3.msra.mxu0 %v1892_v63  ;;  %v5723_v58 = vpop.f32.mrf.mxu1  ;;  %v2579_v60 = vadd.f32 %v5620_v55, %v2509_v57 }
 0x371   : > { %6764 = vmatpush3.msra.mxu1 %v1924_v0  ;;  %6730 = vmatprep.subr.mxu0 %v1907_v1  ;;  %v5689_v59 = vpop.f32.mrf.mxu0 }
 0x372   : > { %6765 = vmatprep.subr.mxu1 %v1939_v2  ;;  %6731 = vmatpush3.msra.mxu0 %v1891_v3  ;;  %v5690_v63 = vadd.f32 %v5689_v59, %v5688_v54  ;;  %v5724_v0 = vpop.f32.mrf.mxu1  ;;  %v2649_v1 = vadd.f32 %v5655_v61, %v2579_v60 }
 0x373   : > { %6766 = vmatpush3.msra.mxu1 %v1923_v4  ;;  %6732 = vmatprep.subr.mxu0 %v1906_v5  ;;  %v5758_v62 = vpop.f32.mrf.mxu0  ;;  %v5725_v5 = vadd.f32 %v5724_v0, %v5723_v58 }
 0x374   : > { %6767 = vmatprep.subr.mxu1 %v1938_v6  ;;  %6733 = vmatpush3.msra.mxu0 %v1890_v7  ;;  %v5793_v2 = vpop.f32.mrf.mxu1  ;;  %v2719_v4 = vadd.f32 %v5690_v63, %v2649_v1 }
 0x375   : > { %6768 = vmatpush3.msra.mxu1 %v1922_v8  ;;  %6734 = vmatprep.subr.mxu0 %v1905_v9  ;;  %v5759_v3 = vpop.f32.mrf.mxu0 }
 0x376   : > { %6769 = vmatprep.subr.mxu1 %v1937_v10  ;;  %6735 = vmatpush3.msra.mxu0 %v1889_v11  ;;  %v5760_v7 = vadd.f32 %v5759_v3, %v5758_v62  ;;  %v5794_v8 = vpop.f32.mrf.mxu1  ;;  %v2789_v9 = vadd.f32 %v5725_v5, %v2719_v4 }
 0x377   : > { %6770 = vmatpush3.msra.mxu1 %v1921_v12  ;;  %6736 = vmatprep.subr.mxu0 %v1904_v13  ;;  %v5828_v6 = vpop.f32.mrf.mxu0  ;;  %v5795_v13 = vadd.f32 %v5794_v8, %v5793_v2 }
 0x378   : > { %6771 = vmatprep.subr.mxu1 %v1936_v14  ;;  %6737 = vmatpush3.msra.mxu0 %v1888_v15  ;;  %v5863_v10 = vpop.f32.mrf.mxu1  ;;  %v2859_v12 = vadd.f32 %v5760_v7, %v2789_v9 }
 0x379   : > { %4816 = vmatprep.mubr.f32.mxu0 %v605_v16  ;;  %6772 = vmatpush3.msra.mxu1 %v1920_v17  ;;  %v5829_v11 = vpop.f32.mrf.mxu0 }
 0x37a   : > { %4886 = vmatprep.mubr.f32.mxu1 %v607_v18  ;;  %4817 = vmatmul.mubr.f32.vlgmr.msra.gmra.mxu0 %v604_v19  ;;  %v5830_v15 = vadd.f32 %v5829_v11, %v5828_v6  ;;  %v5864_v16 = vpop.f32.mrf.mxu1  ;;  %v2929_v17 = vadd.f32 %v5795_v13, %v2859_v12 }
 0x37b   : > { %4887 = vmatmul.mubr.f32.vlgmr.msra.gmra.mxu1 %v606_v20  ;;  %v5898_v14 = vpop.f32.mrf.mxu0  ;;  %v5865_v21 = vadd.f32 %v5864_v16, %v5863_v10 }
 0x37c   : > { %v5933_v18 = vpop.f32.mrf.mxu1  ;;  %v2999_v20 = vadd.f32 %v5830_v15, %v2929_v17 }
 0x37d   : > { %v5899_v19 = vpop.f32.mrf.mxu0 }
 0x37e   : > { %v5900_v23 = vadd.f32 %v5899_v19, %v5898_v14  ;;  %v5934_v24 = vpop.f32.mrf.mxu1  ;;  %v3069_v25 = vadd.f32 %v5865_v21, %v2999_v20 }
 0x37f   : > { %v5968_v22 = vpop.f32.mrf.mxu0  ;;  %v5935_v29 = vadd.f32 %v5934_v24, %v5933_v18 }
 0x380   : > { %v6003_v26 = vpop.f32.mrf.mxu1  ;;  %v3139_v28 = vadd.f32 %v5900_v23, %v3069_v25 }
 0x381   : > { %v5969_v27 = vpop.f32.mrf.mxu0 }
 0x382   : > { %v5970_v31 = vadd.f32 %v5969_v27, %v5968_v22  ;;  %v6004_v32 = vpop.f32.mrf.mxu1  ;;  %v3209_v33 = vadd.f32 %v5935_v29, %v3139_v28 }
 0x383   : > { %v6038_v30 = vpop.f32.mrf.mxu0  ;;  %v6005_v37 = vadd.f32 %v6004_v32, %v6003_v26 }
 0x384   : > { %v6073_v34 = vpop.f32.mrf.mxu1  ;;  %v3279_v36 = vadd.f32 %v5970_v31, %v3209_v33 }
 0x385   : > { %v6039_v35 = vpop.f32.mrf.mxu0 }
 0x386   : > { %v6040_v39 = vadd.f32 %v6039_v35, %v6038_v30  ;;  %v6074_v40 = vpop.f32.mrf.mxu1  ;;  %v3349_v41 = vadd.f32 %v6005_v37, %v3279_v36 }
 0x387   : > { %v6108_v38 = vpop.f32.mrf.mxu0  ;;  %v6075_v45 = vadd.f32 %v6074_v40, %v6073_v34 }
 0x388   : > { %v6143_v42 = vpop.f32.mrf.mxu1  ;;  %v3419_v44 = vadd.f32 %v6040_v39, %v3349_v41 }
 0x389   : > { %v6109_v43 = vpop.f32.mrf.mxu0 }
 0x38a   : > { %v6110_v47 = vadd.f32 %v6109_v43, %v6108_v38  ;;  %v6144_v48 = vpop.f32.mrf.mxu1  ;;  %v3489_v49 = vadd.f32 %v6075_v45, %v3419_v44 }
 0x38b   : > { %v6178_v46 = vpop.f32.mrf.mxu0  ;;  %v6145_v53 = vadd.f32 %v6144_v48, %v6143_v42 }
 0x38c   : > { %v6213_v50 = vpop.f32.mrf.mxu1  ;;  %v3559_v52 = vadd.f32 %v6110_v47, %v3489_v49 }
 0x38d   : > { %v6179_v51 = vpop.f32.mrf.mxu0 }
 0x38e   : > { %v6180_v55 = vadd.f32 %v6179_v51, %v6178_v46  ;;  %v6214_v56 = vpop.f32.mrf.mxu1  ;;  %v3629_v57 = vadd.f32 %v6145_v53, %v3559_v52 }
 0x38f   : > { %v6248_v54 = vpop.f32.mrf.mxu0  ;;  %v6215_v61 = vadd.f32 %v6214_v56, %v6213_v50 }
 0x390   : > { %v6283_v58 = vpop.f32.mrf.mxu1  ;;  %v3699_v60 = vadd.f32 %v6180_v55, %v3629_v57 }
 0x391   : > { %v6249_v59 = vpop.f32.mrf.mxu0 }
 0x392   : > { %v6250_v63 = vadd.f32 %v6249_v59, %v6248_v54  ;;  %v6284_v0 = vpop.f32.mrf.mxu1  ;;  %v3769_v1 = vadd.f32 %v6215_v61, %v3699_v60  ;;  %v523_v59 = vld [vmem:[#allocation2] sm:$0xff] }
 0x393   : > { %v6318_v62 = vpop.f32.mrf.mxu0  ;;  %v6285_v5 = vadd.f32 %v6284_v0, %v6283_v58 }
 0x394   : > { %v6353_v2 = vpop.f32.mrf.mxu1  ;;  %v3839_v4 = vadd.f32 %v6250_v63, %v3769_v1 }
 0x395   : > { %v6319_v3 = vpop.f32.mrf.mxu0 }
 0x396   : > { %v6320_v7 = vadd.f32 %v6319_v3, %v6318_v62  ;;  %v6354_v8 = vpop.f32.mrf.mxu1  ;;  %v3909_v9 = vadd.f32 %v6285_v5, %v3839_v4 }
 0x397   : > { %v6388_v6 = vpop.f32.mrf.mxu0  ;;  %v6355_v13 = vadd.f32 %v6354_v8, %v6353_v2 }
 0x398   : > { %v6423_v10 = vpop.f32.mrf.mxu1  ;;  %v3979_v12 = vadd.f32 %v6320_v7, %v3909_v9 }
 0x399   : > { %v6389_v11 = vpop.f32.mrf.mxu0 }
 0x39a   : > { %v6390_v15 = vadd.f32 %v6389_v11, %v6388_v6  ;;  %v6424_v16 = vpop.f32.mrf.mxu1  ;;  %v4049_v17 = vadd.f32 %v6355_v13, %v3979_v12 }
 0x39b   : > { %v6425_v21 = vadd.f32 %v6424_v16, %v6423_v10 }
 0x39c   : > { %v4119_v20 = vadd.f32 %v6390_v15, %v4049_v17 }
 0x39e   : > { %v4189_v25 = vadd.f32 %v6425_v21, %v4119_v20 }
 0x3b2   : > { %v6458_v14 = vpop.f32.mrf.mxu0 }
 0x3b4   : > { %v6493_v18 = vpop.f32.mrf.mxu1  ;;  %v6459_v19 = vpop.f32.mrf.mxu0 }
 0x3b5   : > { %v6460_v23 = vadd.f32 %v6459_v19, %v6458_v14 }
 0x3b6   : > { %v6494_v24 = vpop.f32.mrf.mxu1 }
 0x3b7   : > { %v4259_v28 = vadd.f32 %v6460_v23, %v4189_v25  ;;  %v6495_v29 = vadd.f32 %v6494_v24, %v6493_v18 }
 0x3b9   : > { %v4329_v33 = vadd.f32 %v6495_v29, %v4259_v28 }
 0x3d4   : > { %v6528_v22 = vpop.f32.mrf.mxu0 }
 0x3d6   : > { %v6563_v26 = vpop.f32.mrf.mxu1  ;;  %v6529_v27 = vpop.f32.mrf.mxu0 }
 0x3d7   : > { %v6530_v31 = vadd.f32 %v6529_v27, %v6528_v22 }
 0x3d8   : > { %v6564_v32 = vpop.f32.mrf.mxu1 }
 0x3d9   : > { %v4399_v36 = vadd.f32 %v6530_v31, %v4329_v33  ;;  %v6565_v37 = vadd.f32 %v6564_v32, %v6563_v26 }
 0x3db   : > { %v4469_v41 = vadd.f32 %v6565_v37, %v4399_v36 }
 0x3f6   : > { %v6598_v30 = vpop.f32.mrf.mxu0 }
 0x3f8   : > { %v6633_v34 = vpop.f32.mrf.mxu1  ;;  %v6599_v35 = vpop.f32.mrf.mxu0 }
 0x3f9   : > { %v6600_v39 = vadd.f32 %v6599_v35, %v6598_v30 }
 0x3fa   : > { %v6634_v40 = vpop.f32.mrf.mxu1 }
 0x3fb   : > { %v4539_v44 = vadd.f32 %v6600_v39, %v4469_v41  ;;  %v6635_v45 = vadd.f32 %v6634_v40, %v6633_v34 }
 0x3fd   : > { %v4609_v48 = vadd.f32 %v6635_v45, %v4539_v44 }
 0x418   : > { %v6668_v38 = vpop.f32.mrf.mxu0 }
 0x41a   : > { %v6703_v42 = vpop.f32.mrf.mxu1  ;;  %v6669_v43 = vpop.f32.mrf.mxu0 }
 0x41b   : > { %v6670_v46 = vadd.f32 %v6669_v43, %v6668_v38 }
 0x41c   : > { %v6704_v47 = vpop.f32.mrf.mxu1 }
 0x41d   : > { %v4679_v49 = vadd.f32 %v6670_v46, %v4609_v48  ;;  %v6705_v50 = vadd.f32 %v6704_v47, %v6703_v42 }
 0x41f   : > { %v4749_v55 = vadd.f32 %v6705_v50, %v4679_v49 }
 0x43a   : > { %v6738_v51 = vpop.f32.mrf.mxu0 }
 0x43b   : > { %v6773_v52 = vpop.f32.mrf.mxu1 }
 0x43c   : > { %v6739_v53 = vpop.f32.mrf.mxu0 }
 0x43d   : > { %v6774_v54 = vpop.f32.mrf.mxu1  ;;  %v6740_v56 = vadd.f32 %v6739_v53, %v6738_v51 }
 0x43e   : > { %v6775_v58 = vadd.f32 %v6774_v54, %v6773_v52 }
 0x43f   : > { %v4819_v57 = vadd.f32 %v6740_v56, %v4749_v55 }
 0x441   : > { %v4889_v60 = vadd.f32 %v6775_v58, %v4819_v57  ;;  %4897 = sbr.rel (%p5292_p2) target bundleno = 1524 (0x5f4), region = 108 }
 0x443   : > { %v4892_v61 = vadd.f32 %v4889_v60, %v523_v59 }
 0x445   : > { %4893 = vst [vmem:[#allocation2] sm:$0xff] %v4892_v61 }
 0x446   : > { %v4939_v62 = vld [vmem:[%s9128_s5 + $0x78] sm:$0xff]  ;;  %v7318_v63 = vmov 0.0   ;;  %v4938_v0 = vld [vmem:[%s9128_s5 + $0x70] sm:$0xff]  ;;  %vm7319_vm0 = vmmov 0   ;;  %v4937_v1 = vld [vmem:[%s9128_s5 + $0x68] sm:$0xff]  ;;  %vm5049_vm1 = vcmask 523264  }
 0x447   : > { %6802 = vmatprep.subr.mxu0 %v7318_v63  ;;  %6834 = vmatprep.mubr.msk.f32.mxu0 %vm7319_vm0, %v7318_v63  ;;  %v4936_v2 = vld [vmem:[%s9128_s5 + $0x60] sm:$0xff]  ;;  %v5041_v3 = vld [vmem:[#allocation15 + $0x38] sm:$0xff]  ;;  %v4935_v4 = vld [vmem:[%s9128_s5 + $0x58] sm:$0xff] }
 0x448   : > { %6803 = vmatpush3.msra.mxu0 %v4939_v62  ;;  %6837 = vmatprep.subr.mxu1 %v7318_v63  ;;  %v5040_v5 = vld [vmem:[#allocation15 + $0x30] sm:$0xff]  ;;  %v5039_v6 = vld [vmem:[#allocation15 + $0x28] sm:$0xff]  ;;  %v4934_v7 = vld [vmem:[%s9128_s5 + $0x50] sm:$0xff] }
 0x449   : > { %6804 = vmatprep.subr.mxu0 %v7318_v63  ;;  %6853 = vmatprep.mubr.msk.f32.mxu1 %vm7319_vm0, %v7318_v63  ;;  %v4933_v8 = vld [vmem:[%s9128_s5 + $0x48] sm:$0xff]  ;;  %v4932_v9 = vld [vmem:[%s9128_s5 + $0x40] sm:$0xff]  ;;  %v4931_v12 = vld [vmem:[%s9128_s5 + $0x38] sm:$0xff] }
 0x44a   : > { %6805 = vmatpush3.msra.mxu0 %v4938_v0  ;;  %6838 = vmatpush3.msra.mxu1 %v5041_v3  ;;  %v5293_v11 = vld [vmem:[#allocation6] ss:$0 sm:$0xff]  ;;  %v4930_v13 = vld [vmem:[%s9128_s5 + $0x30] sm:$0xff]  ;;  %v5294_v15 = vld [vmem:[#allocation8] ss:$0 sm:$0xff] }
 0x44b   : > { %6806 = vmatprep.subr.mxu0 %v7318_v63  ;;  %6839 = vmatprep.subr.mxu1 %v7318_v63  ;;  %v4929_v16 = vld [vmem:[%s9128_s5 + $0x28] sm:$0xff]  ;;  %v4928_v17 = vld [vmem:[%s9128_s5 + $0x20] sm:$0xff]  ;;  %v4927_v20 = vld [vmem:[%s9128_s5 + $0x18] sm:$0xff] }
 0x44c   : > { %6807 = vmatpush3.msra.mxu0 %v4937_v1  ;;  %6840 = vmatpush3.msra.mxu1 %v5040_v5  ;;  %v4898_v10 = vld [vmem:[#allocation2] sm:$0xff]  ;;  %v5295_v19 = vld [vmem:[#allocation9] ss:$0 sm:$0xff]  ;;  %v4926_v21 = vld [vmem:[%s9128_s5 + $0x10] sm:$0xff] }
 0x44d   : > { %6808 = vmatprep.subr.mxu0 %v7318_v63  ;;  %6841 = vmatprep.subr.mxu1 %v7318_v63  ;;  %v4906_v14 = vadd.f32 %v5293_v11, %v4898_v10  ;;  %v4925_v23 = vld [vmem:[%s9128_s5 + $0x8] sm:$0xff]  ;;  %v4924_v24 = vld [vmem:[%s9128_s5] sm:$0xff]  ;;  %v5038_v26 = vld [vmem:[#allocation15 + $0x20] sm:$0xff] }
 0x44e   : > { %6809 = vmatpush3.msra.mxu0 %v4936_v2  ;;  %6842 = vmatpush3.msra.mxu1 %v5039_v6  ;;  %v5037_v27 = vld [vmem:[#allocation15 + $0x18] sm:$0xff]  ;;  %v5036_v28 = vld [vmem:[#allocation15 + $0x10] sm:$0xff]  ;;  %v5035_v29 = vld [vmem:[#allocation15 + $0x8] sm:$0xff] }
 0x44f   : > { %6810 = vmatprep.subr.mxu0 %v7318_v63  ;;  %6843 = vmatprep.subr.mxu1 %v7318_v63  ;;  %v4914_v18 = vmul.f32 %v5294_v15, %v4906_v14  ;;  %v5034_v30 = vld [vmem:[#allocation15] sm:$0xff]  ;;  %v5296_v31 = vld [vmem:[#allocation11] ss:$0 sm:$0xff]  ;;  %v5297_v33 = vld [vmem:[#allocation12] ss:$0 sm:$0xff] }
 0x450   : > { %6811 = vmatpush3.msra.mxu0 %v4935_v4  ;;  %6844 = vmatpush3.msra.mxu1 %v5038_v26  ;;  %v5298_v35 = vld [vmem:[#allocation14] ss:$0 sm:$0xff]  ;;  %v5299_v40 = vld [vmem:[#allocation17] ss:$0 sm:$0xff] }
 0x451   : > { %6812 = vmatprep.subr.mxu0 %v7318_v63  ;;  %v4922_v22 = vadd.f32 %v5295_v19, %v4914_v18  ;;  %6845 = vmatprep.subr.mxu1 %v7318_v63 }
 0x452   : > { %6813 = vmatpush3.msra.mxu0 %v4934_v7  ;;  %6846 = vmatpush3.msra.mxu1 %v5037_v27 }
 0x453   : > { %6814 = vmatprep.subr.mxu0 %v7318_v63  ;;  %v4923_v25 = vmax.f32 %v4922_v22, 0.0  ;;  %6847 = vmatprep.subr.mxu1 %v7318_v63 }
 0x454   : > { %6815 = vmatpush3.msra.mxu0 %v4933_v8  ;;  %6848 = vmatpush3.msra.mxu1 %v5036_v28 }
 0x455   : > { %6816 = vmatprep.subr.mxu0 %v7318_v63  ;;  %6849 = vmatprep.subr.mxu1 %v7318_v63 }
 0x456   : > { %6817 = vmatpush3.msra.mxu0 %v4932_v9  ;;  %6850 = vmatpush3.msra.mxu1 %v5035_v29 }
 0x457   : > { %6818 = vmatprep.subr.mxu0 %v7318_v63  ;;  %6851 = vmatprep.subr.mxu1 %v7318_v63 }
 0x458   : > { %6819 = vmatpush3.msra.mxu0 %v4931_v12  ;;  %6852 = vmatpush3.msra.mxu1 %v5034_v30 }
 0x459   : > { %6820 = vmatprep.subr.mxu0 %v7318_v63 }
 0x45a   : > { %6821 = vmatpush3.msra.mxu0 %v4930_v13 }
 0x45b   : > { %6822 = vmatprep.subr.mxu0 %v7318_v63 }
 0x45c   : > { %6823 = vmatpush3.msra.mxu0 %v4929_v16 }
 0x45d   : > { %6824 = vmatprep.subr.mxu0 %v7318_v63 }
 0x45e   : > { %6825 = vmatpush3.msra.mxu0 %v4928_v17 }
 0x45f   : > { %6826 = vmatprep.subr.mxu0 %v7318_v63 }
 0x460   : > { %6827 = vmatpush3.msra.mxu0 %v4927_v20 }
 0x461   : > { %6828 = vmatprep.subr.mxu0 %v7318_v63 }
 0x462   : > { %6829 = vmatpush3.msra.mxu0 %v4926_v21 }
 0x463   : > { %6830 = vmatprep.subr.mxu0 %v7318_v63 }
 0x464   : > { %6831 = vmatpush3.msra.mxu0 %v4925_v23 }
 0x465   : > { %6832 = vmatprep.subr.mxu0 %v7318_v63 }
 0x466   : > { %6833 = vmatpush3.msra.mxu0 %v4924_v24 }
 0x467   : > { %6835 = vmatmul.mubr.f32.vlgmr.msra.gmra.mxu0 %v4923_v25 }
 0x527   : > { %v5013_v32 = vpop.f32.mrf.mxu0 }
 0x528   : > { %v5014_v34 = vadd.f32 %v5296_v31, %v5013_v32 }
 0x529   : > { %v6836_v36 = vpop.f32.mrf.mxu0 }
 0x52a   : > { %v5024_v37 = vmul.f32 %v5297_v33, %v5014_v34 }
 0x52c   : > { %v5032_v38 = vadd.f32 %v5298_v35, %v5024_v37 }
 0x52e   : > { %v5033_v39 = vmax.f32 %v5032_v38, 0.0 }
 0x530   : > { %6854 = vmatmul.mubr.msk.f32.vlgmr.msra.gmra.mxu1 %vm5049_vm1, %v5033_v39 }
 0x5f0   : > { %v5119_v41 = vpop.f32.mrf.mxu1 }
 0x5f1   : > { %v5120_v42 = vadd.f32 %v5299_v40, %v5119_v41 }
 0x5f2   : > { %v6855_v43 = vpop.f32.mrf.mxu1 }
 0x5f3   : > { %5123 = vst [vmem:[#allocation18] sm:$0xff] %v5120_v42 }
 0x5f4 PF: > { %p6942_p8 = scmp.eq.s32.totalorder %s7402_s23, 2  ;;  %s7320_s26 = smov [#allocation18]  }
 0x5f5   : > { %s5131_s27 = sshll.u32 %s7320_s26, 4  ;;  %s5132_s27 = int_to_ptr.vmem [resolvable:$true] %s5131_s27 }
 0x5f6   : > { %s7226_s2 = scalar_lea.vmem %s5132_s27, 128  ;;  %p7233_p6 = scmp.lt.s32.totalorder %s5132_s27, %s5132_s27 }
 0x5f7   : > { %p7227_p3 = scmp.ne.s32.totalorder %s5132_s27, %s7226_s2  ;;  %p7234_p10 = scmp.lt.s32.totalorder %s7226_s2, %s7226_s2 }
 0x5f9   : > { %p7228_p5 = pnand %p7227_p3, %p6942_p8  ;;  %p7235_p7 = por %p7234_p10, %p7233_p6 }
 0x5fb   : > { %p7229_p9 = pneg %p7228_p5 }
 0x5fd   : > { %p7236_p11 = pnand %p7235_p7, %p7229_p9 }
 0x5ff   : > { %7239 = shalt.err (!%p7236_p11)
}
 0x600   : > { %6893 = dma.vmem_to_hbm [thread:$0]  (%p6942_p8), %s5132_s27, 128, %s9134_s11, [#allocation5]  }
 0x601   : > { %7287 = dma.done.wait (%p6942_p8), [#allocation5], 128  }
 0x602   : > { %7289 = vsyncadd (%p6942_p8), [#allocation5], 4294967168 }
 0x603 PF: > { %p26_p1 = scmp.ge.s32.totalorder %s7505_s13, 5   ;;  %s9161_s17 = smov %s7296_s18 }
 0x604   : > { %s9162_s18 = smov %s7300_s19  ;;  %s9163_s19 = smov %s7517_s12 }
 0x605   : > { %s9164_s20 = smov %s7505_s13  ;;  %28 = sbr.rel (!%p26_p1) target bundleno = 10 (0xa), region = 144 }
 0x60a   :  { %5144 = vsyncpa [#allocation4], 1 }
 0x60b   :  { %5146 = vsyncpa [#allocation4 + $0x1], 1 }
 0x60c   :  { %5147 = vsyncpa [#allocation7], 1 }
 0x60d   :  { %5148 = vsyncpa [#allocation10], 1 }
 0x60e   :  { %5149 = vsyncpa [#allocation13], 1 }
 0x60f   :  { %5150 = vsyncpa [#allocation16], 1 }
 0x610   :  { %5151 = vsyncpa [#allocation5], 1 }
 0x611   :  { %5153 = vsyncpa [#allocation5 + $0x1], 1 }

</bundles_post_ra>
